<compile_context>
chip_gen: v6e
topology: v6e:2x2x1
jax: 0.10.0
libtpu: 0.0.40
codegen_flags: <defaults>
</compile_context>

<pallas_src>
import functools

import numpy as np
import jax
import jax.numpy as jnp
from jax import lax
from jax.experimental import pallas as pl
from jax.experimental.pallas import tpu as pltpu

VMEM_LIMIT_BYTES = 64 * 1024 * 1024


# --------------------------------------------------------------------------
# Trace-time constant helpers
# --------------------------------------------------------------------------
def _group_one_hot(C, G):
    """(G, C) one-hot 'channel c belongs to group g' and its transpose."""
    g = np.arange(C) // (C // G)
    P = (np.arange(G)[:, None] == g[None, :]).astype(np.float32)
    return P, np.ascontiguousarray(P.T)


def _conv_tap_shifts_and_masks(H, W):
    """Lane-roll shifts and validity masks for a 3x3 / pad=1 conv on a
    row-major flattened (H*W) spatial axis."""
    S = H * W
    idx = np.arange(S)
    hh, ww = idx // W, idx % W
    shifts, masks = [], []
    for kh in range(3):
        for kw in range(3):
            dh, dw = kh - 1, kw - 1
            off = dh * W + dw
            shifts.append((-off) % S)  # rolled[:, i] == x[:, (i + off) % S]
            valid = ((hh + dh >= 0) & (hh + dh < H) &
                     (ww + dw >= 0) & (ww + dw < W))
            masks.append(valid.astype(np.float32))
    return tuple(shifts), np.stack(masks, axis=0)  # (9,), (9, S)


def _const_spec(a):
    """BlockSpec for a weight/constant: whole array, same block every step."""
    r = a.ndim
    return pl.BlockSpec(a.shape, lambda n, r=r: (0,) * r)


# --------------------------------------------------------------------------
# Fused ResnetBlock2D kernel (per-image grid step).
# Activations carried as (C, S): channels on sublanes, spatial on lanes.
# --------------------------------------------------------------------------
@functools.lru_cache(maxsize=None)
def _make_resnet_kernel(C, S, G, shifts, eps=1e-5):
    cnt = float((C // G) * S)
    center = shifts.index(0)

    def gn_silu(x, P, Pt, gamma, beta):
        # Per-group stats via one-hot group-sum + broadcast-back.
        sum_c = jnp.sum(x, axis=1, keepdims=True)                       # (C, 1)
        mean_c = jnp.dot(Pt, jnp.dot(P, sum_c,
                                     preferred_element_type=jnp.float32),
                         preferred_element_type=jnp.float32) / cnt      # (C, 1)
        d = x - mean_c
        ss_c = jnp.sum(d * d, axis=1, keepdims=True)
        var_c = jnp.dot(Pt, jnp.dot(P, ss_c,
                                    preferred_element_type=jnp.float32),
                        preferred_element_type=jnp.float32) / cnt
        y = d * lax.rsqrt(var_c + eps) * gamma + beta
        return y * jax.nn.sigmoid(y)                                    # SiLU

    def conv3x3(h, w_ref, masks, bias):
        # Per-tap accumulation: 9 x (Cout,Cin)@(Cin,S) bf16 MXU dots, f32 acc.
        # TODO(synk): K-tile (or Cout-tile) w_ref at SDXL C=1280 for v7x VMEM.
        acc = jnp.dot(w_ref[center], h.astype(jnp.bfloat16),
                      preferred_element_type=jnp.float32)
        for t, sh in enumerate(shifts):
            if t == center:
                continue
            tap = (pltpu.roll(h, sh, axis=1) * masks[t:t + 1, :]
                   ).astype(jnp.bfloat16)
            acc = acc + jnp.dot(w_ref[t], tap,
                                preferred_element_type=jnp.float32)
        return acc + bias

    def kernel(x_ref, temb_ref, mask_ref, P_ref, Pt_ref,
               g1_ref, b1_ref, w1_ref, c1_ref,
               g2_ref, b2_ref, w2_ref, c2_ref, o_ref):
        x = x_ref[0].astype(jnp.float32)                # (C, S)
        P, Pt = P_ref[...], Pt_ref[...]
        masks = mask_ref[...]                           # (9, S)

        h = gn_silu(x, P, Pt, g1_ref[...], b1_ref[...])
        # conv1 bias + (pre-projected) time-embedding bias, both (C, 1)
        h = conv3x3(h, w1_ref, masks,
                    c1_ref[...] + temb_ref[0].astype(jnp.float32))
        h = gn_silu(h, P, Pt, g2_ref[...], b2_ref[...])
        h = conv3x3(h, w2_ref, masks, c2_ref[...])
        o_ref[0] = (x + h).astype(o_ref.dtype)          # identity shortcut

    return kernel


def resnet_forward(x2, emb, p, *, H, W, groups, eps=1e-5, out_dtype=None):
    """x2: (N, C, H*W) channel-major; emb: (N, Temb)."""
    N, C, S = x2.shape
    out_dtype = out_dtype or x2.dtype
    shifts, masks = _conv_tap_shifts_and_masks(H, W)
    P, Pt = _group_one_hot(C, groups)
    kernel = _make_resnet_kernel(C, S, groups, shifts, eps)

    # Time-embedding projection hoisted out of the kernel: one batched matmul.
    temb = (jnp.dot(jax.nn.silu(emb), p["temb_w"].T) + p["temb_b"])
    temb = temb.reshape(N, C, 1)

    args = (
        x2, temb, jnp.asarray(masks), jnp.asarray(P), jnp.asarray(Pt),
        p["gn1_g"].reshape(C, 1), p["gn1_b"].reshape(C, 1),
        p["conv1_w"], p["conv1_b"].reshape(C, 1),
        p["gn2_g"].reshape(C, 1), p["gn2_b"].reshape(C, 1),
        p["conv2_w"], p["conv2_b"].reshape(C, 1),
    )
    img = pl.BlockSpec((1, C, S), lambda n: (n, 0, 0))
    temb_spec = pl.BlockSpec((1, C, 1), lambda n: (n, 0, 0))
    in_specs = [img, temb_spec] + [_const_spec(a) for a in args[2:]]

    return pl.pallas_call(
        kernel,
        grid_spec=pltpu.PrefetchScalarGridSpec(
            num_scalar_prefetch=0, grid=(N,),
            in_specs=in_specs,
            out_specs=pl.BlockSpec((1, C, S), lambda n: (n, 0, 0))),
        out_shape=jax.ShapeDtypeStruct((N, C, S), out_dtype),
        compiler_params=pltpu.CompilerParams(
            dimension_semantics=("parallel",),
            vmem_limit_bytes=VMEM_LIMIT_BYTES),
    )(*args)


# --------------------------------------------------------------------------
# Fused Transformer2DModel kernel (use_linear_projection=True, 1 basic block):
# GroupNorm -> proj_in -> [self-attn, cross-attn, GEGLU FF] -> proj_out -> +res.
# Everything stays channel-major (D, S); weights are stored (out, in).
# --------------------------------------------------------------------------
@functools.lru_cache(maxsize=None)
def _make_transformer_kernel(C, S, G, heads, Dff, eps_gn=1e-6, eps_ln=1e-5):
    D = C                          # inner_dim == channels (linear projection)
    dh = D // heads
    scale = 1.0 / float(np.sqrt(dh))
    cnt = float((C // G) * S)

    def groupnorm(x, P, Pt, gamma, beta):
        sum_c = jnp.sum(x, axis=1, keepdims=True)
        mean_c = jnp.dot(Pt, jnp.dot(P, sum_c,
                                     preferred_element_type=jnp.float32),
                         preferred_element_type=jnp.float32) / cnt
        d = x - mean_c
        ss_c = jnp.sum(d * d, axis=1, keepdims=True)
        var_c = jnp.dot(Pt, jnp.dot(P, ss_c,
                                    preferred_element_type=jnp.float32),
                        preferred_element_type=jnp.float32) / cnt
        return d * lax.rsqrt(var_c + eps_gn) * gamma + beta

    def layernorm(x, gamma, beta):
        # Normalize over the channel (sublane) axis.
        m = jnp.mean(x, axis=0, keepdims=True)
        d = x - m
        v = jnp.mean(d * d, axis=0, keepdims=True)
        return d * lax.rsqrt(v + eps_ln) * gamma + beta

    def attention(q, k, v, bias=None):
        # q: (D, Sq), k/v: (D, Skv); heads become a batch dim of one
        # dot_general (no sub-128-lane slices, no narrow concat).
        Sq, Skv = q.shape[-1], k.shape[-1]
        qh = q.reshape(heads, dh, Sq).astype(jnp.bfloat16)
        kh = k.reshape(heads, dh, Skv).astype(jnp.bfloat16)
        vh = v.reshape(heads, dh, Skv).astype(jnp.bfloat16)
        s = lax.dot_general(qh, kh, (((1,), (1,)), ((0,), (0,))),
                            preferred_element_type=jnp.float32) * scale
        if bias is not None:
            s = s + bias                              # (1,1,Skv) additive mask
        s = s - jnp.max(s, axis=-1, keepdims=True)
        p = jnp.exp(s)
        p = p * pl.reciprocal(jnp.sum(p, axis=-1, keepdims=True), approx=True)
        o = lax.dot_general(vh, p.astype(jnp.bfloat16),
                            (((2,), (2,)), ((0,), (0,))),
                            preferred_element_type=jnp.float32)  # (h, dh, Sq)
        return o.reshape(D, Sq)

    def mm(w_ref, x, b=None):
        y = jnp.dot(w_ref[...], x.astype(jnp.bfloat16),
                    preferred_element_type=jnp.float32)
        return y if b is None else y + b

    def kernel(x_ref, enc_ref, encmask_ref, P_ref, Pt_ref,
               gn_g, gn_b, pin_w, pin_b,
               ln1_g, ln1_b, qkv1_w, out1_w, out1_b,
               ln2_g, ln2_b, q2_w, kv2_w, out2_w, out2_b,
               ln3_g, ln3_b, geglu_w, geglu_b, ffo_w, ffo_b,
               pout_w, pout_b, o_ref):
        x = x_ref[0].astype(jnp.float32)                # (C, S) channel-major
        P, Pt = P_ref[...], Pt_ref[...]

        # GroupNorm (no activation) + linear proj_in
        h = mm(pin_w, groupnorm(x, P, Pt, gn_g[...], gn_b[...]), pin_b[...])

        # --- BasicTransformerBlock ---
        # self-attention
        hn = layernorm(h, ln1_g[...], ln1_b[...])
        qkv = mm(qkv1_w, hn)                            # (3D, S)
        a = attention(qkv[:D], qkv[D:2 * D], qkv[2 * D:])
        h = h + mm(out1_w, a, out1_b[...])

        # cross-attention (padded encoder tokens masked to -1e30)
        hn = layernorm(h, ln2_g[...], ln2_b[...])
        q = mm(q2_w, hn)                                # (D, S)
        kv = jnp.dot(kv2_w[...], enc_ref[0],
                     preferred_element_type=jnp.float32)  # (2D, Lpad)
        a = attention(q, kv[:D], kv[D:], bias=encmask_ref[...])
        h = h + mm(out2_w, a, out2_b[...])

        # feed-forward (GEGLU)
        hn = layernorm(h, ln3_g[...], ln3_b[...])
        g = mm(geglu_w, hn, geglu_b[...])               # (2*Dff, S)
        # TODO(synk): diffusers GEGLU uses exact (erf) GELU; tanh approx here.
        ff = g[:Dff] * jax.nn.gelu(g[Dff:], approximate=True)
        h = h + mm(ffo_w, ff, ffo_b[...])

        # proj_out + outer residual
        o_ref[0] = (mm(pout_w, h, pout_b[...]) + x).astype(o_ref.dtype)

    return kernel


def transformer_forward(x2, encoder_hidden_states, p, *, groups, heads,
                        out_dtype=None):
    """x2: (N, C, H*W) channel-major; encoder_hidden_states: (N, Lenc, Denc)."""
    N, C, S = x2.shape
    out_dtype = out_dtype or x2.dtype
    Dff = p["ffo_w"].shape[1]
    P, Pt = _group_one_hot(C, groups)
    kernel = _make_transformer_kernel(C, S, groups, heads, Dff)

    # Pad encoder tokens to a 128-lane multiple; pre-transpose to (Denc, Lpad).
    Lenc, Denc = encoder_hidden_states.shape[1], encoder_hidden_states.shape[2]
    Lpad = ((Lenc + 127) // 128) * 128
    encT = jnp.transpose(encoder_hidden_states, (0, 2, 1)).astype(jnp.bfloat16)
    encT = jnp.pad(encT, ((0, 0), (0, 0), (0, Lpad - Lenc)))
    enc_mask = jnp.where(jnp.arange(Lpad) < Lenc, 0.0, -1e30
                         ).astype(jnp.float32).reshape(1, 1, Lpad)

    col = lambda v: v.reshape(-1, 1)
    args = (
        x2, encT, enc_mask, jnp.asarray(P), jnp.asarray(Pt),
        col(p["gn_g"]), col(p["gn_b"]),
        p["pin_w"], col(p["pin_b"]),
        col(p["ln1_g"]), col(p["ln1_b"]),
        p["qkv1_w"], p["out1_w"], col(p["out1_b"]),
        col(p["ln2_g"]), col(p["ln2_b"]),
        p["q2_w"], p["kv2_w"], p["out2_w"], col(p["out2_b"]),
        col(p["ln3_g"]), col(p["ln3_b"]),
        p["geglu_w"], col(p["geglu_b"]),
        p["ffo_w"], col(p["ffo_b"]),
        p["pout_w"], col(p["pout_b"]),
    )
    img = pl.BlockSpec((1, C, S), lambda n: (n, 0, 0))
    enc_spec = pl.BlockSpec((1, Denc, Lpad), lambda n: (n, 0, 0))
    in_specs = [img, enc_spec] + [_const_spec(a) for a in args[2:]]

    return pl.pallas_call(
        kernel,
        grid_spec=pltpu.PrefetchScalarGridSpec(
            num_scalar_prefetch=0, grid=(N,),
            in_specs=in_specs,
            out_specs=pl.BlockSpec((1, C, S), lambda n: (n, 0, 0))),
        out_shape=jax.ShapeDtypeStruct((N, C, S), out_dtype),
        compiler_params=pltpu.CompilerParams(
            dimension_semantics=("parallel",),
            vmem_limit_bytes=VMEM_LIMIT_BYTES),
    )(*args)


# --------------------------------------------------------------------------
# UnetMidBlockLayer forward (has_cross_attention=True branch)
# --------------------------------------------------------------------------
def unet_mid_block_forward(inputs, params):
    (sample, timesteps, emb, encoder_hidden_states,
     *down_block_res_samples, forward_upsample_size) = inputs

    N, C, H, W = sample.shape
    x = sample.reshape(N, C, H * W)      # free reshape: keeps NCHW memory layout
    G, heads = params["groups"], params["heads"]

    # Inter-kernel intermediates in bf16 (halves HBM round-trip traffic);
    # final output converted back to the input dtype.
    x = resnet_forward(x, emb, params["resnets"][0], H=H, W=W, groups=G,
                       out_dtype=jnp.bfloat16)
    x = transformer_forward(x, encoder_hidden_states, params["attn"],
                            groups=G, heads=heads, out_dtype=jnp.bfloat16)
    x = resnet_forward(x, emb, params["resnets"][1], H=H, W=W, groups=G,
                       out_dtype=sample.dtype)

    sample_out = x.reshape(N, C, H, W)
    # make_contiguous is a no-op for JAX arrays; pass everything else through.
    return (sample_out, timesteps, emb, encoder_hidden_states,
            *down_block_res_samples, forward_upsample_size)


# --------------------------------------------------------------------------
# Deterministic synthetic parameters (shapes follow UNetMidBlock2DCrossAttn,
# stored directly in the kernel-friendly layouts documented above).
# --------------------------------------------------------------------------
def init_params(key, *, channels=32, temb_ch=32, groups=8, heads=2,
                cross_dim=64, ff_mult=4):
    C, D = channels, channels
    Dff = ff_mult * D
    keys = iter(jax.random.split(key, 64))
    bf = jnp.bfloat16

    def w(shape, scale=0.05, dtype=jnp.float32):
        return (scale * jax.random.normal(next(keys), shape, jnp.float32)
                ).astype(dtype)

    def conv_w(cin, cout):
        # (kh, kw, cin, cout) -> per-tap matmul layout (9, cout, cin), bf16
        k = w((3, 3, cin, cout))
        return jnp.transpose(k.reshape(9, cin, cout), (0, 2, 1)).astype(bf)

    def resnet_p(c):
        return {
            "gn1_g": jnp.ones((c,), jnp.float32), "gn1_b": jnp.zeros((c,), jnp.float32),
            "conv1_w": conv_w(c, c), "conv1_b": w((c,)),
            "temb_w": w((c, temb_ch)), "temb_b": w((c,)),
            "gn2_g": jnp.ones((c,), jnp.float32), "gn2_b": jnp.zeros((c,), jnp.float32),
            "conv2_w": conv_w(c, c), "conv2_b": w((c,)),
        }

    # Transformer weights stored (out, in) = torch Linear layout -> y = W @ x
    # in the channel-major kernel (no in-kernel transposes), bf16 for the MXU.
    attn_p = {
        "gn_g": jnp.ones((C,), jnp.float32), "gn_b": jnp.zeros((C,), jnp.float32),
        "pin_w": w((D, C), dtype=bf), "pin_b": w((D,)),
        "ln1_g": jnp.ones((D,), jnp.float32), "ln1_b": jnp.zeros((D,), jnp.float32),
        "qkv1_w": w((3 * D, D), dtype=bf),
        "out1_w": w((D, D), dtype=bf), "out1_b": w((D,)),
        "ln2_g": jnp.ones((D,), jnp.float32), "ln2_b": jnp.zeros((D,), jnp.float32),
        "q2_w": w((D, D), dtype=bf), "kv2_w": w((2 * D, cross_dim), dtype=bf),
        "out2_w": w((D, D), dtype=bf), "out2_b": w((D,)),
        "ln3_g": jnp.ones((D,), jnp.float32), "ln3_b": jnp.zeros((D,), jnp.float32),
        "geglu_w": w((2 * Dff, D), dtype=bf), "geglu_b": w((2 * Dff,)),
        "ffo_w": w((D, Dff), dtype=bf), "ffo_b": w((D,)),
        "pout_w": w((C, D), dtype=bf), "pout_b": w((C,)),
    }
    return {"groups": groups, "heads": heads,
            "resnets": [resnet_p(C), resnet_p(C)], "attn": attn_p}


if __name__ == "__main__":
    key = jax.random.PRNGKey(0)
    k_s, k_e, k_enc, k_r1, k_r2, k_p = jax.random.split(key, 6)

    N, C, H, W = 2, 32, 16, 16
    temb_ch, cross_dim, enc_len = 32, 64, 8

    sample = jax.random.normal(k_s, (N, C, H, W), jnp.float32)           # NCHW
    timesteps = jnp.array([10.0, 500.0], jnp.float32)
    emb = jax.random.normal(k_e, (N, temb_ch), jnp.float32)
    encoder_hidden_states = jax.random.normal(k_enc, (N, enc_len, cross_dim),
                                              jnp.float32)
    res1 = jax.random.normal(k_r1, (N, C, H, W), jnp.float32)            # passthrough
    res2 = jax.random.normal(k_r2, (N, C, 2 * H, 2 * W), jnp.float32)    # passthrough
    forward_upsample_size = False

    params = init_params(k_p, channels=C, temb_ch=temb_ch, groups=8, heads=2,
                         cross_dim=cross_dim)

    inputs = (sample, timesteps, emb, encoder_hidden_states, res1, res2,
              forward_upsample_size)
    outputs = unet_mid_block_forward(inputs, params)
    jax.block_until_ready([o for o in outputs if isinstance(o, jax.Array)])

    assert len(outputs) == len(inputs)
    assert outputs[0].shape == (N, C, H, W)
    assert outputs[0].dtype == jnp.float32
    assert bool(jnp.isfinite(outputs[0]).all())
    assert outputs[1] is timesteps and outputs[3] is encoder_hidden_states
    assert outputs[4] is res1 and outputs[5] is res2
    print("KERNEL_OK")
</pallas_src>

<mosaic_0001>
module attributes {stable_mosaic.version = 11 : i64} {
  func.func @kernel(%arg0: i32, %arg1: memref<1x32x256xf32, #tpu.memory_space<vmem>>, %arg2: memref<1x32x1xf32, #tpu.memory_space<vmem>>, %arg3: memref<9x256xf32, #tpu.memory_space<vmem>>, %arg4: memref<8x32xf32, #tpu.memory_space<vmem>>, %arg5: memref<32x8xf32, #tpu.memory_space<vmem>>, %arg6: memref<32x1xf32, #tpu.memory_space<vmem>>, %arg7: memref<32x1xf32, #tpu.memory_space<vmem>>, %arg8: memref<9x32x32xbf16, #tpu.memory_space<vmem>>, %arg9: memref<32x1xf32, #tpu.memory_space<vmem>>, %arg10: memref<32x1xf32, #tpu.memory_space<vmem>>, %arg11: memref<32x1xf32, #tpu.memory_space<vmem>>, %arg12: memref<9x32x32xbf16, #tpu.memory_space<vmem>>, %arg13: memref<32x1xf32, #tpu.memory_space<vmem>>, %arg14: memref<1x32x256xbf16, #tpu.memory_space<vmem>>) attributes {dimension_semantics = [#tpu.dimension_semantics<parallel>], iteration_bounds = array<i64: 2>, scalar_prefetch = 0 : i64, scratch_operands = 0 : i64, tpu.core_type = #tpu.core_type<tc>, window_params = [{transform_indices = @transform_0, window_bounds = array<i64: 1, 32, 256>}, {transform_indices = @transform_1, window_bounds = array<i64: 1, 32, 1>}, {pipeline_mode = #tpu.pipeline_mode<synchronous>, transform_indices = @transform_2, window_bounds = array<i64: 9, 256>}, {pipeline_mode = #tpu.pipeline_mode<synchronous>, transform_indices = @transform_3, window_bounds = array<i64: 8, 32>}, {pipeline_mode = #tpu.pipeline_mode<synchronous>, transform_indices = @transform_4, window_bounds = array<i64: 32, 8>}, {pipeline_mode = #tpu.pipeline_mode<synchronous>, transform_indices = @transform_5, window_bounds = array<i64: 32, 1>}, {pipeline_mode = #tpu.pipeline_mode<synchronous>, transform_indices = @transform_6, window_bounds = array<i64: 32, 1>}, {pipeline_mode = #tpu.pipeline_mode<synchronous>, transform_indices = @transform_7, window_bounds = array<i64: 9, 32, 32>}, {pipeline_mode = #tpu.pipeline_mode<synchronous>, transform_indices = @transform_8, window_bounds = array<i64: 32, 1>}, {pipeline_mode = #tpu.pipeline_mode<synchronous>, transform_indices = @transform_9, window_bounds = array<i64: 32, 1>}, {pipeline_mode = #tpu.pipeline_mode<synchronous>, transform_indices = @transform_10, window_bounds = array<i64: 32, 1>}, {pipeline_mode = #tpu.pipeline_mode<synchronous>, transform_indices = @transform_11, window_bounds = array<i64: 9, 32, 32>}, {pipeline_mode = #tpu.pipeline_mode<synchronous>, transform_indices = @transform_12, window_bounds = array<i64: 32, 1>}, {transform_indices = @transform_13, window_bounds = array<i64: 1, 32, 256>}]} {
    %c0 = arith.constant 0 : index
    %c0_0 = arith.constant 0 : index
    %c0_1 = arith.constant 0 : index
    %0 = vector.load %arg1[%c0, %c0_0, %c0_1] : memref<1x32x256xf32, #tpu.memory_space<vmem>>, vector<1x32x256xf32>
    %1 = vector.shape_cast %0 : vector<1x32x256xf32> to vector<32x256xf32>
    %c0_2 = arith.constant 0 : index
    %c0_3 = arith.constant 0 : index
    %2 = vector.load %arg4[%c0_2, %c0_3] : memref<8x32xf32, #tpu.memory_space<vmem>>, vector<8x32xf32>
    %c0_4 = arith.constant 0 : index
    %c0_5 = arith.constant 0 : index
    %3 = vector.load %arg5[%c0_4, %c0_5] : memref<32x8xf32, #tpu.memory_space<vmem>>, vector<32x8xf32>
    %c0_6 = arith.constant 0 : index
    %c0_7 = arith.constant 0 : index
    %4 = vector.load %arg3[%c0_6, %c0_7] : memref<9x256xf32, #tpu.memory_space<vmem>>, vector<9x256xf32>
    %c0_8 = arith.constant 0 : index
    %c0_9 = arith.constant 0 : index
    %5 = vector.load %arg6[%c0_8, %c0_9] : memref<32x1xf32, #tpu.memory_space<vmem>>, vector<32x1xf32>
    %c0_10 = arith.constant 0 : index
    %c0_11 = arith.constant 0 : index
    %6 = vector.load %arg7[%c0_10, %c0_11] : memref<32x1xf32, #tpu.memory_space<vmem>>, vector<32x1xf32>
    %cst = arith.constant dense<0.000000e+00> : vector<32xf32>
    %7 = vector.multi_reduction <add>, %1, %cst [1] : vector<32x256xf32> to vector<32xf32>
    %8 = vector.shape_cast %7 : vector<32xf32> to vector<32x1xf32>
    %cst_12 = arith.constant dense<0.000000e+00> : vector<8x1xf32>
    %9 = tpu.matmul %2, %8, %cst_12 {dimension_numbers = #tpu.dot_dimension_numbers<[1], [0], [0], [1], [0, 0, 1, 1], [], []>} : vector<8x32xf32>, vector<32x1xf32>, vector<8x1xf32> -> vector<8x1xf32>
    %cst_13 = arith.constant dense<0.000000e+00> : vector<32x1xf32>
    %10 = tpu.matmul %3, %9, %cst_13 {dimension_numbers = #tpu.dot_dimension_numbers<[1], [0], [0], [1], [0, 0, 1, 1], [], []>} : vector<32x8xf32>, vector<8x1xf32>, vector<32x1xf32> -> vector<32x1xf32>
    %cst_14 = arith.constant 1.024000e+03 : f32
    %11 = vector.broadcast %cst_14 : f32 to vector<32x1xf32>
    %12 = arith.divf %10, %11 : vector<32x1xf32>
    %13 = vector.broadcast %12 : vector<32x1xf32> to vector<32x256xf32>
    %14 = arith.subf %1, %13 : vector<32x256xf32>
    %15 = arith.mulf %14, %14 : vector<32x256xf32>
    %cst_15 = arith.constant dense<0.000000e+00> : vector<32xf32>
    %16 = vector.multi_reduction <add>, %15, %cst_15 [1] : vector<32x256xf32> to vector<32xf32>
    %17 = vector.shape_cast %16 : vector<32xf32> to vector<32x1xf32>
    %cst_16 = arith.constant dense<0.000000e+00> : vector<8x1xf32>
    %18 = tpu.matmul %2, %17, %cst_16 {dimension_numbers = #tpu.dot_dimension_numbers<[1], [0], [0], [1], [0, 0, 1, 1], [], []>} : vector<8x32xf32>, vector<32x1xf32>, vector<8x1xf32> -> vector<8x1xf32>
    %cst_17 = arith.constant dense<0.000000e+00> : vector<32x1xf32>
    %19 = tpu.matmul %3, %18, %cst_17 {dimension_numbers = #tpu.dot_dimension_numbers<[1], [0], [0], [1], [0, 0, 1, 1], [], []>} : vector<32x8xf32>, vector<8x1xf32>, vector<32x1xf32> -> vector<32x1xf32>
    %cst_18 = arith.constant 1.024000e+03 : f32
    %20 = vector.broadcast %cst_18 : f32 to vector<32x1xf32>
    %21 = arith.divf %19, %20 : vector<32x1xf32>
    %cst_19 = arith.constant 9.99999974E-6 : f32
    %22 = vector.broadcast %cst_19 : f32 to vector<32x1xf32>
    %23 = arith.addf %21, %22 : vector<32x1xf32>
    %24 = math.rsqrt %23 : vector<32x1xf32>
    %25 = vector.broadcast %24 : vector<32x1xf32> to vector<32x256xf32>
    %26 = arith.mulf %14, %25 : vector<32x256xf32>
    %27 = vector.broadcast %5 : vector<32x1xf32> to vector<32x256xf32>
    %28 = arith.mulf %26, %27 : vector<32x256xf32>
    %29 = vector.broadcast %6 : vector<32x1xf32> to vector<32x256xf32>
    %30 = arith.addf %28, %29 : vector<32x256xf32>
    %31 = arith.negf %30 : vector<32x256xf32>
    %32 = math.exp %31 : vector<32x256xf32>
    %cst_20 = arith.constant 1.000000e+00 : f32
    %33 = vector.broadcast %cst_20 : f32 to vector<32x256xf32>
    %34 = arith.addf %33, %32 : vector<32x256xf32>
    %35 = arith.divf %33, %34 : vector<32x256xf32>
    %36 = arith.mulf %30, %35 : vector<32x256xf32>
    %c0_21 = arith.constant 0 : index
    %c0_22 = arith.constant 0 : index
    %37 = vector.load %arg9[%c0_21, %c0_22] : memref<32x1xf32, #tpu.memory_space<vmem>>, vector<32x1xf32>
    %c0_23 = arith.constant 0 : index
    %c0_24 = arith.constant 0 : index
    %c0_25 = arith.constant 0 : index
    %38 = vector.load %arg2[%c0_23, %c0_24, %c0_25] : memref<1x32x1xf32, #tpu.memory_space<vmem>>, vector<1x32x1xf32>
    %39 = vector.shape_cast %38 : vector<1x32x1xf32> to vector<32x1xf32>
    %40 = arith.addf %37, %39 : vector<32x1xf32>
    %c4 = arith.constant 4 : index
    %c0_26 = arith.constant 0 : index
    %c0_27 = arith.constant 0 : index
    %41 = vector.load %arg8[%c4, %c0_26, %c0_27] : memref<9x32x32xbf16, #tpu.memory_space<vmem>>, vector<1x32x32xbf16>
    %42 = vector.shape_cast %41 : vector<1x32x32xbf16> to vector<32x32xbf16>
    %43 = arith.truncf %36 : vector<32x256xf32> to vector<32x256xbf16>
    %cst_28 = arith.constant dense<0.000000e+00> : vector<32x256xf32>
    %44 = tpu.matmul %42, %43, %cst_28 {dimension_numbers = #tpu.dot_dimension_numbers<[1], [0], [0], [1], [0, 0, 1, 1], [], []>} : vector<32x32xbf16>, vector<32x256xbf16>, vector<32x256xf32> -> vector<32x256xf32>
    %c17_i32 = arith.constant 17 : i32
    %45 = tpu.dynamic_rotate %36 by %c17_i32 dim 1 : vector<32x256xf32>, i32 -> vector<32x256xf32>
    %46 = vector.extract_strided_slice %4 {offsets = [0, 0], sizes = [1, 256], strides = [1, 1]} : vector<9x256xf32> to vector<1x256xf32>
    %47 = vector.broadcast %46 : vector<1x256xf32> to vector<32x256xf32>
    %48 = arith.mulf %45, %47 : vector<32x256xf32>
    %49 = arith.truncf %48 : vector<32x256xf32> to vector<32x256xbf16>
    %c0_29 = arith.constant 0 : index
    %c0_30 = arith.constant 0 : index
    %c0_31 = arith.constant 0 : index
    %50 = vector.load %arg8[%c0_29, %c0_30, %c0_31] : memref<9x32x32xbf16, #tpu.memory_space<vmem>>, vector<1x32x32xbf16>
    %51 = vector.shape_cast %50 : vector<1x32x32xbf16> to vector<32x32xbf16>
    %cst_32 = arith.constant dense<0.000000e+00> : vector<32x256xf32>
    %52 = tpu.matmul %51, %49, %cst_32 {dimension_numbers = #tpu.dot_dimension_numbers<[1], [0], [0], [1], [0, 0, 1, 1], [], []>} : vector<32x32xbf16>, vector<32x256xbf16>, vector<32x256xf32> -> vector<32x256xf32>
    %53 = arith.addf %44, %52 : vector<32x256xf32>
    %c16_i32 = arith.constant 16 : i32
    %54 = tpu.dynamic_rotate %36 by %c16_i32 dim 1 : vector<32x256xf32>, i32 -> vector<32x256xf32>
    %55 = vector.extract_strided_slice %4 {offsets = [1, 0], sizes = [1, 256], strides = [1, 1]} : vector<9x256xf32> to vector<1x256xf32>
    %56 = vector.broadcast %55 : vector<1x256xf32> to vector<32x256xf32>
    %57 = arith.mulf %54, %56 : vector<32x256xf32>
    %58 = arith.truncf %57 : vector<32x256xf32> to vector<32x256xbf16>
    %c1 = arith.constant 1 : index
    %c0_33 = arith.constant 0 : index
    %c0_34 = arith.constant 0 : index
    %59 = vector.load %arg8[%c1, %c0_33, %c0_34] : memref<9x32x32xbf16, #tpu.memory_space<vmem>>, vector<1x32x32xbf16>
    %60 = vector.shape_cast %59 : vector<1x32x32xbf16> to vector<32x32xbf16>
    %cst_35 = arith.constant dense<0.000000e+00> : vector<32x256xf32>
    %61 = tpu.matmul %60, %58, %cst_35 {dimension_numbers = #tpu.dot_dimension_numbers<[1], [0], [0], [1], [0, 0, 1, 1], [], []>} : vector<32x32xbf16>, vector<32x256xbf16>, vector<32x256xf32> -> vector<32x256xf32>
    %62 = arith.addf %53, %61 : vector<32x256xf32>
    %c15_i32 = arith.constant 15 : i32
    %63 = tpu.dynamic_rotate %36 by %c15_i32 dim 1 : vector<32x256xf32>, i32 -> vector<32x256xf32>
    %64 = vector.extract_strided_slice %4 {offsets = [2, 0], sizes = [1, 256], strides = [1, 1]} : vector<9x256xf32> to vector<1x256xf32>
    %65 = vector.broadcast %64 : vector<1x256xf32> to vector<32x256xf32>
    %66 = arith.mulf %63, %65 : vector<32x256xf32>
    %67 = arith.truncf %66 : vector<32x256xf32> to vector<32x256xbf16>
    %c2 = arith.constant 2 : index
    %c0_36 = arith.constant 0 : index
    %c0_37 = arith.constant 0 : index
    %68 = vector.load %arg8[%c2, %c0_36, %c0_37] : memref<9x32x32xbf16, #tpu.memory_space<vmem>>, vector<1x32x32xbf16>
    %69 = vector.shape_cast %68 : vector<1x32x32xbf16> to vector<32x32xbf16>
    %cst_38 = arith.constant dense<0.000000e+00> : vector<32x256xf32>
    %70 = tpu.matmul %69, %67, %cst_38 {dimension_numbers = #tpu.dot_dimension_numbers<[1], [0], [0], [1], [0, 0, 1, 1], [], []>} : vector<32x32xbf16>, vector<32x256xbf16>, vector<32x256xf32> -> vector<32x256xf32>
    %71 = arith.addf %62, %70 : vector<32x256xf32>
    %c1_i32 = arith.constant 1 : i32
    %72 = tpu.dynamic_rotate %36 by %c1_i32 dim 1 : vector<32x256xf32>, i32 -> vector<32x256xf32>
    %73 = vector.extract_strided_slice %4 {offsets = [3, 0], sizes = [1, 256], strides = [1, 1]} : vector<9x256xf32> to vector<1x256xf32>
    %74 = vector.broadcast %73 : vector<1x256xf32> to vector<32x256xf32>
    %75 = arith.mulf %72, %74 : vector<32x256xf32>
    %76 = arith.truncf %75 : vector<32x256xf32> to vector<32x256xbf16>
    %c3 = arith.constant 3 : index
    %c0_39 = arith.constant 0 : index
    %c0_40 = arith.constant 0 : index
    %77 = vector.load %arg8[%c3, %c0_39, %c0_40] : memref<9x32x32xbf16, #tpu.memory_space<vmem>>, vector<1x32x32xbf16>
    %78 = vector.shape_cast %77 : vector<1x32x32xbf16> to vector<32x32xbf16>
    %cst_41 = arith.constant dense<0.000000e+00> : vector<32x256xf32>
    %79 = tpu.matmul %78, %76, %cst_41 {dimension_numbers = #tpu.dot_dimension_numbers<[1], [0], [0], [1], [0, 0, 1, 1], [], []>} : vector<32x32xbf16>, vector<32x256xbf16>, vector<32x256xf32> -> vector<32x256xf32>
    %80 = arith.addf %71, %79 : vector<32x256xf32>
    %c255_i32 = arith.constant 255 : i32
    %81 = tpu.dynamic_rotate %36 by %c255_i32 dim 1 : vector<32x256xf32>, i32 -> vector<32x256xf32>
    %82 = vector.extract_strided_slice %4 {offsets = [5, 0], sizes = [1, 256], strides = [1, 1]} : vector<9x256xf32> to vector<1x256xf32>
    %83 = vector.broadcast %82 : vector<1x256xf32> to vector<32x256xf32>
    %84 = arith.mulf %81, %83 : vector<32x256xf32>
    %85 = arith.truncf %84 : vector<32x256xf32> to vector<32x256xbf16>
    %c5 = arith.constant 5 : index
    %c0_42 = arith.constant 0 : index
    %c0_43 = arith.constant 0 : index
    %86 = vector.load %arg8[%c5, %c0_42, %c0_43] : memref<9x32x32xbf16, #tpu.memory_space<vmem>>, vector<1x32x32xbf16>
    %87 = vector.shape_cast %86 : vector<1x32x32xbf16> to vector<32x32xbf16>
    %cst_44 = arith.constant dense<0.000000e+00> : vector<32x256xf32>
    %88 = tpu.matmul %87, %85, %cst_44 {dimension_numbers = #tpu.dot_dimension_numbers<[1], [0], [0], [1], [0, 0, 1, 1], [], []>} : vector<32x32xbf16>, vector<32x256xbf16>, vector<32x256xf32> -> vector<32x256xf32>
    %89 = arith.addf %80, %88 : vector<32x256xf32>
    %c241_i32 = arith.constant 241 : i32
    %90 = tpu.dynamic_rotate %36 by %c241_i32 dim 1 : vector<32x256xf32>, i32 -> vector<32x256xf32>
    %91 = vector.extract_strided_slice %4 {offsets = [6, 0], sizes = [1, 256], strides = [1, 1]} : vector<9x256xf32> to vector<1x256xf32>
    %92 = vector.broadcast %91 : vector<1x256xf32> to vector<32x256xf32>
    %93 = arith.mulf %90, %92 : vector<32x256xf32>
    %94 = arith.truncf %93 : vector<32x256xf32> to vector<32x256xbf16>
    %c6 = arith.constant 6 : index
    %c0_45 = arith.constant 0 : index
    %c0_46 = arith.constant 0 : index
    %95 = vector.load %arg8[%c6, %c0_45, %c0_46] : memref<9x32x32xbf16, #tpu.memory_space<vmem>>, vector<1x32x32xbf16>
    %96 = vector.shape_cast %95 : vector<1x32x32xbf16> to vector<32x32xbf16>
    %cst_47 = arith.constant dense<0.000000e+00> : vector<32x256xf32>
    %97 = tpu.matmul %96, %94, %cst_47 {dimension_numbers = #tpu.dot_dimension_numbers<[1], [0], [0], [1], [0, 0, 1, 1], [], []>} : vector<32x32xbf16>, vector<32x256xbf16>, vector<32x256xf32> -> vector<32x256xf32>
    %98 = arith.addf %89, %97 : vector<32x256xf32>
    %c240_i32 = arith.constant 240 : i32
    %99 = tpu.dynamic_rotate %36 by %c240_i32 dim 1 : vector<32x256xf32>, i32 -> vector<32x256xf32>
    %100 = vector.extract_strided_slice %4 {offsets = [7, 0], sizes = [1, 256], strides = [1, 1]} : vector<9x256xf32> to vector<1x256xf32>
    %101 = vector.broadcast %100 : vector<1x256xf32> to vector<32x256xf32>
    %102 = arith.mulf %99, %101 : vector<32x256xf32>
    %103 = arith.truncf %102 : vector<32x256xf32> to vector<32x256xbf16>
    %c7 = arith.constant 7 : index
    %c0_48 = arith.constant 0 : index
    %c0_49 = arith.constant 0 : index
    %104 = vector.load %arg8[%c7, %c0_48, %c0_49] : memref<9x32x32xbf16, #tpu.memory_space<vmem>>, vector<1x32x32xbf16>
    %105 = vector.shape_cast %104 : vector<1x32x32xbf16> to vector<32x32xbf16>
    %cst_50 = arith.constant dense<0.000000e+00> : vector<32x256xf32>
    %106 = tpu.matmul %105, %103, %cst_50 {dimension_numbers = #tpu.dot_dimension_numbers<[1], [0], [0], [1], [0, 0, 1, 1], [], []>} : vector<32x32xbf16>, vector<32x256xbf16>, vector<32x256xf32> -> vector<32x256xf32>
    %107 = arith.addf %98, %106 : vector<32x256xf32>
    %c239_i32 = arith.constant 239 : i32
    %108 = tpu.dynamic_rotate %36 by %c239_i32 dim 1 : vector<32x256xf32>, i32 -> vector<32x256xf32>
    %109 = vector.extract_strided_slice %4 {offsets = [8, 0], sizes = [1, 256], strides = [1, 1]} : vector<9x256xf32> to vector<1x256xf32>
    %110 = vector.broadcast %109 : vector<1x256xf32> to vector<32x256xf32>
    %111 = arith.mulf %108, %110 : vector<32x256xf32>
    %112 = arith.truncf %111 : vector<32x256xf32> to vector<32x256xbf16>
    %c8 = arith.constant 8 : index
    %c0_51 = arith.constant 0 : index
    %c0_52 = arith.constant 0 : index
    %113 = vector.load %arg8[%c8, %c0_51, %c0_52] : memref<9x32x32xbf16, #tpu.memory_space<vmem>>, vector<1x32x32xbf16>
    %114 = vector.shape_cast %113 : vector<1x32x32xbf16> to vector<32x32xbf16>
    %cst_53 = arith.constant dense<0.000000e+00> : vector<32x256xf32>
    %115 = tpu.matmul %114, %112, %cst_53 {dimension_numbers = #tpu.dot_dimension_numbers<[1], [0], [0], [1], [0, 0, 1, 1], [], []>} : vector<32x32xbf16>, vector<32x256xbf16>, vector<32x256xf32> -> vector<32x256xf32>
    %116 = arith.addf %107, %115 : vector<32x256xf32>
    %117 = vector.broadcast %40 : vector<32x1xf32> to vector<32x256xf32>
    %118 = arith.addf %116, %117 : vector<32x256xf32>
    %c0_54 = arith.constant 0 : index
    %c0_55 = arith.constant 0 : index
    %119 = vector.load %arg10[%c0_54, %c0_55] : memref<32x1xf32, #tpu.memory_space<vmem>>, vector<32x1xf32>
    %c0_56 = arith.constant 0 : index
    %c0_57 = arith.constant 0 : index
    %120 = vector.load %arg11[%c0_56, %c0_57] : memref<32x1xf32, #tpu.memory_space<vmem>>, vector<32x1xf32>
    %cst_58 = arith.constant dense<0.000000e+00> : vector<32xf32>
    %121 = vector.multi_reduction <add>, %118, %cst_58 [1] : vector<32x256xf32> to vector<32xf32>
    %122 = vector.shape_cast %121 : vector<32xf32> to vector<32x1xf32>
    %cst_59 = arith.constant dense<0.000000e+00> : vector<8x1xf32>
    %123 = tpu.matmul %2, %122, %cst_59 {dimension_numbers = #tpu.dot_dimension_numbers<[1], [0], [0], [1], [0, 0, 1, 1], [], []>} : vector<8x32xf32>, vector<32x1xf32>, vector<8x1xf32> -> vector<8x1xf32>
    %cst_60 = arith.constant dense<0.000000e+00> : vector<32x1xf32>
    %124 = tpu.matmul %3, %123, %cst_60 {dimension_numbers = #tpu.dot_dimension_numbers<[1], [0], [0], [1], [0, 0, 1, 1], [], []>} : vector<32x8xf32>, vector<8x1xf32>, vector<32x1xf32> -> vector<32x1xf32>
    %cst_61 = arith.constant 1.024000e+03 : f32
    %125 = vector.broadcast %cst_61 : f32 to vector<32x1xf32>
    %126 = arith.divf %124, %125 : vector<32x1xf32>
    %127 = vector.broadcast %126 : vector<32x1xf32> to vector<32x256xf32>
    %128 = arith.subf %118, %127 : vector<32x256xf32>
    %129 = arith.mulf %128, %128 : vector<32x256xf32>
    %cst_62 = arith.constant dense<0.000000e+00> : vector<32xf32>
    %130 = vector.multi_reduction <add>, %129, %cst_62 [1] : vector<32x256xf32> to vector<32xf32>
    %131 = vector.shape_cast %130 : vector<32xf32> to vector<32x1xf32>
    %cst_63 = arith.constant dense<0.000000e+00> : vector<8x1xf32>
    %132 = tpu.matmul %2, %131, %cst_63 {dimension_numbers = #tpu.dot_dimension_numbers<[1], [0], [0], [1], [0, 0, 1, 1], [], []>} : vector<8x32xf32>, vector<32x1xf32>, vector<8x1xf32> -> vector<8x1xf32>
    %cst_64 = arith.constant dense<0.000000e+00> : vector<32x1xf32>
    %133 = tpu.matmul %3, %132, %cst_64 {dimension_numbers = #tpu.dot_dimension_numbers<[1], [0], [0], [1], [0, 0, 1, 1], [], []>} : vector<32x8xf32>, vector<8x1xf32>, vector<32x1xf32> -> vector<32x1xf32>
    %cst_65 = arith.constant 1.024000e+03 : f32
    %134 = vector.broadcast %cst_65 : f32 to vector<32x1xf32>
    %135 = arith.divf %133, %134 : vector<32x1xf32>
    %cst_66 = arith.constant 9.99999974E-6 : f32
    %136 = vector.broadcast %cst_66 : f32 to vector<32x1xf32>
    %137 = arith.addf %135, %136 : vector<32x1xf32>
    %138 = math.rsqrt %137 : vector<32x1xf32>
    %139 = vector.broadcast %138 : vector<32x1xf32> to vector<32x256xf32>
    %140 = arith.mulf %128, %139 : vector<32x256xf32>
    %141 = vector.broadcast %119 : vector<32x1xf32> to vector<32x256xf32>
    %142 = arith.mulf %140, %141 : vector<32x256xf32>
    %143 = vector.broadcast %120 : vector<32x1xf32> to vector<32x256xf32>
    %144 = arith.addf %142, %143 : vector<32x256xf32>
    %145 = arith.negf %144 : vector<32x256xf32>
    %146 = math.exp %145 : vector<32x256xf32>
    %cst_67 = arith.constant 1.000000e+00 : f32
    %147 = vector.broadcast %cst_67 : f32 to vector<32x256xf32>
    %148 = arith.addf %147, %146 : vector<32x256xf32>
    %149 = arith.divf %147, %148 : vector<32x256xf32>
    %150 = arith.mulf %144, %149 : vector<32x256xf32>
    %c0_68 = arith.constant 0 : index
    %c0_69 = arith.constant 0 : index
    %151 = vector.load %arg13[%c0_68, %c0_69] : memref<32x1xf32, #tpu.memory_space<vmem>>, vector<32x1xf32>
    %c4_70 = arith.constant 4 : index
    %c0_71 = arith.constant 0 : index
    %c0_72 = arith.constant 0 : index
    %152 = vector.load %arg12[%c4_70, %c0_71, %c0_72] : memref<9x32x32xbf16, #tpu.memory_space<vmem>>, vector<1x32x32xbf16>
    %153 = vector.shape_cast %152 : vector<1x32x32xbf16> to vector<32x32xbf16>
    %154 = arith.truncf %150 : vector<32x256xf32> to vector<32x256xbf16>
    %cst_73 = arith.constant dense<0.000000e+00> : vector<32x256xf32>
    %155 = tpu.matmul %153, %154, %cst_73 {dimension_numbers = #tpu.dot_dimension_numbers<[1], [0], [0], [1], [0, 0, 1, 1], [], []>} : vector<32x32xbf16>, vector<32x256xbf16>, vector<32x256xf32> -> vector<32x256xf32>
    %c17_i32_74 = arith.constant 17 : i32
    %156 = tpu.dynamic_rotate %150 by %c17_i32_74 dim 1 : vector<32x256xf32>, i32 -> vector<32x256xf32>
    %157 = vector.extract_strided_slice %4 {offsets = [0, 0], sizes = [1, 256], strides = [1, 1]} : vector<9x256xf32> to vector<1x256xf32>
    %158 = vector.broadcast %157 : vector<1x256xf32> to vector<32x256xf32>
    %159 = arith.mulf %156, %158 : vector<32x256xf32>
    %160 = arith.truncf %159 : vector<32x256xf32> to vector<32x256xbf16>
    %c0_75 = arith.constant 0 : index
    %c0_76 = arith.constant 0 : index
    %c0_77 = arith.constant 0 : index
    %161 = vector.load %arg12[%c0_75, %c0_76, %c0_77] : memref<9x32x32xbf16, #tpu.memory_space<vmem>>, vector<1x32x32xbf16>
    %162 = vector.shape_cast %161 : vector<1x32x32xbf16> to vector<32x32xbf16>
    %cst_78 = arith.constant dense<0.000000e+00> : vector<32x256xf32>
    %163 = tpu.matmul %162, %160, %cst_78 {dimension_numbers = #tpu.dot_dimension_numbers<[1], [0], [0], [1], [0, 0, 1, 1], [], []>} : vector<32x32xbf16>, vector<32x256xbf16>, vector<32x256xf32> -> vector<32x256xf32>
    %164 = arith.addf %155, %163 : vector<32x256xf32>
    %c16_i32_79 = arith.constant 16 : i32
    %165 = tpu.dynamic_rotate %150 by %c16_i32_79 dim 1 : vector<32x256xf32>, i32 -> vector<32x256xf32>
    %166 = vector.extract_strided_slice %4 {offsets = [1, 0], sizes = [1, 256], strides = [1, 1]} : vector<9x256xf32> to vector<1x256xf32>
    %167 = vector.broadcast %166 : vector<1x256xf32> to vector<32x256xf32>
    %168 = arith.mulf %165, %167 : vector<32x256xf32>
    %169 = arith.truncf %168 : vector<32x256xf32> to vector<32x256xbf16>
    %c1_80 = arith.constant 1 : index
    %c0_81 = arith.constant 0 : index
    %c0_82 = arith.constant 0 : index
    %170 = vector.load %arg12[%c1_80, %c0_81, %c0_82] : memref<9x32x32xbf16, #tpu.memory_space<vmem>>, vector<1x32x32xbf16>
    %171 = vector.shape_cast %170 : vector<1x32x32xbf16> to vector<32x32xbf16>
    %cst_83 = arith.constant dense<0.000000e+00> : vector<32x256xf32>
    %172 = tpu.matmul %171, %169, %cst_83 {dimension_numbers = #tpu.dot_dimension_numbers<[1], [0], [0], [1], [0, 0, 1, 1], [], []>} : vector<32x32xbf16>, vector<32x256xbf16>, vector<32x256xf32> -> vector<32x256xf32>
    %173 = arith.addf %164, %172 : vector<32x256xf32>
    %c15_i32_84 = arith.constant 15 : i32
    %174 = tpu.dynamic_rotate %150 by %c15_i32_84 dim 1 : vector<32x256xf32>, i32 -> vector<32x256xf32>
    %175 = vector.extract_strided_slice %4 {offsets = [2, 0], sizes = [1, 256], strides = [1, 1]} : vector<9x256xf32> to vector<1x256xf32>
    %176 = vector.broadcast %175 : vector<1x256xf32> to vector<32x256xf32>
    %177 = arith.mulf %174, %176 : vector<32x256xf32>
    %178 = arith.truncf %177 : vector<32x256xf32> to vector<32x256xbf16>
    %c2_85 = arith.constant 2 : index
    %c0_86 = arith.constant 0 : index
    %c0_87 = arith.constant 0 : index
    %179 = vector.load %arg12[%c2_85, %c0_86, %c0_87] : memref<9x32x32xbf16, #tpu.memory_space<vmem>>, vector<1x32x32xbf16>
    %180 = vector.shape_cast %179 : vector<1x32x32xbf16> to vector<32x32xbf16>
    %cst_88 = arith.constant dense<0.000000e+00> : vector<32x256xf32>
    %181 = tpu.matmul %180, %178, %cst_88 {dimension_numbers = #tpu.dot_dimension_numbers<[1], [0], [0], [1], [0, 0, 1, 1], [], []>} : vector<32x32xbf16>, vector<32x256xbf16>, vector<32x256xf32> -> vector<32x256xf32>
    %182 = arith.addf %173, %181 : vector<32x256xf32>
    %c1_i32_89 = arith.constant 1 : i32
    %183 = tpu.dynamic_rotate %150 by %c1_i32_89 dim 1 : vector<32x256xf32>, i32 -> vector<32x256xf32>
    %184 = vector.extract_strided_slice %4 {offsets = [3, 0], sizes = [1, 256], strides = [1, 1]} : vector<9x256xf32> to vector<1x256xf32>
    %185 = vector.broadcast %184 : vector<1x256xf32> to vector<32x256xf32>
    %186 = arith.mulf %183, %185 : vector<32x256xf32>
    %187 = arith.truncf %186 : vector<32x256xf32> to vector<32x256xbf16>
    %c3_90 = arith.constant 3 : index
    %c0_91 = arith.constant 0 : index
    %c0_92 = arith.constant 0 : index
    %188 = vector.load %arg12[%c3_90, %c0_91, %c0_92] : memref<9x32x32xbf16, #tpu.memory_space<vmem>>, vector<1x32x32xbf16>
    %189 = vector.shape_cast %188 : vector<1x32x32xbf16> to vector<32x32xbf16>
    %cst_93 = arith.constant dense<0.000000e+00> : vector<32x256xf32>
    %190 = tpu.matmul %189, %187, %cst_93 {dimension_numbers = #tpu.dot_dimension_numbers<[1], [0], [0], [1], [0, 0, 1, 1], [], []>} : vector<32x32xbf16>, vector<32x256xbf16>, vector<32x256xf32> -> vector<32x256xf32>
    %191 = arith.addf %182, %190 : vector<32x256xf32>
    %c255_i32_94 = arith.constant 255 : i32
    %192 = tpu.dynamic_rotate %150 by %c255_i32_94 dim 1 : vector<32x256xf32>, i32 -> vector<32x256xf32>
    %193 = vector.extract_strided_slice %4 {offsets = [5, 0], sizes = [1, 256], strides = [1, 1]} : vector<9x256xf32> to vector<1x256xf32>
    %194 = vector.broadcast %193 : vector<1x256xf32> to vector<32x256xf32>
    %195 = arith.mulf %192, %194 : vector<32x256xf32>
    %196 = arith.truncf %195 : vector<32x256xf32> to vector<32x256xbf16>
    %c5_95 = arith.constant 5 : index
    %c0_96 = arith.constant 0 : index
    %c0_97 = arith.constant 0 : index
    %197 = vector.load %arg12[%c5_95, %c0_96, %c0_97] : memref<9x32x32xbf16, #tpu.memory_space<vmem>>, vector<1x32x32xbf16>
    %198 = vector.shape_cast %197 : vector<1x32x32xbf16> to vector<32x32xbf16>
    %cst_98 = arith.constant dense<0.000000e+00> : vector<32x256xf32>
    %199 = tpu.matmul %198, %196, %cst_98 {dimension_numbers = #tpu.dot_dimension_numbers<[1], [0], [0], [1], [0, 0, 1, 1], [], []>} : vector<32x32xbf16>, vector<32x256xbf16>, vector<32x256xf32> -> vector<32x256xf32>
    %200 = arith.addf %191, %199 : vector<32x256xf32>
    %c241_i32_99 = arith.constant 241 : i32
    %201 = tpu.dynamic_rotate %150 by %c241_i32_99 dim 1 : vector<32x256xf32>, i32 -> vector<32x256xf32>
    %202 = vector.extract_strided_slice %4 {offsets = [6, 0], sizes = [1, 256], strides = [1, 1]} : vector<9x256xf32> to vector<1x256xf32>
    %203 = vector.broadcast %202 : vector<1x256xf32> to vector<32x256xf32>
    %204 = arith.mulf %201, %203 : vector<32x256xf32>
    %205 = arith.truncf %204 : vector<32x256xf32> to vector<32x256xbf16>
    %c6_100 = arith.constant 6 : index
    %c0_101 = arith.constant 0 : index
    %c0_102 = arith.constant 0 : index
    %206 = vector.load %arg12[%c6_100, %c0_101, %c0_102] : memref<9x32x32xbf16, #tpu.memory_space<vmem>>, vector<1x32x32xbf16>
    %207 = vector.shape_cast %206 : vector<1x32x32xbf16> to vector<32x32xbf16>
    %cst_103 = arith.constant dense<0.000000e+00> : vector<32x256xf32>
    %208 = tpu.matmul %207, %205, %cst_103 {dimension_numbers = #tpu.dot_dimension_numbers<[1], [0], [0], [1], [0, 0, 1, 1], [], []>} : vector<32x32xbf16>, vector<32x256xbf16>, vector<32x256xf32> -> vector<32x256xf32>
    %209 = arith.addf %200, %208 : vector<32x256xf32>
    %c240_i32_104 = arith.constant 240 : i32
    %210 = tpu.dynamic_rotate %150 by %c240_i32_104 dim 1 : vector<32x256xf32>, i32 -> vector<32x256xf32>
    %211 = vector.extract_strided_slice %4 {offsets = [7, 0], sizes = [1, 256], strides = [1, 1]} : vector<9x256xf32> to vector<1x256xf32>
    %212 = vector.broadcast %211 : vector<1x256xf32> to vector<32x256xf32>
    %213 = arith.mulf %210, %212 : vector<32x256xf32>
    %214 = arith.truncf %213 : vector<32x256xf32> to vector<32x256xbf16>
    %c7_105 = arith.constant 7 : index
    %c0_106 = arith.constant 0 : index
    %c0_107 = arith.constant 0 : index
    %215 = vector.load %arg12[%c7_105, %c0_106, %c0_107] : memref<9x32x32xbf16, #tpu.memory_space<vmem>>, vector<1x32x32xbf16>
    %216 = vector.shape_cast %215 : vector<1x32x32xbf16> to vector<32x32xbf16>
    %cst_108 = arith.constant dense<0.000000e+00> : vector<32x256xf32>
    %217 = tpu.matmul %216, %214, %cst_108 {dimension_numbers = #tpu.dot_dimension_numbers<[1], [0], [0], [1], [0, 0, 1, 1], [], []>} : vector<32x32xbf16>, vector<32x256xbf16>, vector<32x256xf32> -> vector<32x256xf32>
    %218 = arith.addf %209, %217 : vector<32x256xf32>
    %c239_i32_109 = arith.constant 239 : i32
    %219 = tpu.dynamic_rotate %150 by %c239_i32_109 dim 1 : vector<32x256xf32>, i32 -> vector<32x256xf32>
    %220 = vector.extract_strided_slice %4 {offsets = [8, 0], sizes = [1, 256], strides = [1, 1]} : vector<9x256xf32> to vector<1x256xf32>
    %221 = vector.broadcast %220 : vector<1x256xf32> to vector<32x256xf32>
    %222 = arith.mulf %219, %221 : vector<32x256xf32>
    %223 = arith.truncf %222 : vector<32x256xf32> to vector<32x256xbf16>
    %c8_110 = arith.constant 8 : index
    %c0_111 = arith.constant 0 : index
    %c0_112 = arith.constant 0 : index
    %224 = vector.load %arg12[%c8_110, %c0_111, %c0_112] : memref<9x32x32xbf16, #tpu.memory_space<vmem>>, vector<1x32x32xbf16>
    %225 = vector.shape_cast %224 : vector<1x32x32xbf16> to vector<32x32xbf16>
    %cst_113 = arith.constant dense<0.000000e+00> : vector<32x256xf32>
    %226 = tpu.matmul %225, %223, %cst_113 {dimension_numbers = #tpu.dot_dimension_numbers<[1], [0], [0], [1], [0, 0, 1, 1], [], []>} : vector<32x32xbf16>, vector<32x256xbf16>, vector<32x256xf32> -> vector<32x256xf32>
    %227 = arith.addf %218, %226 : vector<32x256xf32>
    %228 = vector.broadcast %151 : vector<32x1xf32> to vector<32x256xf32>
    %229 = arith.addf %227, %228 : vector<32x256xf32>
    %230 = arith.addf %1, %229 : vector<32x256xf32>
    %231 = arith.truncf %230 : vector<32x256xf32> to vector<32x256xbf16>
    %c0_114 = arith.constant 0 : index
    %c0_115 = arith.constant 0 : index
    %c0_116 = arith.constant 0 : index
    %232 = vector.load %arg14[%c0_114, %c0_115, %c0_116] : memref<1x32x256xbf16, #tpu.memory_space<vmem>>, vector<1x32x256xbf16>
    %233 = vector.shape_cast %232 : vector<1x32x256xbf16> to vector<32x256xbf16>
    %234 = vector.shape_cast %231 : vector<32x256xbf16> to vector<1x32x256xbf16>
    tpu.vector_store %arg14[%c0_114, %c0_115, %c0_116], %234 {strides = array<i32>} : memref<1x32x256xbf16, #tpu.memory_space<vmem>>, vector<1x32x256xbf16>,
    return
  }
  func.func @transform_0(%arg0: i32) -> (i32, i32, i32) {
    %c0_i32 = arith.constant 0 : i32
    %c0_i32_0 = arith.constant 0 : i32
    %c0_i32_1 = arith.constant 0 : i32
    return %arg0, %c0_i32, %c0_i32_0 : i32, i32, i32
  }
  func.func @transform_1(%arg0: i32) -> (i32, i32, i32) {
    %c0_i32 = arith.constant 0 : i32
    %c0_i32_0 = arith.constant 0 : i32
    %c0_i32_1 = arith.constant 0 : i32
    return %arg0, %c0_i32, %c0_i32_0 : i32, i32, i32
  }
  func.func @transform_2(%arg0: i32) -> (i32, i32) {
    %c0_i32 = arith.constant 0 : i32
    %c0_i32_0 = arith.constant 0 : i32
    %c0_i32_1 = arith.constant 0 : i32
    return %c0_i32, %c0_i32_0 : i32, i32
  }
  func.func @transform_3(%arg0: i32) -> (i32, i32) {
    %c0_i32 = arith.constant 0 : i32
    %c0_i32_0 = arith.constant 0 : i32
    %c0_i32_1 = arith.constant 0 : i32
    return %c0_i32, %c0_i32_0 : i32, i32
  }
  func.func @transform_4(%arg0: i32) -> (i32, i32) {
    %c0_i32 = arith.constant 0 : i32
    %c0_i32_0 = arith.constant 0 : i32
    %c0_i32_1 = arith.constant 0 : i32
    return %c0_i32, %c0_i32_0 : i32, i32
  }
  func.func @transform_5(%arg0: i32) -> (i32, i32) {
    %c0_i32 = arith.constant 0 : i32
    %c0_i32_0 = arith.constant 0 : i32
    %c0_i32_1 = arith.constant 0 : i32
    return %c0_i32, %c0_i32_0 : i32, i32
  }
  func.func @transform_6(%arg0: i32) -> (i32, i32) {
    %c0_i32 = arith.constant 0 : i32
    %c0_i32_0 = arith.constant 0 : i32
    %c0_i32_1 = arith.constant 0 : i32
    return %c0_i32, %c0_i32_0 : i32, i32
  }
  func.func @transform_7(%arg0: i32) -> (i32, i32, i32) {
    %c0_i32 = arith.constant 0 : i32
    %c0_i32_0 = arith.constant 0 : i32
    %c0_i32_1 = arith.constant 0 : i32
    %c0_i32_2 = arith.constant 0 : i32
    return %c0_i32, %c0_i32_0, %c0_i32_1 : i32, i32, i32
  }
  func.func @transform_8(%arg0: i32) -> (i32, i32) {
    %c0_i32 = arith.constant 0 : i32
    %c0_i32_0 = arith.constant 0 : i32
    %c0_i32_1 = arith.constant 0 : i32
    return %c0_i32, %c0_i32_0 : i32, i32
  }
  func.func @transform_9(%arg0: i32) -> (i32, i32) {
    %c0_i32 = arith.constant 0 : i32
    %c0_i32_0 = arith.constant 0 : i32
    %c0_i32_1 = arith.constant 0 : i32
    return %c0_i32, %c0_i32_0 : i32, i32
  }
  func.func @transform_10(%arg0: i32) -> (i32, i32) {
    %c0_i32 = arith.constant 0 : i32
    %c0_i32_0 = arith.constant 0 : i32
    %c0_i32_1 = arith.constant 0 : i32
    return %c0_i32, %c0_i32_0 : i32, i32
  }
  func.func @transform_11(%arg0: i32) -> (i32, i32, i32) {
    %c0_i32 = arith.constant 0 : i32
    %c0_i32_0 = arith.constant 0 : i32
    %c0_i32_1 = arith.constant 0 : i32
    %c0_i32_2 = arith.constant 0 : i32
    return %c0_i32, %c0_i32_0, %c0_i32_1 : i32, i32, i32
  }
  func.func @transform_12(%arg0: i32) -> (i32, i32) {
    %c0_i32 = arith.constant 0 : i32
    %c0_i32_0 = arith.constant 0 : i32
    %c0_i32_1 = arith.constant 0 : i32
    return %c0_i32, %c0_i32_0 : i32, i32
  }
  func.func @transform_13(%arg0: i32) -> (i32, i32, i32) {
    %c0_i32 = arith.constant 0 : i32
    %c0_i32_0 = arith.constant 0 : i32
    %c0_i32_1 = arith.constant 0 : i32
    return %arg0, %c0_i32, %c0_i32_0 : i32, i32, i32
  }
}

</mosaic_0001>

<bundles_post_ra>
// kernel: tpu_custom_call.1
= control target key start
LH: loop header
LB: loop body
LE: loop exit
PB: predicated region body
PF: predicated region fallthrough
CT: control target
= control target key end

     0   :  { %s6395_s0 = inlined_call_operand.hbm [shape: f32[2,32,256], index: 0, kind: input, shape index: {}]   ;;  %s6396_s1 = inlined_call_operand.vmem [shape: f32[2,32,1], index: 1, kind: input, shape index: {}]   ;;  %s6397_s2 = inlined_call_operand.hbm [shape: f32[9,256], index: 2, kind: input, shape index: {}]   ;;  %s6398_s3 = inlined_call_operand.vmem [shape: f32[8,32], index: 3, kind: input, shape index: {}]   ;;  %s6399_s4 = inlined_call_operand.vmem [shape: f32[32,8], index: 4, kind: input, shape index: {}]   ;;  %s6400_s5 = inlined_call_operand.vmem [shape: f32[32,1], index: 5, kind: input, shape index: {}]   ;;  %s6401_s6 = inlined_call_operand.vmem [shape: f32[32,1], index: 6, kind: input, shape index: {}]   ;;  %s6402_s7 = inlined_call_operand.vmem [shape: bf16[9,32,32], index: 7, kind: input, shape index: {}]   ;;  %s6403_s8 = inlined_call_operand.vmem [shape: f32[32,1], index: 8, kind: input, shape index: {}]   ;;  %s6404_s9 = inlined_call_operand.vmem [shape: f32[32,1], index: 9, kind: input, shape index: {}]   ;;  %s6405_s10 = inlined_call_operand.vmem [shape: f32[32,1], index: 10, kind: input, shape index: {}]   ;;  %s6406_s11 = inlined_call_operand.vmem [shape: bf16[9,32,32], index: 11, kind: input, shape index: {}]   ;;  %s6407_s12 = inlined_call_operand.vmem [shape: f32[32,1], index: 12, kind: input, shape index: {}]   ;;  %s6408_s13 = inlined_call_operand.hbm [shape: bf16[2,32,256], index: 13, kind: output, shape index: {}]  }
   0x1   :  { %6462 = sst [smem:[#allocation39_spill]] %s6397_s2 }
   0x2   :  { %6463 = sst [smem:[#allocation40_spill]] %s6406_s11 }
   0x3   :  { %6464 = sst [smem:[#allocation41_spill]] %s6407_s12 }
   0x4   :  { %6465 = sst [smem:[#allocation42_spill]] %s6408_s13 }
   0x5   :  { %18 = vsyncpa [#allocation3], 0 }
   0x6   :  { %20 = vsyncpa [#allocation3 + $0x1], 0 }
   0x7   :  { %21 = vsyncpa [#allocation6], 0 }
   0x8   :  { %22 = vsyncpa [#allocation4], 0 }
   0x9   :  { %24 = vsyncpa [#allocation4 + $0x1], 0  ;;  %s4651_s25 = smov 0   ;;  %s4653_s26 = smov 0  }
   0xa   :  { %s4655_s27 = smov 0   ;;  %s4657_s28 = smov 0  }
   0xb LB: > { %6466 = sst [smem:[#allocation11_spill]] %s4549_s25  ;;  %s4672_s29 = sadd.s32 4294967295, %s4561_s28   ;;  %s4561_s28 = sphi %s4657_s28, %s6557_s28   ;;  %s4557_s27 = sphi %s4655_s27, %s6560_s27   ;;  %s4553_s26 = sphi %s4653_s26, %s6559_s26   ;;  %s4549_s25 = sphi %s4651_s25, %s6558_s25  }
   0xc   : > { %s3915_s30 = sadd.s32 4294967294, %s4561_s28   ;;  %p50_p0 = scmp.ne.s32.totalorder %s4553_s26, %s4549_s25 }
   0xd   : > { %p6417_p1 = scmp.eq.s32.totalorder %s4672_s29, 0  ;;  %p337_p3 = scmp.eq.s32.totalorder %s3915_s30, 1 }
   0xe   : > { %p3916_p5 = scmp.ge.s32.totalorder %s4561_s28, 1  ;;  %p344_p7 = scmp.lt.s32.totalorder %s4561_s28, 3 }
   0xf   : > { %p4681_p4 = por %p6417_p1, %p50_p0  ;;  %p4686_p6 = por %p337_p3, %p50_p0 }
  0x10   : > { %p4691_p8 = pnand %p3916_p5, %p344_p7  ;;  %s4563_s17 = smov [#allocation5]  }
  0x11   : > { %s6467_s14 = scalar_select %p4681_p4, 1, 0 }
  0x12   : > { %s6468_s15 = scalar_select %p4686_p6, 1, 0 }
  0x13   : > { %s6470_s16 = scalar_select %p4691_p8, 1, 0 }
  0x14   : > { %6469 = sst [smem:[#allocation12_spill]] %s6468_s15  ;;  %s356_s18 = sshll.u32 %s4563_s17, 4  ;;  %s357_s18 = int_to_ptr.vmem [resolvable:$true] %s356_s18 }
  0x15   : > { %p4242_p9 = pneg %p4691_p8  ;;  %s4705_s20 = sadd.s32 1, %s4561_s28  }
  0x16   : > { %6472 = sst [smem:[#allocation13_spill]] %s4705_s20  ;;  %s37_s21 = sadd.s32 1, %s4557_s27 }
  0x17   : > { %p4700_p11 = pnand %p4242_p9, %p6417_p1  ;;  %s34_s22 = ssub.s32 %s4561_s28, %s4705_s20 }
  0x18   : > { %s4450_s23 = scalar_lea.vmem %s357_s18, 512  ;;  %p4458_p5 = scmp.lt.s32.totalorder %s357_s18, %s357_s18 }
  0x19   : > { %p4441_p12 = pneg %p4700_p11  ;;  %p4451_p13 = scmp.ne.s32.totalorder %s357_s18, %s4450_s23 }
  0x1a   : > { %p4459_p7 = scmp.lt.s32.totalorder %s4450_s23, %s4450_s23 }
  0x1b   : > { %p4453_p0 = pnand %p4451_p13, %p4441_p12 }
  0x1c   : > { %p4460_p10 = por %p4459_p7, %p4458_p5 }
  0x1d   : > { %p4454_p3 = pneg %p4453_p0 }
  0x1f   : > { %p4461_p2 = pnand %p4460_p10, %p4454_p3 }
  0x21   : > { %4464 = shalt.err (!%p4461_p2)
}
  0x22   : > { %s6416_s24 = smov 256   ;;  %s6418_s30 = smov 16  }
  0x23   : > { %s6473_s2 = sld [smem:[#allocation39_spill]]  ;;  %p35_p2 = scmp.eq.s32.totalorder %s34_s22, 0 }
  0x24   : > { %p44_p9 = scmp.ne.s32.totalorder %s4557_s27, %s4553_s26  ;;  %p45_p10 = scmp.eq.s32.totalorder %s4561_s28, 0 }
  0x25   : > { %p4255_p12 = scmp.lt.s32.totalorder %s4561_s28, 2  ;;  %p6474_p0 = scmp.eq.s32.totalorder %s4672_s29, 1 }
  0x26   : > { %s4725_s20 = scalar_select %p35_p2, %s4557_s27, %s37_s21  }
  0x27   : > { %p46_p13 = por %p45_p10, %p44_p9  ;;  %p4729_p3 = por %p6474_p0, %p44_p9 }
  0x28   : > { %s400_s19 = sand.u32 1, %s4557_s27   ;;  %s4111_s25 = sshll.u32 %s4561_s28, 10 }
  0x29   : > { %4245 = dma.hbm_to_vmem [thread:$0]  (!%p4700_p11), %s6473_s2, 512, %s357_s18, [#allocation6], %s6416_s24, %s6416_s24, %s6418_s30  }
  0x2a   : > { %s6475_s15 = scalar_select %p4729_p3, 1, 0 }
  0x2b   : > { %s3919_s13 = sshll.u32 %s400_s19, 6  ;;  %s4738_s17 = scalar_lea.hbm %s6395_s0, %s4111_s25 }
  0x2c   : > { %s404_s18 = scalar_lea.vmem [#allocation2], %s3919_s13  ;;  %p4740_p11 = pnand %p4255_p12, %p46_p13 }
  0x2d   : > { %s411_s21 = sshll.u32 %s404_s18, 4  ;;  %s4746_s23 = scalar_lea.sflag [#allocation3], %s400_s19  ;;  %s4744_s21 = int_to_ptr.vmem [resolvable:$true] %s411_s21 }
  0x2e   : > { %s4465_s24 = scalar_lea.hbm %s4738_s17, 1024  ;;  %p4467_p7 = pneg %p4740_p11 }
  0x2f   : > { %p4466_p5 = scmp.ne.s32.totalorder %s4738_s17, %s4465_s24  ;;  %s4470_s13 = scalar_lea.hbm %s6395_s0, 2048 }
  0x30   : > { %p4471_p10 = scmp.lt.s32.totalorder %s4738_s17, %s6395_s0  ;;  %p4472_p12 = scmp.lt.s32.totalorder %s4470_s13, %s4465_s24 }
  0x31   : > { %p4468_p2 = pnand %p4467_p7, %p4466_p5 }
  0x32   : > { %p4473_p13 = por %p4472_p12, %p4471_p10 }
  0x33   : > { %p4469_p9 = pneg %p4468_p2 }
  0x35   : > { %p4474_p0 = pnand %p4473_p13, %p4469_p9 }
  0x37   : > { %4477 = shalt.err (!%p4474_p0)
}
  0x38   : > { %s4478_s19 = scalar_lea.vmem %s4744_s21, 1024  ;;  %s4566_s30 = smov [#allocation2]  }
  0x39   : > { %p4479_p1 = scmp.ne.s32.totalorder %s4744_s21, %s4478_s19  ;;  %s4483_s2 = sshll.u32 %s4566_s30, 4  ;;  %s4484_s2 = int_to_ptr.vmem [resolvable:$false] %s4483_s2 }
  0x3a   : > { %s4485_s11 = scalar_lea.vmem %s4484_s2, 2048  ;;  %p4486_p2 = scmp.lt.s32.totalorder %s4744_s21, %s4484_s2 }
  0x3b   : > { %p4481_p6 = pnand %p4479_p1, %p4467_p7  ;;  %p4487_p3 = scmp.lt.s32.totalorder %s4485_s11, %s4478_s19 }
  0x3d   : > { %p4482_p5 = pneg %p4481_p6  ;;  %p4488_p4 = por %p4487_p3, %p4486_p2 }
  0x3f   : > { %p4489_p8 = pnand %p4488_p4, %p4482_p5 }
  0x41   : > { %4492 = shalt.err (!%p4489_p8)
}
  0x42   : > { %s6477_s24 = smov 16   ;;  %s6478_s12 = smov 256  }
  0x43   : > { %4249 = dma.hbm_to_vmem [thread:$0]  (!%p4740_p11), %s4738_s17, 1024, %s4744_s21, %s4746_s23, %s6478_s12, %s6478_s12, %s6477_s24  }
  0x44   : > { %p6479_p1 = scmp.ne.s32.totalorder %s6470_s16, 0 }
  0x46   : > { %431 = sbr.rel (%p6479_p1) target bundleno = 3822 (0xeee), region = 72 }
  0x4b   : > { %s4773_s30 = sand.u32 1, %s4553_s26   ;;  %p6480_p4 = scmp.ne.s32.totalorder %s6467_s14, 0 }
  0x4c   : > { %s3923_s2 = sshll.u32 %s4773_s30, 6  ;;  %s434_s13 = scalar_lea.sflag [#allocation3], %s4773_s30 }
  0x4d   : > { %s4777_s25 = scalar_lea.vmem [#allocation2], %s3923_s2 }
  0x4e   : > { %4536 = dma.done.wait (%p6480_p4), %s434_s13, 1024  }
  0x4f   : > { %4538 = vsyncadd (%p6480_p4), %s434_s13, 4294966272  ;;  %p6481_p6 = scmp.eq.s32.totalorder %s4672_s29, 0 }
  0x51   : > { %4540 = dma.done.wait (%p6481_p6), [#allocation6], 512   ;;  %p6482_p8 = pmov %p6481_p6 }
  0x52   : > { %v6430_v0 = vmov 0.0   ;;  %v4789_v1 = vld [vmem:[%s4777_s25 + $0x30] sm:$0xff]  ;;  %v4792_v2 = vld [vmem:[%s4777_s25 + $0x38] sm:$0xff]  ;;  %v4795_v3 = vld [vmem:[%s4777_s25 + $0x20] sm:$0xff]  ;;  %vm4568_vm0 = vmmov 0   ;;  %vm532_vm1 = vcmask 261120  }
  0x53   : > { %4542 = vsyncadd (%p6482_p8), [#allocation6], 4294966784  ;;  %4158 = vmatprep.subr.mxu0 %v6430_v0  ;;  %v529_v4 = vadd.f32 %v4792_v2, %v4789_v1  ;;  %v4800_v5 = vld [vmem:[%s4777_s25 + $0x28] sm:$0xff]  ;;  %v497_v6 = vld [vmem:[%s4777_s25 + $0x10] sm:$0xff]  ;;  %4166 = vmatprep.mubr.msk.f32.mxu0 %vm4568_vm0, %v6430_v0  ;;  %vm606_vm2 = vcmask 64512   ;;  %v6428_v24 = vmov 0  }
  0x54   : > { %v498_v7 = vld [vmem:[%s4777_s25 + $0x18] sm:$0xff]  ;;  %v4805_v9 = vld [vmem:[%s4777_s25] sm:$0xff]  ;;  %v4808_v10 = vld [vmem:[%s4777_s25 + $0x8] sm:$0xff]  ;;  %v526_v11 = vadd.f32 %v4800_v5, %v4795_v3  ;;  %4307 = vset.pattern.permute.xlu1 %v6428_v24  ;;  %4306 = vset.pattern.permute.xlu0 %v6428_v24  ;;  %s4570_s14 = smov 17   ;;  %s4571_s16 = smov 16  }
  0x55   : > { %v523_v8 = vadd.f32 %v498_v7, %v497_v6  ;;  %530 = vadd.xlane.f32.xlu0 %v529_v4  ;;  %v520_v12 = vadd.f32 %v4808_v10, %v4805_v9  ;;  %v4821_v17 = vld [vmem:[%s6398_s3] sm:$0xff]  ;;  %v4834_v20 = vld [vmem:[%s6399_s4 + $0x8] sm:$0xff]  ;;  %v4839_v21 = vld [vmem:[%s6399_s4 + $0x10] sm:$0xff]  ;;  %s4572_s17 = smov 15   ;;  %s4573_s21 = smov 1  }
  0x56   : > { %v504_v18 = vld [vmem:[%s6399_s4] sm:$0xff]  ;;  %v4849_v23 = vld [vmem:[%s6399_s4 + $0x18] sm:$0xff]  ;;  %v514_v58 = vld [vmem:[%s6400_s5 + $0x10] sm:$0xff]  ;;  %s6426_s22 = smov 127   ;;  %s6422_s23 = smov 113  }
  0x57   : > { %524 = vadd.xlane.f32.xlu1 %v523_v8  ;;  %4171 = vmatprep.mubr.msk.f32.mxu1 %vm606_vm2, %v504_v18  ;;  %v519_v57 = vld [vmem:[%s6401_s6 + $0x18] sm:$0xff]  ;;  %v518_v60 = vld [vmem:[%s6401_s6 + $0x10] sm:$0xff]  ;;  %s6424_s18 = smov 112   ;;  %s4577_s2 = smov 111  }
  0x58   : > { %v515_v59 = vld [vmem:[%s6400_s5 + $0x18] sm:$0xff]  ;;  %p489_p3 = scmp.lt.s32.totalorder %s4672_s29, 1  ;;  %s4117_s24 = sshll.u32 %s4672_s29, 9 }
  0x59   : > { %527 = vadd.xlane.f32.xlu0 %v526_v11  ;;  %p6552_p7 = scmp.ne.s32.totalorder %s6475_s15, 0 }
  0x5a   : > { %s490_s13 = scalar_select %p489_p3, %s4672_s29, 1 }
  0x5b   : > { %521 = vadd.xlane.f32.xlu1 %v520_v12  ;;  %s4578_s29 = smov [#allocation7]  }
  0x5c   : > { %s4112_s19 = sshll.u32 %s490_s13, 5  ;;  %s6521_s13 = smov 113  }
  0x5d   : > { %s493_s12 = scalar_lea.vmem %s6396_s1, %s4112_s19  ;;  %s6522_s19 = smov 112  }
  0xde   : > { %v531_v13 = vpop.xlane.xlu0 %530 }
  0xdf   : > { %4159 = vmatpush3.msra.mxu0 %v531_v13 }
  0xe0   : > { %v525_v14 = vpop.xlane.xlu1 %524  ;;  %4160 = vmatprep.subr.mxu0 %v6430_v0 }
  0xe2   : > { %v528_v15 = vpop.xlane.xlu0 %527 }
  0xe3   : > { %4161 = vmatpush3.msra.mxu0 %v528_v15 }
  0xe4   : > { %4162 = vmatprep.subr.mxu0 %v6430_v0  ;;  %v522_v16 = vpop.xlane.xlu1 %521 }
  0xe5   : > { %4163 = vmatpush3.msra.mxu0 %v525_v14 }
  0xe6   : > { %4164 = vmatprep.subr.mxu0 %v6430_v0 }
  0xe7   : > { %4165 = vmatpush3.msra.mxu0 %v522_v16 }
  0xe8   : > { %4167 = vmatmul.mubr.msk.f32.vlgmr.msra.gmra.mxu0 %vm532_vm1, %v4821_v17 }
  0xe9   : > { %4190 = vmatprep.mubr.msk.f32.mxu0 %vm606_vm2, %v504_v18 }
 0x1a8   : > { %v602_v19 = vpop.f32.mrf.mxu0 }
 0x1a9   : > { %4169 = vmatprep.subr.mxu1 %v602_v19 }
 0x1aa   : > { %v4168_v22 = vpop.f32.mrf.mxu0  ;;  %4170 = vmatpush3.msra.mxu1 %v602_v19 }
 0x1ab   : > { %4172 = vmatmul.mubr.msk.f32.vlgmr.msra.gmra.mxu1 %vm606_vm2, %v4834_v20  ;;  %4177 = vmatprep.subr.mxu1 %v6430_v0  ;;  %v517_v22 = vld [vmem:[%s6401_s6 + $0x8] sm:$0xff] }
 0x1ac   : > { %4174 = vmatprep.mubr.msk.f32.mxu1 %vm606_vm2, %v4839_v21 }
 0x1af   : > { %4175 = vmatmul.mubr.msk.f32.gmra.mxu1 %vm606_vm2, %v4849_v23 }
 0x1b0   : > { %4185 = vmatprep.mubr.msk.f32.mxu1 %vm4568_vm0, %v6430_v0 }
 0x26b   : > { %v4173_v25 = vpop.f32.mrf.mxu1 }
 0x26c   : > { %v706_v26 = vmul.f32 0.0009765625, %v4173_v25 }
 0x26d   : > { %v685_v27 = vpop.f32.mrf.mxu1 }
 0x26e   : > { %716 = vperm.xlu1 %4307, %v706_v26   ;;  %v705_v32 = vmul.f32 0.0009765625, %v685_v27 }
 0x26f   : > { %v4176_v28 = vpop.f32.mrf.mxu1 }
 0x270   : > { %v708_v29 = vmul.f32 0.0009765625, %v4176_v28 }
 0x271   : > { %v695_v30 = vpop.f32.mrf.mxu1 }
 0x272   : > { %v707_v31 = vmul.f32 0.0009765625, %v695_v30  ;;  %726 = vperm.xlu0 %4306, %v708_v29  }
 0x274   : > { %721 = vperm.xlu1 %4307, %v707_v31  }
 0x278   : > { %711 = vperm.xlu1 %4307, %v705_v32  }
 0x2e9   : > { %v717_v33 = vpop.permute.xlu1 %716 }
 0x2ea   : > { %v4857_v34 = vsub.f32 %v497_v6, %v717_v33  ;;  %v4859_v36 = vsub.f32 %v498_v7, %v717_v33 }
 0x2ec   : > { %v739_v44 = vmul.f32 %v4857_v34, %v4857_v34  ;;  %v740_v48 = vmul.f32 %v4859_v36, %v4859_v36 }
 0x2ed   : > { %v727_v35 = vpop.permute.xlu0 %726 }
 0x2ee   : > { %v4862_v37 = vsub.f32 %v4789_v1, %v727_v35  ;;  %v4865_v38 = vsub.f32 %v4792_v2, %v727_v35  ;;  %v748_v53 = vadd.f32 %v740_v48, %v739_v44 }
 0x2ef   : > { %v722_v39 = vpop.permute.xlu1 %721 }
 0x2f0   : > { %v4868_v40 = vsub.f32 %v4795_v3, %v722_v39  ;;  %v4871_v41 = vsub.f32 %v4800_v5, %v722_v39  ;;  %v743_v42 = vmul.f32 %v4862_v37, %v4862_v37  ;;  %v744_v43 = vmul.f32 %v4865_v38, %v4865_v38 }
 0x2f2   : > { %v754_v45 = vadd.f32 %v744_v43, %v743_v42  ;;  %v741_v46 = vmul.f32 %v4868_v40, %v4868_v40  ;;  %v742_v47 = vmul.f32 %v4871_v41, %v4871_v41 }
 0x2f3   : > { %v712_v49 = vpop.permute.xlu1 %711 }
 0x2f4   : > { %v4886_v50 = vsub.f32 %v4805_v9, %v712_v49  ;;  %v4889_v51 = vsub.f32 %v4808_v10, %v712_v49  ;;  %755 = vadd.xlane.f32.xlu1 %v754_v45  ;;  %v751_v52 = vadd.f32 %v742_v47, %v741_v46 }
 0x2f6   : > { %752 = vadd.xlane.f32.xlu0 %v751_v52  ;;  %v737_v54 = vmul.f32 %v4886_v50, %v4886_v50  ;;  %v738_v55 = vmul.f32 %v4889_v51, %v4889_v51 }
 0x2f8   : > { %749 = vadd.xlane.f32.xlu1 %v748_v53  ;;  %v745_v56 = vadd.f32 %v738_v55, %v737_v54 }
 0x2fc   : > { %746 = vadd.xlane.f32.xlu1 %v745_v56 }
 0x30c   : > { %997 = vperm.xlu0 %4306, %v519_v57  }
 0x30d   : > { %964 = vperm.xlu1 %4307, %v514_v58  }
 0x311   : > { %969 = vperm.xlu1 %4307, %v515_v59  }
 0x315   : > { %992 = vperm.xlu1 %4307, %v518_v60  }
 0x37d   : > { %v756_v61 = vpop.xlane.xlu1 %755 }
 0x37e   : > { %4178 = vmatpush3.msra.mxu1 %v756_v61 }
 0x37f   : > { %v753_v62 = vpop.xlane.xlu0 %752  ;;  %4179 = vmatprep.subr.mxu1 %v6430_v0 }
 0x380   : > { %4180 = vmatpush3.msra.mxu1 %v753_v62 }
 0x381   : > { %4181 = vmatprep.subr.mxu1 %v6430_v0  ;;  %v750_v63 = vpop.xlane.xlu1 %749 }
 0x382   : > { %4182 = vmatpush3.msra.mxu1 %v750_v63 }
 0x383   : > { %4183 = vmatprep.subr.mxu1 %v6430_v0 }
 0x385   : > { %v747_v1 = vpop.xlane.xlu1 %746 }
 0x386   : > { %4184 = vmatpush3.msra.mxu1 %v747_v1 }
 0x387   : > { %4186 = vmatmul.mubr.msk.f32.vlgmr.msra.gmra.mxu1 %vm532_vm1, %v4821_v17  ;;  %v998_v27 = vpop.permute.xlu0 %997 }
 0x388   : > { %1184 = vmatprep.mubr.bf16.mxu1 %v6428_v24 }
 0x389   : > { %v965_v25 = vpop.permute.xlu1 %964 }
 0x38d   : > { %v970_v26 = vpop.permute.xlu1 %969 }
 0x391   : > { %v993_v28 = vpop.permute.xlu1 %992 }
 0x447   : > { %v823_v2 = vpop.f32.mrf.mxu1 }
 0x448   : > { %4188 = vmatprep.subr.mxu0 %v823_v2 }
 0x449   : > { %v4187_v3 = vpop.f32.mrf.mxu1  ;;  %4189 = vmatpush3.msra.mxu0 %v823_v2 }
 0x44a   : > { %4191 = vmatmul.mubr.msk.f32.vlgmr.msra.gmra.mxu0 %vm606_vm2, %v4834_v20  ;;  %v513_v20 = vld [vmem:[%s6400_s5 + $0x8] sm:$0xff] }
 0x44b   : > { %4193 = vmatprep.mubr.msk.f32.mxu0 %vm606_vm2, %v4839_v21  ;;  %v512_v21 = vld [vmem:[%s6400_s5] sm:$0xff] }
 0x44e   : > { %4194 = vmatmul.mubr.msk.f32.gmra.mxu0 %vm606_vm2, %v4849_v23  ;;  %v516_v23 = vld [vmem:[%s6401_s6] sm:$0xff] }
 0x44f   : > { %1253 = vmatprep.mubr.bf16.mxu0 %v6428_v24 }
 0x50a   : > { %v4192_v4 = vpop.f32.mrf.mxu0 }
 0x50b   : > { %v913_v5 = vmul.f32 0.0009765625, %v4192_v4 }
 0x50c   : > { %v893_v6 = vpop.f32.mrf.mxu0 }
 0x50d   : > { %v917_v7 = vadd.f32 1e-05, %v913_v5  ;;  %v912_v8 = vmul.f32 0.0009765625, %v893_v6 }
 0x50e   : > { %v4195_v9 = vpop.f32.mrf.mxu0 }
 0x50f   : > { %4344 = vrsqrt.f32 %v917_v7  ;;  %v916_v10 = vadd.f32 1e-05, %v912_v8  ;;  %v915_v11 = vmul.f32 0.0009765625, %v4195_v9 }
 0x510   : > { %v903_v12 = vpop.f32.mrf.mxu0 }
 0x511   : > { %4346 = vrsqrt.f32 %v916_v10  ;;  %v919_v13 = vadd.f32 1e-05, %v915_v11  ;;  %v914_v14 = vmul.f32 0.0009765625, %v903_v12 }
 0x513   : > { %4348 = vrsqrt.f32 %v919_v13  ;;  %v918_v15 = vadd.f32 1e-05, %v914_v14 }
 0x515   : > { %4350 = vrsqrt.f32 %v918_v15 }
 0x51c   : > { %v4345_v16 = vpop.eup %4344 }
 0x51d   : > { %931 = vperm.xlu0 %4306, %v4345_v16  }
 0x51e   : > { %v4347_v17 = vpop.eup %4346 }
 0x51f   : > { %926 = vperm.xlu1 %4307, %v4347_v17  }
 0x520   : > { %v4349_v18 = vpop.eup %4348 }
 0x521   : > { %941 = vperm.xlu0 %4306, %v4349_v18  }
 0x522   : > { %v4351_v19 = vpop.eup %4350 }
 0x523   : > { %936 = vperm.xlu1 %4307, %v4351_v19  }
 0x525   : > { %959 = vperm.xlu0 %4306, %v513_v20  }
 0x527   : > { %954 = vperm.xlu1 %4307, %v512_v21  }
 0x529   : > { %987 = vperm.xlu0 %4306, %v517_v22  }
 0x52b   : > { %982 = vperm.xlu1 %4307, %v516_v23  }
 0x598   : > { %v932_v29 = vpop.permute.xlu0 %931 }
 0x599   : > { %v946_v45 = vmul.f32 %v932_v29, %v4857_v34 }
 0x59a   : > { %v927_v30 = vpop.permute.xlu1 %926 }
 0x59b   : > { %v945_v53 = vmul.f32 %v927_v30, %v4889_v51 }
 0x59c   : > { %v942_v31 = vpop.permute.xlu0 %941 }
 0x59d   : > { %v950_v32 = vmul.f32 %v942_v31, %v4862_v37  ;;  %v951_v33 = vmul.f32 %v942_v31, %v4865_v38  ;;  %v947_v37 = vmul.f32 %v932_v29, %v4859_v36  ;;  %v944_v38 = vmul.f32 %v927_v30, %v4886_v50 }
 0x59e   : > { %v937_v35 = vpop.permute.xlu1 %936 }
 0x59f   : > { %v978_v39 = vmul.f32 %v970_v26, %v950_v32  ;;  %v979_v42 = vmul.f32 %v970_v26, %v951_v33  ;;  %v948_v43 = vmul.f32 %v937_v35, %v4868_v40  ;;  %v949_v44 = vmul.f32 %v937_v35, %v4871_v41 }
 0x5a0   : > { %v960_v46 = vpop.permute.xlu0 %959 }
 0x5a1   : > { %v4937_v47 = vadd.f32 %v998_v27, %v978_v39  ;;  %v4939_v48 = vadd.f32 %v998_v27, %v979_v42  ;;  %v976_v49 = vmul.f32 %v965_v25, %v948_v43  ;;  %v977_v52 = vmul.f32 %v965_v25, %v949_v44 }
 0x5a2   : > { %v974_v54 = vmul.f32 %v960_v46, %v946_v45  ;;  %v955_v55 = vpop.permute.xlu1 %954  ;;  %v975_v57 = vmul.f32 %v960_v46, %v947_v37 }
 0x5a3   : > { %v3944_v40 = vmul.f32 -1.442695, %v4937_v47  ;;  %v3945_v41 = vmul.f32 -1.442695, %v4939_v48  ;;  %v1004_v34 = vadd.f32 %v993_v28, %v976_v49  ;;  %v1005_v56 = vadd.f32 %v993_v28, %v977_v52  ;;  %v4309_v49 = vld [vmem:[%s6402_s7 + $0x40] sm:$0xff]   ;;  %v4311_v52 = vld [vmem:[%s6402_s7 + $0x48] sm:$0xff]  }
 0x5a4   : > { %v972_v58 = vmul.f32 %v955_v55, %v944_v38  ;;  %v973_v59 = vmul.f32 %v955_v55, %v945_v53  ;;  %v988_v60 = vpop.permute.xlu0 %987  ;;  %v1066_v55 = vld [vmem:[%s6403_s8 + $0x10] sm:$0xff] }
 0x5a5   : > { %4352 = vpow2.f32 %v3944_v40  ;;  %v3942_v61 = vmul.f32 -1.442695, %v1004_v34  ;;  %v3943_v62 = vmul.f32 -1.442695, %v1005_v56  ;;  %v1002_v36 = vadd.f32 %v988_v60, %v974_v54  ;;  %v1070_v40 = vld [vmem:[%s493_s12 + $0x10] sm:$0xff] }
 0x5a6   : > { %4354 = vpow2.f32 %v3945_v41  ;;  %v1003_v50 = vadd.f32 %v988_v60, %v975_v57  ;;  %v983_v63 = vpop.permute.xlu1 %982  ;;  %v1068_v60 = vld [vmem:[%s493_s12] sm:$0xff] }
 0x5a7   : > { %4356 = vpow2.f32 %v3942_v61  ;;  %v3940_v51 = vmul.f32 -1.442695, %v1002_v36  ;;  %v1000_v1 = vadd.f32 %v983_v63, %v972_v58  ;;  %v1001_v2 = vadd.f32 %v983_v63, %v973_v59  ;;  %v1064_v59 = vld [vmem:[%s6403_s8] sm:$0xff] }
 0x5a8   : > { %4358 = vpow2.f32 %v3943_v62  ;;  %v3941_v3 = vmul.f32 -1.442695, %v1003_v50  ;;  %v1074_v58 = vadd.f32 %v1070_v40, %v1066_v55 }
 0x5a9   : > { %4360 = vpow2.f32 %v3940_v51  ;;  %v3938_v4 = vmul.f32 -1.442695, %v1000_v1  ;;  %v3939_v5 = vmul.f32 -1.442695, %v1001_v2  ;;  %v1072_v51 = vadd.f32 %v1068_v60, %v1064_v59 }
 0x5aa   : > { %4362 = vpow2.f32 %v3941_v3 }
 0x5ab   : > { %4364 = vpow2.f32 %v3938_v4 }
 0x5ac   : > { %4366 = vpow2.f32 %v3939_v5 }
 0x5b2   : > { %v4353_v6 = vpop.eup %4352 }
 0x5b3   : > { %v4355_v7 = vpop.eup %4354  ;;  %v1038_v8 = vadd.f32 1.0, %v4353_v6 }
 0x5b4   : > { %v4357_v9 = vpop.eup %4356  ;;  %v1039_v10 = vadd.f32 1.0, %v4355_v7 }
 0x5b5   : > { %v4359_v11 = vpop.eup %4358  ;;  %4368 = vrcp.f32 %v1038_v8  ;;  %v1036_v12 = vadd.f32 1.0, %v4357_v9 }
 0x5b6   : > { %v4361_v13 = vpop.eup %4360  ;;  %4370 = vrcp.f32 %v1039_v10  ;;  %v1037_v14 = vadd.f32 1.0, %v4359_v11 }
 0x5b7   : > { %v4363_v15 = vpop.eup %4362  ;;  %4372 = vrcp.f32 %v1036_v12  ;;  %v1034_v16 = vadd.f32 1.0, %v4361_v13 }
 0x5b8   : > { %v4365_v17 = vpop.eup %4364  ;;  %4374 = vrcp.f32 %v1037_v14  ;;  %v1035_v18 = vadd.f32 1.0, %v4363_v15 }
 0x5b9   : > { %v4367_v19 = vpop.eup %4366  ;;  %4376 = vrcp.f32 %v1034_v16  ;;  %v1032_v20 = vadd.f32 1.0, %v4365_v17  ;;  %v1101_v17 = vlaneseq }
 0x5ba   : > { %4378 = vrcp.f32 %v1035_v18  ;;  %v1033_v21 = vadd.f32 1.0, %v4367_v19 }
 0x5bb   : > { %4380 = vrcp.f32 %v1032_v20  ;;  %v5164_v20 = vshrl.u32 %v1101_v17, 7 }
 0x5bc   : > { %4382 = vrcp.f32 %v1033_v21 }
 0x5c2   : > { %v4369_v22 = vpop.eup %4368 }
 0x5c3   : > { %v4371_v23 = vpop.eup %4370  ;;  %v4947_v27 = vmul.f32 %v4369_v22, %v4937_v47  ;;  %v5168_v22 = vand.u32 127, %v1101_v17 }
 0x5c4   : > { %v4373_v25 = vpop.eup %4372  ;;  %v4952_v30 = vmul.f32 %v4371_v23, %v4939_v48 }
 0x5c5   : > { %v4375_v26 = vpop.eup %4374  ;;  %v4949_v28 = vmul.f32 %v4373_v25, %v1004_v34  ;;  %v1067_v34 = vld [vmem:[%s6403_s8 + $0x18] sm:$0xff]  ;;  %6483 = vst [vmem:[#allocation14_spill] sm:$0xff] %v5168_v22  ;;  %v1114_v25 = vsub.s32 0, %v5164_v20  ;;  %vm1103_vm3 = vcmp.lt.s32.totalorder %v5168_v22, 17  ;;  %vm1290_vm4 = vcmp.lt.s32.totalorder %v5168_v22, 16 }
 0x5c6   : > { %v4377_v29 = vpop.eup %4376  ;;  %v4954_v31 = vmul.f32 %v4375_v26, %v1005_v56  ;;  %v1071_v56 = vld [vmem:[%s493_s12 + $0x18] sm:$0xff]  ;;  %v5171_v26 = vld [vmem:[#allocation5 + $0x8] sm:$0xff]  ;;  %vm1417_vm5 = vcmp.lt.s32.totalorder %v5168_v22, 15  ;;  %vm1544_vm6 = vcmp.lt.s32.totalorder %v5168_v22, 1  ;;  %vm1671_vm7 = vcmp.lt.s32.totalorder %v5168_v22, 127 }
 0x5c7   : > { %v4379_v32 = vpop.eup %4378  ;;  %v4956_v33 = vmul.f32 %v4377_v29, %v1002_v36  ;;  %v1083_v35 = vpack.c.bf16 %v4947_v27, %v4949_v28  ;;  %v1075_v62 = vadd.f32 %v1071_v56, %v1067_v34  ;;  %v1065_v36 = vld [vmem:[%s6403_s8 + $0x8] sm:$0xff]  ;;  %vm1798_vm8 = vcmp.lt.s32.totalorder %v5168_v22, 113 }
 0x5c8   : > { %v4381_v39 = vpop.eup %4380  ;;  %v1084_v42 = vpack.c.bf16 %v4952_v30, %v4954_v31  ;;  %v4964_v45 = vmul.f32 %v4379_v32, %v1003_v50  ;;  %v1069_v50 = vld [vmem:[%s493_s12 + $0x8] sm:$0xff]  ;;  %vm1925_vm9 = vcmp.lt.s32.totalorder %v5168_v22, 112  ;;  %vm2052_vm10 = vcmp.lt.s32.totalorder %v5168_v22, 111  ;;  %s6520_s12 = smov 127  }
 0x5c9   : > { %v4383_v43 = vpop.eup %4382  ;;  %v1056_v44 = vmul.f32 %v4381_v39, %v1000_v1  ;;  %1087 = vrot.lane.b32.xlu0 %v4956_v33, %s4570_s14 }
 0x5ca   : > { %v4966_v46 = vmul.f32 %v4383_v43, %v1001_v2  ;;  %1233 = vmatprep.subr.bf16.mxu0 %v1084_v42  ;;  %v1073_v2 = vadd.f32 %v1069_v50, %v1065_v36 }
 0x5cb   : > { %1234 = vmatpush1.bf16.msra.mxu0 %v1083_v35  ;;  %1085 = vrot.lane.b32.xlu1 %v1056_v44, %s4570_s14  ;;  %v1081_v47 = vpack.c.bf16 %v4956_v33, %v1056_v44 }
 0x5cc   : > { %v1082_v48 = vpack.c.bf16 %v4964_v45, %v4966_v46 }
 0x5cd   : > { %1095 = vrot.lane.b32.xlu0 %v4964_v45, %s4570_s14 }
 0x5ce   : > { %1235 = vmatprep.subr.bf16.mxu0 %v1082_v48 }
 0x5cf   : > { %1236 = vmatpush1.bf16.msra.mxu0 %v1081_v47  ;;  %1093 = vrot.lane.b32.xlu1 %v4966_v46, %s4570_s14 }
 0x5d1   : > { %1276 = vrot.lane.b32.xlu0 %v4956_v33, %s4571_s16 }
 0x5d2   : > { %3956 = vmatmul.mubr.msk.bf16.vlgmr.msra.gmra.mxu0 %vm532_vm1, %v4309_v49 }
 0x5d3   : > { %1274 = vrot.lane.b32.xlu1 %v1056_v44, %s4571_s16  ;;  %1263 = vmatprep.mubr.bf16.mxu0 %v6428_v24 }
 0x5d5   : > { %1284 = vrot.lane.b32.xlu0 %v4964_v45, %s4571_s16 }
 0x5d7   : > { %1282 = vrot.lane.b32.xlu1 %v4966_v46, %s4571_s16 }
 0x5d9   : > { %1403 = vrot.lane.b32.xlu0 %v4956_v33, %s4572_s17 }
 0x5da   : > { %3957 = vmatmul.mubr.msk.bf16.gmra.mxu0 %vm532_vm1, %v4311_v52 }
 0x5db   : > { %1401 = vrot.lane.b32.xlu1 %v1056_v44, %s4572_s17  ;;  %1499 = vmatprep.mubr.bf16.mxu0 %v6428_v24 }
 0x5dd   : > { %1411 = vrot.lane.b32.xlu0 %v4964_v45, %s4572_s17 }
 0x5df   : > { %1409 = vrot.lane.b32.xlu1 %v4966_v46, %s4572_s17 }
 0x5e1   : > { %1530 = vrot.lane.b32.xlu0 %v4956_v33, %s4573_s21 }
 0x5e3   : > { %1528 = vrot.lane.b32.xlu1 %v1056_v44, %s4573_s21 }
 0x5e5   : > { %1538 = vrot.lane.b32.xlu0 %v4964_v45, %s4573_s21 }
 0x5e7   : > { %1536 = vrot.lane.b32.xlu1 %v4966_v46, %s4573_s21 }
 0x5e9   : > { %1657 = vrot.lane.b32.xlu0 %v4956_v33, %s6426_s22 }
 0x5eb   : > { %1655 = vrot.lane.b32.xlu1 %v1056_v44, %s6426_s22 }
 0x5ed   : > { %1665 = vrot.lane.b32.xlu0 %v4964_v45, %s6426_s22 }
 0x5ef   : > { %1663 = vrot.lane.b32.xlu1 %v4966_v46, %s6426_s22 }
 0x5f1   : > { %1784 = vrot.lane.b32.xlu0 %v4956_v33, %s6422_s23 }
 0x5f3   : > { %1782 = vrot.lane.b32.xlu1 %v1056_v44, %s6422_s23 }
 0x5f5   : > { %1792 = vrot.lane.b32.xlu0 %v4964_v45, %s6422_s23 }
 0x5f7   : > { %1790 = vrot.lane.b32.xlu1 %v4966_v46, %s6422_s23 }
 0x5f9   : > { %1911 = vrot.lane.b32.xlu0 %v4956_v33, %s6424_s18 }
 0x5fb   : > { %1909 = vrot.lane.b32.xlu1 %v1056_v44, %s6424_s18 }
 0x5fd   : > { %1091 = vrot.lane.b32.xlu0 %v4947_v27, %s4570_s14 }
 0x5ff   : > { %1089 = vrot.lane.b32.xlu1 %v4949_v28, %s4570_s14 }
 0x601   : > { %1099 = vrot.lane.b32.xlu0 %v4952_v30, %s4570_s14 }
 0x603   : > { %1097 = vrot.lane.b32.xlu1 %v4954_v31, %s4570_s14 }
 0x605   : > { %1280 = vrot.lane.b32.xlu0 %v4947_v27, %s4571_s16 }
 0x607   : > { %1917 = vrot.lane.b32.xlu1 %v4966_v46, %s6424_s18 }
 0x609   : > { %1288 = vrot.lane.b32.xlu0 %v4952_v30, %s4571_s16 }
 0x60b   : > { %2036 = vrot.lane.b32.xlu1 %v1056_v44, %s4577_s2 }
 0x60d   : > { %1407 = vrot.lane.b32.xlu0 %v4947_v27, %s4572_s17 }
 0x60f   : > { %1278 = vrot.lane.b32.xlu1 %v4949_v28, %s4571_s16 }
 0x611   : > { %1415 = vrot.lane.b32.xlu0 %v4952_v30, %s4572_s17 }
 0x613   : > { %1286 = vrot.lane.b32.xlu1 %v4954_v31, %s4571_s16 }
 0x615   : > { %1534 = vrot.lane.b32.xlu0 %v4947_v27, %s4573_s21 }
 0x617   : > { %1405 = vrot.lane.b32.xlu1 %v4949_v28, %s4572_s17 }
 0x619   : > { %1542 = vrot.lane.b32.xlu0 %v4952_v30, %s4573_s21 }
 0x61b   : > { %1413 = vrot.lane.b32.xlu1 %v4954_v31, %s4572_s17 }
 0x61d   : > { %1661 = vrot.lane.b32.xlu0 %v4947_v27, %s6426_s22 }
 0x61f   : > { %1532 = vrot.lane.b32.xlu1 %v4949_v28, %s4573_s21 }
 0x621   : > { %1669 = vrot.lane.b32.xlu0 %v4952_v30, %s6426_s22 }
 0x623   : > { %1540 = vrot.lane.b32.xlu1 %v4954_v31, %s4573_s21 }
 0x625   : > { %1788 = vrot.lane.b32.xlu0 %v4947_v27, %s6422_s23 }
 0x627   : > { %1659 = vrot.lane.b32.xlu1 %v4949_v28, %s6426_s22 }
 0x629   : > { %1796 = vrot.lane.b32.xlu0 %v4952_v30, %s6422_s23 }
 0x62b   : > { %1667 = vrot.lane.b32.xlu1 %v4954_v31, %s6426_s22 }
 0x62d   : > { %1915 = vrot.lane.b32.xlu0 %v4947_v27, %s6424_s18 }
 0x62f   : > { %1786 = vrot.lane.b32.xlu1 %v4949_v28, %s6422_s23 }
 0x631   : > { %1923 = vrot.lane.b32.xlu0 %v4952_v30, %s6424_s18 }
 0x633   : > { %1794 = vrot.lane.b32.xlu1 %v4954_v31, %s6422_s23  ;;  %s3925_s23 = sshll.u32 %s4773_s30, 5 }
 0x634   : > { %s6333_s22 = scalar_lea.vmem [#allocation7], %s3925_s23 }
 0x635   : > { %2042 = vrot.lane.b32.xlu0 %v4947_v27, %s4577_s2  ;;  %s3820_s11 = sshll.u32 %s6333_s22, 4  ;;  %s6343_s11 = int_to_ptr.vmem [resolvable:$true] %s3820_s11 }
 0x637   : > { %1913 = vrot.lane.b32.xlu1 %v4949_v28, %s6424_s18 }
 0x639   : > { %2050 = vrot.lane.b32.xlu0 %v4952_v30, %s4577_s2 }
 0x63b   : > { %v5087_v37 = vpop.permute.xlu0 %1087  ;;  %1921 = vrot.lane.b32.xlu1 %v4954_v31, %s6424_s18 }
 0x63d   : > { %1919 = vrot.lane.b32.xlu0 %v4964_v45, %s6424_s18  ;;  %v5093_v38 = vpop.permute.xlu1 %1085  ;;  %s6523_s18 = sld [smem:[#allocation40_spill]] }
 0x63f   : > { %v5095_v53 = vpop.permute.xlu0 %1095  ;;  %2040 = vrot.lane.b32.xlu1 %v4949_v28, %s4577_s2  ;;  %v5173_v28 = vld [vmem:[#allocation5] sm:$0xff] }
 0x640   : > { %v5187_v35 = vrot.slane %v5173_v28, %v1114_v25  ;;  %v1105_v39 = vsel %vm1103_vm3, %v5087_v37, %v5095_v53 }
 0x641   : > { %2038 = vrot.lane.b32.xlu0 %v4956_v33, %s4577_s2  ;;  %v1094_v54 = vpop.permute.xlu1 %1093 }
 0x642   : > { %v1104_v29 = vsel %vm1103_vm3, %v5093_v38, %v1094_v54  ;;  %6485 = vst [vmem:[#allocation16_spill] sm:$0xff] %v5187_v35  ;;  %v1108_v43 = vsel %vm1103_vm3, %v1094_v54, %v5093_v38  ;;  %v1109_v38 = vsel %vm1103_vm3, %v5095_v53, %v5087_v37  ;;  %v4308_v37 = vld [vmem:[%s6402_s7] sm:$0xff]   ;;  %v1301_v53 = vsub.s32 1, %v5164_v20 }
 0x643   : > { %v5107_v41 = vpop.permute.xlu0 %1276  ;;  %2048 = vrot.lane.b32.xlu1 %v4954_v31, %s4577_s2  ;;  %v5180_v31 = vrot.slane %v5171_v26, %v1114_v25 }
 0x644   : > { %v5227_v25 = vrot.slane %v5171_v26, %v1301_v53 }
 0x645   : > { %2046 = vrot.lane.b32.xlu0 %v4964_v45, %s4577_s2  ;;  %v5116_v57 = vpop.permute.xlu1 %1274  ;;  %6484 = vst [vmem:[#allocation15_spill] sm:$0xff] %v5180_v31  ;;  %v1121_v44 = vmul.f32 %v5180_v31, %v1104_v29  ;;  %v1123_v54 = vmul.f32 %v5180_v31, %v1105_v39 }
 0x646   : > { %6486 = vst [vmem:[#allocation17_spill] sm:$0xff] %v5227_v25 }
 0x647   : > { %v5121_v61 = vpop.permute.xlu0 %1284  ;;  %2044 = vrot.lane.b32.xlu1 %v4966_v46, %s4577_s2  ;;  %v1129_v60 = vpack.c.bf16 %v1123_v54, %v1121_v44 }
 0x649   : > { %2175 = vperm.xlu0 %4306, %v1074_v58   ;;  %v5128_v63 = vpop.permute.xlu1 %1282  ;;  %v1120_v58 = vmul.f32 %v5187_v35, %v1108_v43 }
 0x64a   : > { %v1291_v17 = vsel %vm1290_vm4, %v5116_v57, %v5128_v63  ;;  %v1295_v39 = vsel %vm1290_vm4, %v5128_v63, %v5116_v57  ;;  %v4310_v57 = vld [vmem:[%s6402_s7 + $0x8] sm:$0xff]   ;;  %v1296_v63 = vsel %vm1290_vm4, %v5121_v61, %v5107_v41 }
 0x64b   : > { %v5130_v1 = vpop.permute.xlu0 %1403  ;;  %2180 = vperm.xlu1 %4307, %v1075_v62   ;;  %v1122_v62 = vmul.f32 %v5187_v35, %v1109_v38 }
 0x64d   : > { %2165 = vperm.xlu0 %4306, %v1072_v51   ;;  %v5132_v3 = vpop.permute.xlu1 %1401  ;;  %v1128_v50 = vpack.c.bf16 %v1122_v62, %v1120_v58 }
 0x64f   : > { %v5134_v4 = vpop.permute.xlu0 %1411  ;;  %2170 = vperm.xlu1 %4307, %v1073_v2  }
 0x651   : > { %v5136_v5 = vpop.permute.xlu1 %1409 }
 0x653   : > { %v5138_v6 = vpop.permute.xlu0 %1530 }
 0x655   : > { %v5140_v7 = vpop.permute.xlu1 %1528 }
 0x657   : > { %v5142_v8 = vpop.permute.xlu0 %1538 }
 0x659   : > { %v5144_v9 = vpop.permute.xlu1 %1536 }
 0x65b   : > { %v5146_v10 = vpop.permute.xlu0 %1657 }
 0x65d   : > { %v5148_v11 = vpop.permute.xlu1 %1655 }
 0x65f   : > { %v5150_v12 = vpop.permute.xlu0 %1665 }
 0x661   : > { %v5152_v13 = vpop.permute.xlu1 %1663 }
 0x663   : > { %v5154_v14 = vpop.permute.xlu0 %1784 }
 0x665   : > { %v5156_v15 = vpop.permute.xlu1 %1782 }
 0x667   : > { %v5158_v16 = vpop.permute.xlu0 %1792 }
 0x669   : > { %v5160_v18 = vpop.permute.xlu1 %1790 }
 0x66b   : > { %v5162_v19 = vpop.permute.xlu0 %1911 }
 0x66d   : > { %v5166_v21 = vpop.permute.xlu1 %1909 }
 0x66f   : > { %v1092_v23 = vpop.permute.xlu0 %1091 }
 0x671   : > { %v1090_v27 = vpop.permute.xlu1 %1089 }
 0x673   : > { %v1100_v30 = vpop.permute.xlu0 %1099 }
 0x674   : > { %v1107_v32 = vsel %vm1103_vm3, %v1092_v23, %v1100_v30  ;;  %v1111_v33 = vsel %vm1103_vm3, %v1100_v30, %v1092_v23  ;;  %v5235_v30 = vrot.slane %v5173_v28, %v1301_v53 }
 0x675   : > { %v1098_v42 = vpop.permute.xlu1 %1097  ;;  %v1126_v47 = vmul.f32 %v5187_v35, %v1111_v33  ;;  %v1127_v48 = vmul.f32 %v5180_v31, %v1107_v32  ;;  %v1292_v32 = vsel %vm1290_vm4, %v5107_v41, %v5121_v61 }
 0x676   : > { %v1106_v45 = vsel %vm1103_vm3, %v1090_v27, %v1098_v42  ;;  %v1110_v46 = vsel %vm1103_vm3, %v1098_v42, %v1090_v27  ;;  %6487 = vst [vmem:[#allocation18_spill] sm:$0xff] %v5235_v30  ;;  %v1308_v42 = vmul.f32 %v5227_v25, %v1291_v17  ;;  %v1307_v38 = vmul.f32 %v5235_v30, %v1295_v39 }
 0x677   : > { %v1124_v49 = vmul.f32 %v5187_v35, %v1110_v46  ;;  %v1125_v52 = vmul.f32 %v5180_v31, %v1106_v45  ;;  %v1281_v55 = vpop.permute.xlu0 %1280  ;;  %v1309_v58 = vmul.f32 %v5235_v30, %v1296_v63 }
 0x679   : > { %v1130_v40 = vpack.c.bf16 %v1126_v47, %v1124_v49  ;;  %v5210_v34 = vpop.permute.xlu1 %1917  ;;  %v1131_v56 = vpack.c.bf16 %v1127_v48, %v1125_v52  ;;  %v1428_v52 = vsub.s32 2, %v5164_v20 }
 0x67b   : > { %v1289_v59 = vpop.permute.xlu0 %1288  ;;  %1164 = vmatprep.subr.bf16.mxu1 %v1131_v56  ;;  %v5272_v61 = vrot.slane %v5171_v26, %v1428_v52  ;;  %v5280_v53 = vrot.slane %v5173_v28, %v1428_v52 }
 0x67c   : > { %1165 = vmatpush1.bf16.msra.mxu1 %v1130_v40  ;;  %v1294_v27 = vsel %vm1290_vm4, %v1281_v55, %v1289_v59  ;;  %v1298_v29 = vsel %vm1290_vm4, %v1289_v59, %v1281_v55  ;;  %v1310_v55 = vmul.f32 %v5227_v25, %v1292_v32  ;;  %v1418_v59 = vsel %vm1417_vm5, %v5132_v3, %v5136_v5 }
 0x67d   : > { %1166 = vmatprep.subr.bf16.mxu1 %v1129_v60  ;;  %v5214_v36 = vpop.permute.xlu1 %2036  ;;  %v1313_v45 = vmul.f32 %v5235_v30, %v1298_v29  ;;  %v1314_v46 = vmul.f32 %v5227_v25, %v1294_v27  ;;  %6488 = vst [vmem:[#allocation19_spill] sm:$0xff] %v5272_v61  ;;  %6489 = vst [vmem:[#allocation20_spill] sm:$0xff] %v5280_v53  ;;  %v1422_v27 = vsel %vm1417_vm5, %v5136_v5, %v5132_v3  ;;  %v4312_v3 = vld [vmem:[%s6402_s7 + $0x10] sm:$0xff]  }
 0x67e   : > { %v1316_v41 = vpack.c.bf16 %v1310_v55, %v1308_v42  ;;  %v1423_v5 = vsel %vm1417_vm5, %v5134_v4, %v5130_v1 }
 0x67f   : > { %v1408_v51 = vpop.permute.xlu0 %1407  ;;  %v1436_v63 = vmul.f32 %v5280_v53, %v1423_v5 }
 0x680   : > { %1167 = vmatpush1.bf16.msra.mxu1 %v1128_v50 }
 0x681   : > { %v1279_v2 = vpop.permute.xlu1 %1278 }
 0x683   : > { %v1416_v23 = vpop.permute.xlu0 %1415  ;;  %3952 = vmatmul.mubr.msk.bf16.vlgmr.msra.gmra.mxu1 %vm532_vm1, %v4308_v37  ;;  %v1315_v37 = vpack.c.bf16 %v1309_v58, %v1307_v38  ;;  %v1682_v58 = vsub.s32 5, %v5164_v20 }
 0x684   : > { %1194 = vmatprep.mubr.bf16.mxu1 %v6428_v24  ;;  %v1421_v62 = vsel %vm1417_vm5, %v1408_v51, %v1416_v23  ;;  %v1425_v50 = vsel %vm1417_vm5, %v1416_v23, %v1408_v51  ;;  %v1435_v51 = vmul.f32 %v5272_v61, %v1418_v59 }
 0x685   : > { %v1287_v33 = vpop.permute.xlu1 %1286  ;;  %v1440_v32 = vmul.f32 %v5280_v53, %v1425_v50  ;;  %v5360_v5 = vrot.slane %v5171_v26, %v1682_v58 }
 0x686   : > { %v1293_v43 = vsel %vm1290_vm4, %v1279_v2, %v1287_v33  ;;  %v1297_v44 = vsel %vm1290_vm4, %v1287_v33, %v1279_v2  ;;  %v1419_v2 = vsel %vm1417_vm5, %v5130_v1, %v5134_v4  ;;  %v1441_v33 = vmul.f32 %v5272_v61, %v1421_v62 }
 0x687   : > { %v1311_v47 = vmul.f32 %v5235_v30, %v1297_v44  ;;  %v1312_v48 = vmul.f32 %v5227_v25, %v1293_v43  ;;  %v1535_v49 = vpop.permute.xlu0 %1534  ;;  %v1555_v44 = vsub.s32 3, %v5164_v20  ;;  %6492 = vst [vmem:[#allocation23_spill] sm:$0xff] %v5360_v5 }
 0x689   : > { %v1317_v54 = vpack.c.bf16 %v1313_v45, %v1311_v47  ;;  %v1406_v40 = vpop.permute.xlu1 %1405  ;;  %v1318_v56 = vpack.c.bf16 %v1314_v46, %v1312_v48  ;;  %v1437_v45 = vmul.f32 %v5272_v61, %v1419_v2  ;;  %v1434_v46 = vmul.f32 %v5280_v53, %v1422_v27 }
 0x68a   : > { %v5313_v1 = vrot.slane %v5173_v28, %v1555_v44 }
 0x68b   : > { %v1543_v60 = vpop.permute.xlu0 %1542  ;;  %3953 = vmatmul.mubr.msk.bf16.gmra.mxu1 %vm532_vm1, %v4310_v57  ;;  %1352 = vmatprep.subr.bf16.mxu1 %v1318_v56  ;;  %v1443_v55 = vpack.c.bf16 %v1437_v45, %v1435_v51  ;;  %v1545_v56 = vsel %vm1544_vm6, %v5140_v7, %v5144_v9  ;;  %v4313_v51 = vld [vmem:[%s6402_s7 + $0x18] sm:$0xff]  }
 0x68c   : > { %1353 = vmatpush1.bf16.msra.mxu1 %v1317_v54  ;;  %1372 = vmatprep.mubr.bf16.mxu1 %v6428_v24  ;;  %6490 = vst [vmem:[#allocation21_spill] sm:$0xff] %v5313_v1  ;;  %v1548_v4 = vsel %vm1544_vm6, %v1535_v49, %v1543_v60  ;;  %v1552_v38 = vsel %vm1544_vm6, %v1543_v60, %v1535_v49 }
 0x68d   : > { %1354 = vmatprep.subr.bf16.mxu1 %v1316_v41  ;;  %v1414_v17 = vpop.permute.xlu1 %1413  ;;  %v1442_v54 = vpack.c.bf16 %v1436_v63, %v1434_v46  ;;  %v1546_v49 = vsel %vm1544_vm6, %v5138_v6, %v5142_v8  ;;  %v1549_v60 = vsel %vm1544_vm6, %v5144_v9, %v5140_v7  ;;  %v1567_v50 = vmul.f32 %v5313_v1, %v1552_v38  ;;  %v4314_v7 = vld [vmem:[%s6402_s7 + $0x20] sm:$0xff]  }
 0x68e   : > { %v1420_v23 = vsel %vm1417_vm5, %v1406_v40, %v1414_v17  ;;  %v1424_v29 = vsel %vm1417_vm5, %v1414_v17, %v1406_v40  ;;  %v5321_v40 = vrot.slane %v5171_v26, %v1555_v44  ;;  %v1550_v9 = vsel %vm1544_vm6, %v5142_v8, %v5138_v6 }
 0x68f   : > { %v1438_v39 = vmul.f32 %v5280_v53, %v1424_v29  ;;  %v1439_v42 = vmul.f32 %v5272_v61, %v1420_v23  ;;  %v1662_v43 = vpop.permute.xlu0 %1661  ;;  %v1561_v29 = vmul.f32 %v5313_v1, %v1549_v60  ;;  %v1676_v6 = vsel %vm1671_vm7, %v5152_v13, %v5148_v11  ;;  %v4316_v60 = vld [vmem:[%s6402_s7 + $0x30] sm:$0xff]  }
 0x690   : > { %1355 = vmatpush1.bf16.msra.mxu1 %v1315_v37  ;;  %6491 = vst [vmem:[#allocation22_spill] sm:$0xff] %v5321_v40  ;;  %v1568_v37 = vmul.f32 %v5321_v40, %v1548_v4  ;;  %v1562_v23 = vmul.f32 %v5321_v40, %v1545_v56 }
 0x691   : > { %v1444_v47 = vpack.c.bf16 %v1440_v32, %v1438_v39  ;;  %v1533_v48 = vpop.permute.xlu1 %1532  ;;  %v1445_v57 = vpack.c.bf16 %v1441_v33, %v1439_v42  ;;  %v1564_v42 = vmul.f32 %v5321_v40, %v1546_v49  ;;  %v1809_v49 = vsub.s32 6, %v5164_v20 }
 0x693   : > { %v1670_v52 = vpop.permute.xlu0 %1669  ;;  %3964 = vmatmul.mubr.msk.bf16.vlgmr.msra.gmra.mxu1 %vm532_vm1, %v4312_v3  ;;  %1479 = vmatprep.subr.bf16.mxu0 %v1445_v57  ;;  %v1563_v3 = vmul.f32 %v5313_v1, %v1550_v9  ;;  %v1570_v46 = vpack.c.bf16 %v1564_v42, %v1562_v23  ;;  %v1677_v57 = vsel %vm1671_vm7, %v5150_v12, %v5146_v10 }
 0x694   : > { %1480 = vmatpush1.bf16.msra.mxu0 %v1444_v47  ;;  %1382 = vmatprep.mubr.bf16.mxu1 %v6428_v24  ;;  %v1675_v44 = vsel %vm1671_vm7, %v1662_v43, %v1670_v52  ;;  %v1679_v45 = vsel %vm1671_vm7, %v1670_v52, %v1662_v43  ;;  %v1672_v43 = vsel %vm1671_vm7, %v5148_v11, %v5152_v13  ;;  %v4315_v11 = vld [vmem:[%s6402_s7 + $0x28] sm:$0xff]  }
 0x695   : > { %v1541_v59 = vpop.permute.xlu1 %1540  ;;  %1481 = vmatprep.subr.bf16.mxu0 %v1443_v55  ;;  %v1569_v47 = vpack.c.bf16 %v1563_v3, %v1561_v29  ;;  %v1689_v52 = vmul.f32 %v5360_v5, %v1676_v6  ;;  %v1673_v13 = vsel %vm1671_vm7, %v5146_v10, %v5150_v12  ;;  %v5411_v12 = vrot.slane %v5173_v28, %v1809_v49 }
 0x696   : > { %v1547_v41 = vsel %vm1544_vm6, %v1533_v48, %v1541_v59  ;;  %v1551_v62 = vsel %vm1544_vm6, %v1541_v59, %v1533_v48  ;;  %v5374_v48 = vrot.slane %v5173_v28, %v1682_v58  ;;  %v5419_v29 = vrot.slane %v5171_v26, %v1809_v49 }
 0x697   : > { %v1565_v2 = vmul.f32 %v5313_v1, %v1551_v62  ;;  %v1566_v17 = vmul.f32 %v5321_v40, %v1547_v41  ;;  %v1789_v27 = vpop.permute.xlu0 %1788  ;;  %v1691_v41 = vmul.f32 %v5360_v5, %v1677_v57  ;;  %6494 = vst [vmem:[#allocation25_spill] sm:$0xff] %v5411_v12  ;;  %v4317_v57 = vld [vmem:[%s6402_s7 + $0x38] sm:$0xff]  }
 0x698   : > { %1482 = vmatpush1.bf16.msra.mxu0 %v1442_v54  ;;  %6493 = vst [vmem:[#allocation24_spill] sm:$0xff] %v5374_v48  ;;  %v1694_v38 = vmul.f32 %v5374_v48, %v1675_v44  ;;  %v1695_v54 = vmul.f32 %v5360_v5, %v1679_v45  ;;  %v1688_v62 = vmul.f32 %v5374_v48, %v1672_v43  ;;  %6495 = vst [vmem:[#allocation26_spill] sm:$0xff] %v5419_v29 }
 0x699   : > { %v1571_v32 = vpack.c.bf16 %v1567_v50, %v1565_v2  ;;  %v1660_v33 = vpop.permute.xlu1 %1659  ;;  %v1572_v39 = vpack.c.bf16 %v1568_v37, %v1566_v17  ;;  %v1690_v17 = vmul.f32 %v5374_v48, %v1673_v13  ;;  %v1697_v10 = vpack.c.bf16 %v1691_v41, %v1689_v52 }
 0x69b   : > { %v1797_v8 = vpop.permute.xlu0 %1796  ;;  %3965 = vmatmul.mubr.msk.bf16.gmra.mxu1 %vm532_vm1, %v4313_v51  ;;  %3972 = vmatmul.mubr.msk.bf16.vlgmr.msra.gmra.mxu0 %vm532_vm1, %v4314_v7  ;;  %v1696_v23 = vpack.c.bf16 %v1690_v17, %v1688_v62  ;;  %v1926_v17 = vsel %vm1925_vm9, %v5166_v21, %v5210_v34 }
 0x69c   : > { %1606 = vmatprep.subr.bf16.mxu1 %v1572_v39  ;;  %1509 = vmatprep.mubr.bf16.mxu0 %v6428_v24  ;;  %v1802_v7 = vsel %vm1798_vm8, %v1789_v27, %v1797_v8  ;;  %v1806_v9 = vsel %vm1798_vm8, %v1797_v8, %v1789_v27  ;;  %v1804_v27 = vsel %vm1798_vm8, %v5158_v16, %v5154_v14 }
 0x69d   : > { %1607 = vmatpush1.bf16.msra.mxu1 %v1571_v32  ;;  %v1668_v63 = vpop.permute.xlu1 %1667  ;;  %1626 = vmatprep.mubr.bf16.mxu1 %v6428_v24  ;;  %v1803_v32 = vsel %vm1798_vm8, %v5160_v18, %v5156_v15  ;;  %v1799_v39 = vsel %vm1798_vm8, %v5156_v15, %v5160_v18  ;;  %v1821_v6 = vmul.f32 %v5411_v12, %v1802_v7  ;;  %v4318_v15 = vld [vmem:[%s6402_s7 + $0x50] sm:$0xff]   ;;  %v4320_v7 = vld [vmem:[%s6402_s7 + $0x60] sm:$0xff]  }
 0x69e   : > { %1608 = vmatprep.subr.bf16.mxu1 %v1570_v46  ;;  %v1674_v55 = vsel %vm1671_vm7, %v1660_v33, %v1668_v63  ;;  %v1678_v4 = vsel %vm1671_vm7, %v1668_v63, %v1660_v33  ;;  %v1822_v8 = vmul.f32 %v5419_v29, %v1806_v9  ;;  %v1800_v18 = vsel %vm1798_vm8, %v5154_v14, %v5158_v16 }
 0x69f   : > { %v1692_v56 = vmul.f32 %v5374_v48, %v1674_v55  ;;  %v1693_v58 = vmul.f32 %v5360_v5, %v1678_v4  ;;  %v1916_v59 = vpop.permute.xlu0 %1915  ;;  %v1936_v63 = vsub.s32 7, %v5164_v20  ;;  %v1818_v4 = vmul.f32 %v5419_v29, %v1804_v27 }
 0x6a1   : > { %v1698_v50 = vpack.c.bf16 %v1694_v38, %v1692_v56  ;;  %1609 = vmatpush1.bf16.msra.mxu1 %v1569_v47  ;;  %v1787_v37 = vpop.permute.xlu1 %1786  ;;  %v1699_v2 = vpack.c.bf16 %v1695_v54, %v1693_v58  ;;  %v1816_v47 = vmul.f32 %v5419_v29, %v1803_v32  ;;  %v1815_v38 = vmul.f32 %v5411_v12, %v1799_v39 }
 0x6a2   : > { %v1817_v54 = vmul.f32 %v5411_v12, %v1800_v18  ;;  %v5467_v58 = vrot.slane %v5173_v28, %v1936_v63 }
 0x6a3   : > { %v1924_v51 = vpop.permute.xlu0 %1923  ;;  %3973 = vmatmul.mubr.msk.bf16.gmra.mxu0 %vm532_vm1, %v4315_v11  ;;  %1733 = vmatprep.subr.bf16.mxu0 %v1699_v2  ;;  %v1824_v56 = vpack.c.bf16 %v1818_v4, %v1816_v47  ;;  %v5470_v11 = vrot.slane %v5171_v26, %v1936_v63  ;;  %v4319_v2 = vld [vmem:[%s6402_s7 + $0x58] sm:$0xff]  }
 0x6a4   : > { %3980 = vmatmul.mubr.msk.bf16.vlgmr.msra.gmra.mxu1 %vm532_vm1, %v4316_v60  ;;  %1734 = vmatpush1.bf16.msra.mxu0 %v1698_v50  ;;  %v1929_v16 = vsel %vm1925_vm9, %v1916_v59, %v1924_v51  ;;  %v1933_v20 = vsel %vm1925_vm9, %v1924_v51, %v1916_v59  ;;  %6496 = vst [vmem:[#allocation27_spill] sm:$0xff] %v5467_v58 }
 0x6a5   : > { %v1795_v33 = vpop.permute.xlu1 %1794  ;;  %1735 = vmatprep.subr.bf16.mxu0 %v1697_v10  ;;  %1636 = vmatprep.mubr.bf16.mxu1 %v6428_v24  ;;  %6497 = vst [vmem:[#allocation28_spill] sm:$0xff] %v5470_v11  ;;  %v1823_v49 = vpack.c.bf16 %v1817_v54, %v1815_v38  ;;  %v1930_v59 = vsel %vm1925_vm9, %v5210_v34, %v5166_v21  ;;  %v4321_v38 = vld [vmem:[%s6402_s7 + $0x68] sm:$0xff]  }
 0x6a6   : > { %v1801_v42 = vsel %vm1798_vm8, %v1787_v37, %v1795_v33  ;;  %v1805_v3 = vsel %vm1798_vm8, %v1795_v33, %v1787_v37  ;;  %1753 = vmatprep.mubr.bf16.mxu0 %v6428_v24  ;;  %v1948_v26 = vmul.f32 %v5467_v58, %v1929_v16  ;;  %v1949_v41 = vmul.f32 %v5470_v11, %v1933_v20 }
 0x6a7   : > { %v1819_v44 = vmul.f32 %v5411_v12, %v1801_v42  ;;  %v1820_v45 = vmul.f32 %v5419_v29, %v1805_v3  ;;  %v2043_v46 = vpop.permute.xlu0 %2042  ;;  %v1943_v9 = vmul.f32 %v5470_v11, %v1930_v59  ;;  %v4006_v42 = vld [vmem:[#allocation5 + $0x10] ss:$0 sm:$0xff]  ;;  %v4007_v3 = vld [vmem:[#allocation5 + $0x18] ss:$0 sm:$0xff] }
 0x6a8   : > { %1736 = vmatpush1.bf16.msra.mxu0 %v1696_v23 }
 0x6a9   : > { %v1825_v43 = vpack.c.bf16 %v1821_v6, %v1819_v44  ;;  %v1914_v52 = vpop.permute.xlu1 %1913  ;;  %v1826_v55 = vpack.c.bf16 %v1822_v8, %v1820_v45 }
 0x6ab   : > { %v2051_v14 = vpop.permute.xlu0 %2050  ;;  %3988 = vmatmul.mubr.msk.bf16.vlgmr.msra.gmra.mxu0 %vm532_vm1, %v4318_v15  ;;  %1860 = vmatprep.subr.bf16.mxu1 %v1826_v55 }
 0x6ac   : > { %3981 = vmatmul.mubr.msk.bf16.gmra.mxu1 %vm532_vm1, %v4317_v57  ;;  %1763 = vmatprep.mubr.bf16.mxu0 %v6428_v24  ;;  %v2056_v6 = vsel %vm2052_vm10, %v2043_v46, %v2051_v14  ;;  %v2060_v8 = vsel %vm2052_vm10, %v2051_v14, %v2043_v46 }
 0x6ad   : > { %1861 = vmatpush1.bf16.msra.mxu1 %v1825_v43  ;;  %v1922_v13 = vpop.permute.xlu1 %1921  ;;  %1880 = vmatprep.mubr.bf16.mxu1 %v6428_v24  ;;  %v2075_v47 = vmul.f32 %v4006_v42, %v2056_v6  ;;  %v2076_v57 = vmul.f32 %v4007_v3, %v2060_v8 }
 0x6ae   : > { %1862 = vmatprep.subr.bf16.mxu1 %v1824_v56  ;;  %v1928_v60 = vsel %vm1925_vm9, %v1914_v52, %v1922_v13  ;;  %v1932_v28 = vsel %vm1925_vm9, %v1922_v13, %v1914_v52  ;;  %v4322_v52 = vld [vmem:[%s6402_s7 + $0x70] sm:$0xff]  }
 0x6af   : > { %v1946_v62 = vmul.f32 %v5467_v58, %v1928_v60  ;;  %v1947_v50 = vmul.f32 %v5470_v11, %v1932_v28  ;;  %v1920_v37 = vpop.permute.xlu0 %1919 }
 0x6b0   : > { %v1927_v51 = vsel %vm1925_vm9, %v5162_v19, %v1920_v37  ;;  %v1931_v10 = vsel %vm1925_vm9, %v1920_v37, %v5162_v19  ;;  %v1942_v19 = vmul.f32 %v5467_v58, %v1926_v17 }
 0x6b1   : > { %v1952_v23 = vpack.c.bf16 %v1948_v26, %v1946_v62  ;;  %v1945_v32 = vmul.f32 %v5470_v11, %v1931_v10  ;;  %1863 = vmatpush1.bf16.msra.mxu1 %v1823_v49  ;;  %v2041_v21 = vpop.permute.xlu1 %2040  ;;  %v1953_v34 = vpack.c.bf16 %v1949_v41, %v1947_v50  ;;  %v1944_v33 = vmul.f32 %v5467_v58, %v1927_v51  ;;  %v4324_v41 = vld [vmem:[%s6402_s7 + $0x80] sm:$0xff]   ;;  %v4325_v62 = vld [vmem:[%s6402_s7 + $0x88] sm:$0xff]   ;;  %v5557_v50 = vpop.f32.mrf.mxu0 }
 0x6b3   : > { %v2039_v27 = vpop.permute.xlu0 %2038  ;;  %3989 = vmatmul.mubr.msk.bf16.gmra.mxu0 %vm532_vm1, %v4319_v2  ;;  %1987 = vmatprep.subr.bf16.mxu0 %v1953_v34  ;;  %v1951_v39 = vpack.c.bf16 %v1945_v32, %v1943_v9  ;;  %v1950_v45 = vpack.c.bf16 %v1944_v33, %v1942_v19  ;;  %v5559_v37 = vpop.f32.mrf.mxu0 }
 0x6b4   : > { %3996 = vmatmul.mubr.msk.bf16.vlgmr.msra.gmra.mxu1 %vm532_vm1, %v4320_v7  ;;  %1988 = vmatpush1.bf16.msra.mxu0 %v1952_v23 }
 0x6b5   : > { %v2049_v44 = vpop.permute.xlu1 %2048  ;;  %1989 = vmatprep.subr.bf16.mxu0 %v1951_v39  ;;  %1890 = vmatprep.mubr.bf16.mxu1 %v6428_v24  ;;  %v1259_v51 = vpop.f32.mrf.mxu0 }
 0x6b6   : > { %v2055_v15 = vsel %vm2052_vm10, %v2041_v21, %v2049_v44  ;;  %v2059_v18 = vsel %vm2052_vm10, %v2049_v44, %v2041_v21  ;;  %2007 = vmatprep.mubr.bf16.mxu0 %v6428_v24 }
 0x6b7   : > { %v2073_v63 = vmul.f32 %v4006_v42, %v2055_v15  ;;  %v2074_v46 = vmul.f32 %v4007_v3, %v2059_v18  ;;  %v2047_v43 = vpop.permute.xlu0 %2046  ;;  %v1261_v9 = vpop.f32.mrf.mxu0 }
 0x6b8   : > { %v2054_v55 = vsel %vm2052_vm10, %v2039_v27, %v2047_v43  ;;  %v2058_v4 = vsel %vm2052_vm10, %v2047_v43, %v2039_v27  ;;  %1990 = vmatpush1.bf16.msra.mxu0 %v1950_v45 }
 0x6b9   : > { %v2079_v54 = vpack.c.bf16 %v2075_v47, %v2073_v63  ;;  %v2045_v14 = vpop.permute.xlu1 %2044  ;;  %v2080_v16 = vpack.c.bf16 %v2076_v57, %v2074_v46  ;;  %4196 = vmatprep.subr.mxu0 %v6430_v0  ;;  %v2071_v20 = vmul.f32 %v4006_v42, %v2054_v55  ;;  %v2072_v49 = vmul.f32 %v4007_v3, %v2058_v4  ;;  %v1265_v32 = vpop.f32.mrf.mxu0 }
 0x6ba   : > { %v2053_v56 = vsel %vm2052_vm10, %v5214_v36, %v2045_v14  ;;  %v2057_v13 = vsel %vm2052_vm10, %v2045_v14, %v5214_v36  ;;  %v4323_v36 = vld [vmem:[%s6402_s7 + $0x78] sm:$0xff]  }
 0x6bb   : > { %v2069_v59 = vmul.f32 %v4006_v42, %v2053_v56  ;;  %v2070_v60 = vmul.f32 %v4007_v3, %v2057_v13  ;;  %4004 = vmatmul.mubr.msk.bf16.vlgmr.msra.gmra.mxu0 %vm532_vm1, %v4322_v52  ;;  %2114 = vmatprep.subr.bf16.mxu1 %v2080_v16  ;;  %v1267_v33 = vpop.f32.mrf.mxu0 }
 0x6bc   : > { %3997 = vmatmul.mubr.msk.bf16.gmra.mxu1 %vm532_vm1, %v4321_v38  ;;  %2017 = vmatprep.mubr.bf16.mxu0 %v6428_v24 }
 0x6bd   : > { %v2077_v28 = vpack.c.bf16 %v2071_v20, %v2069_v59  ;;  %2115 = vmatpush1.bf16.msra.mxu1 %v2079_v54  ;;  %v2078_v26 = vpack.c.bf16 %v2072_v49, %v2070_v60  ;;  %2134 = vmatprep.mubr.bf16.mxu1 %v6428_v24  ;;  %v1269_v19 = vpop.f32.mrf.mxu0 }
 0x6bf   : > { %2116 = vmatprep.subr.bf16.mxu1 %v2078_v26  ;;  %v1271_v6 = vpop.f32.mrf.mxu0 }
 0x6c1   : > { %2117 = vmatpush1.bf16.msra.mxu1 %v2077_v28 }
 0x6c2   : > { %4215 = vmatprep.subr.mxu1 %v6430_v0 }
 0x6c3   : > { %4005 = vmatmul.mubr.msk.bf16.gmra.mxu0 %vm532_vm1, %v4323_v36 }
 0x6c4   : > { %4014 = vmatmul.mubr.msk.bf16.vlgmr.msra.gmra.mxu1 %vm532_vm1, %v4324_v41  ;;  %4204 = vmatprep.mubr.msk.f32.mxu0 %vm4568_vm0, %v6430_v0 }
 0x6c5   : > { %2144 = vmatprep.mubr.bf16.mxu1 %v6428_v24 }
 0x6cc   : > { %4015 = vmatmul.mubr.msk.bf16.gmra.mxu1 %vm532_vm1, %v4325_v62 }
 0x6cd   : > { %4223 = vmatprep.mubr.msk.f32.mxu1 %vm4568_vm0, %v6430_v0 }
 0x743   : > { %v5561_v2 = vpop.f32.mrf.mxu1 }
 0x745   : > { %v5563_v17 = vpop.f32.mrf.mxu1 }
 0x747   : > { %v1190_v10 = vpop.f32.mrf.mxu1 }
 0x748   : > { %v1260_v22 = vadd.f32 %v1259_v51, %v1190_v10 }
 0x749   : > { %v1192_v7 = vpop.f32.mrf.mxu1 }
 0x74a   : > { %v1262_v61 = vadd.f32 %v1261_v9, %v1192_v7 }
 0x74b   : > { %v1196_v23 = vpop.f32.mrf.mxu1 }
 0x74c   : > { %v1266_v48 = vadd.f32 %v1265_v32, %v1196_v23 }
 0x74d   : > { %v1198_v21 = vpop.f32.mrf.mxu1 }
 0x74e   : > { %v1268_v53 = vadd.f32 %v1267_v33, %v1198_v21 }
 0x74f   : > { %v1200_v34 = vpop.f32.mrf.mxu1 }
 0x751   : > { %v1202_v27 = vpop.f32.mrf.mxu1 }
 0x753   : > { %v5565_v39 = vpop.f32.mrf.mxu1 }
 0x755   : > { %v5567_v42 = vpop.f32.mrf.mxu1 }
 0x757   : > { %v1378_v3 = vpop.f32.mrf.mxu1 }
 0x759   : > { %v1380_v8 = vpop.f32.mrf.mxu1 }
 0x75b   : > { %v1384_v44 = vpop.f32.mrf.mxu1  ;;  %v5569_v45 = vpop.f32.mrf.mxu0 }
 0x75c   : > { %6498 = vst [vmem:[#allocation29_spill] sm:$0xff] %v5569_v45  ;;  %v1397_v25 = vadd.f32 %v1384_v44, %v1266_v48  ;;  %v1272_v45 = vadd.f32 %v1271_v6, %v1202_v27  ;;  %v1256_v48 = vadd.f32 %v5557_v50, %v5561_v2 }
 0x75d   : > { %v1386_v15 = vpop.f32.mrf.mxu1  ;;  %v5571_v18 = vpop.f32.mrf.mxu0 }
 0x75e   : > { %6499 = vst [vmem:[#allocation30_spill] sm:$0xff] %v5571_v18 }
 0x75f   : > { %v1388_v47 = vpop.f32.mrf.mxu1  ;;  %v1505_v57 = vpop.f32.mrf.mxu0 }
 0x761   : > { %v1390_v63 = vpop.f32.mrf.mxu1  ;;  %v1507_v46 = vpop.f32.mrf.mxu0 }
 0x763   : > { %v1511_v43 = vpop.f32.mrf.mxu0 }
 0x764   : > { %v5573_v52 = vpop.f32.mrf.mxu1 }
 0x765   : > { %6500 = vst [vmem:[#allocation31_spill] sm:$0xff] %v5573_v52  ;;  %v1513_v55 = vpop.f32.mrf.mxu0  ;;  %v1524_v52 = vadd.f32 %v1511_v43, %v1397_v25  ;;  %v6508_v33 = vld [vmem:[#allocation30_spill] sm:$0xff] }
 0x766   : > { %v5575_v4 = vpop.f32.mrf.mxu1 }
 0x767   : > { %6501 = vst [vmem:[#allocation32_spill] sm:$0xff] %v5575_v4  ;;  %v1515_v38 = vpop.f32.mrf.mxu0 }
 0x768   : > { %v1632_v54 = vpop.f32.mrf.mxu1 }
 0x769   : > { %v1517_v14 = vpop.f32.mrf.mxu0 }
 0x76a   : > { %v1634_v16 = vpop.f32.mrf.mxu1 }
 0x76b   : > { %v5577_v20 = vpop.f32.mrf.mxu0 }
 0x76c   : > { %6502 = vst [vmem:[#allocation33_spill] sm:$0xff] %v5577_v20  ;;  %v1638_v56 = vpop.f32.mrf.mxu1  ;;  %v1396_v20 = vadd.f32 %v1380_v8, %v1262_v61 }
 0x76d   : > { %v5579_v13 = vpop.f32.mrf.mxu0  ;;  %v1651_v9 = vadd.f32 %v1638_v56, %v1524_v52  ;;  %v2181_v52 = vpop.permute.xlu1 %2180 }
 0x76e   : > { %6503 = vst [vmem:[#allocation34_spill] sm:$0xff] %v5579_v13  ;;  %v1640_v49 = vpop.f32.mrf.mxu1  ;;  %v1398_v13 = vadd.f32 %v1386_v15, %v1268_v53  ;;  %v1523_v32 = vadd.f32 %v1507_v46, %v1396_v20  ;;  %v1400_v53 = vadd.f32 %v1390_v63, %v1272_v45 }
 0x76f   : > { %v1759_v59 = vpop.f32.mrf.mxu0 }
 0x770   : > { %v1642_v60 = vpop.f32.mrf.mxu1  ;;  %v1525_v7 = vadd.f32 %v1513_v55, %v1398_v13  ;;  %v6511_v55 = vld [vmem:[#allocation31_spill] sm:$0xff] }
 0x771   : > { %v1761_v28 = vpop.f32.mrf.mxu0 }
 0x772   : > { %v1644_v26 = vpop.f32.mrf.mxu1 }
 0x773   : > { %v1765_v36 = vpop.f32.mrf.mxu0 }
 0x774   : > { %v5581_v41 = vpop.f32.mrf.mxu1 }
 0x775   : > { %6504 = vst [vmem:[#allocation35_spill] sm:$0xff] %v5581_v41  ;;  %v1767_v62 = vpop.f32.mrf.mxu0 }
 0x776   : > { %v5583_v24 = vpop.f32.mrf.mxu1 }
 0x777   : > { %6505 = vst [vmem:[#allocation36_spill] sm:$0xff] %v5583_v24  ;;  %v1769_v0 = vpop.f32.mrf.mxu0  ;;  %v1270_v24 = vadd.f32 %v1269_v19, %v1200_v34  ;;  %v1650_v34 = vadd.f32 %v1634_v16, %v1523_v32  ;;  %v1527_v19 = vadd.f32 %v1517_v14, %v1400_v53 }
 0x778   : > { %v1886_v11 = vpop.f32.mrf.mxu1 }
 0x779   : > { %v1771_v58 = vpop.f32.mrf.mxu0  ;;  %v1399_v23 = vadd.f32 %v1388_v47, %v1270_v24  ;;  %v1777_v8 = vadd.f32 %v1761_v28, %v1650_v34  ;;  %v1654_v15 = vadd.f32 %v1644_v26, %v1527_v19 }
 0x77a   : > { %v1888_v31 = vpop.f32.mrf.mxu1 }
 0x77b   : > { %v5585_v35 = vpop.f32.mrf.mxu0  ;;  %v1526_v21 = vadd.f32 %v1515_v38, %v1399_v23  ;;  %v1904_v46 = vadd.f32 %v1888_v31, %v1777_v8  ;;  %v1781_v20 = vadd.f32 %v1771_v58, %v1654_v15  ;;  %v5626_v15 = vld [vmem:[%s6398_s3] sm:$0xff] }
 0x77c   : > { %6506 = vst [vmem:[#allocation37_spill] sm:$0xff] %v5585_v35  ;;  %v1892_v29 = vpop.f32.mrf.mxu1  ;;  %v1258_v35 = vadd.f32 %v5559_v37, %v5563_v17  ;;  %v1652_v37 = vadd.f32 %v1640_v49, %v1525_v7  ;;  %v1778_v17 = vadd.f32 %v1765_v36, %v1651_v9  ;;  %v2176_v7 = vpop.permute.xlu0 %2175  ;;  %v6515_v9 = vld [vmem:[#allocation35_spill] sm:$0xff] }
 0x77d   : > { %v5587_v12 = vpop.f32.mrf.mxu0  ;;  %v1653_v6 = vadd.f32 %v1642_v60, %v1526_v21 }
 0x77e   : > { %6507 = vst [vmem:[#allocation38_spill] sm:$0xff] %v5587_v12  ;;  %v1894_v5 = vpop.f32.mrf.mxu1  ;;  %v1395_v12 = vadd.f32 %v1378_v3, %v1260_v22  ;;  %v1394_v51 = vadd.f32 %v5567_v42, %v1258_v35  ;;  %v1393_v22 = vadd.f32 %v5565_v39, %v1256_v48  ;;  %v1779_v50 = vadd.f32 %v1767_v62, %v1652_v37  ;;  %v6509_v35 = vld [vmem:[#allocation29_spill] sm:$0xff]  ;;  %v6510_v42 = vld [vmem:[#allocation32_spill] sm:$0xff] }
 0x77f   : > { %v2013_v40 = vpop.f32.mrf.mxu0  ;;  %v1905_v2 = vadd.f32 %v1892_v29, %v1778_v17  ;;  %v1780_v63 = vadd.f32 %v1769_v0, %v1653_v6  ;;  %v6514_v26 = vld [vmem:[#allocation36_spill] sm:$0xff] }
 0x780   : > { %v1896_v1 = vpop.f32.mrf.mxu1  ;;  %v1522_v61 = vadd.f32 %v1505_v57, %v1395_v12  ;;  %v1521_v24 = vadd.f32 %v6508_v33, %v1394_v51  ;;  %v1520_v12 = vadd.f32 %v6509_v35, %v1393_v22  ;;  %v1906_v39 = vadd.f32 %v1894_v5, %v1779_v50  ;;  %v2166_v6 = vpop.permute.xlu0 %2165 }
 0x781   : > { %v2015_v30 = vpop.f32.mrf.mxu0  ;;  %v1907_v56 = vadd.f32 %v1896_v1, %v1780_v63 }
 0x782   : > { %v1898_v41 = vpop.f32.mrf.mxu1  ;;  %v1649_v27 = vadd.f32 %v1632_v54, %v1522_v61  ;;  %v1648_v44 = vadd.f32 %v6510_v42, %v1521_v24  ;;  %v1647_v38 = vadd.f32 %v6511_v55, %v1520_v12  ;;  %v6512_v54 = vld [vmem:[#allocation34_spill] sm:$0xff]  ;;  %v2031_v13 = vadd.f32 %v2015_v30, %v1904_v46  ;;  %v5640_v46 = vld [vmem:[%s6399_s4 + $0x8] sm:$0xff] }
 0x783   : > { %v2019_v4 = vpop.f32.mrf.mxu0  ;;  %v6517_v21 = vld [vmem:[#allocation37_spill] sm:$0xff] }
 0x784   : > { %v5591_v18 = vpop.f32.mrf.mxu1  ;;  %v1776_v45 = vadd.f32 %v1759_v59, %v1649_v27  ;;  %v2032_v43 = vadd.f32 %v2019_v4, %v1905_v2  ;;  %v1775_v14 = vadd.f32 %v6512_v54, %v1648_v44  ;;  %v6513_v59 = vld [vmem:[#allocation33_spill] sm:$0xff]  ;;  %v1908_v4 = vadd.f32 %v1898_v41, %v1781_v20 }
 0x785   : > { %v2021_v25 = vpop.f32.mrf.mxu0  ;;  %v1774_v28 = vadd.f32 %v6513_v59, %v1647_v38  ;;  %v6516_v58 = vld [vmem:[#allocation38_spill] sm:$0xff] }
 0x786   : > { %v2138_v10 = vpop.f32.mrf.mxu1  ;;  %v1903_v16 = vadd.f32 %v1886_v11, %v1776_v45  ;;  %v2033_v49 = vadd.f32 %v2021_v25, %v1906_v39  ;;  %v1902_v36 = vadd.f32 %v6514_v26, %v1775_v14  ;;  %v5647_v39 = vld [vmem:[%s6399_s4 + $0x10] sm:$0xff] }
 0x787   : > { %v2023_v47 = vpop.f32.mrf.mxu0  ;;  %v1901_v11 = vadd.f32 %v6515_v9, %v1774_v28 }
 0x788   : > { %v2140_v3 = vpop.f32.mrf.mxu1  ;;  %v2030_v0 = vadd.f32 %v2013_v40, %v1903_v16  ;;  %v2034_v62 = vadd.f32 %v2023_v47, %v1907_v56  ;;  %v2029_v48 = vadd.f32 %v6516_v58, %v1902_v36  ;;  %v2171_v40 = vpop.permute.xlu1 %2170  ;;  %v5633_v47 = vld [vmem:[%s6399_s4] sm:$0xff] }
 0x789   : > { %v2025_v31 = vpop.f32.mrf.mxu0  ;;  %v2028_v34 = vadd.f32 %v6517_v21, %v1901_v11  ;;  %v2194_v21 = vld [vmem:[%s6404_s9 + $0x18] sm:$0xff] }
 0x78a   : > { %v2142_v57 = vpop.f32.mrf.mxu1  ;;  %v2157_v1 = vadd.f32 %v2140_v3, %v2030_v0  ;;  %v2035_v51 = vadd.f32 %v2025_v31, %v1908_v4  ;;  %v2156_v37 = vadd.f32 %v2138_v10, %v2029_v48 }
 0x78b   : > { %v2158_v23 = vadd.f32 %v2142_v57, %v2031_v13  ;;  %v2155_v24 = vadd.f32 %v5591_v18, %v2028_v34  ;;  %v6518_v18 = vmov 0.0   ;;  %v2198_v34 = vld [vmem:[%s6405_s10 + $0x18] sm:$0xff] }
 0x78c   : > { %v2146_v29 = vpop.f32.mrf.mxu1  ;;  %v5616_v27 = vadd.f32 %v2171_v40, %v2157_v1  ;;  %v2184_v8 = vadd.f32 %v2166_v6, %v2156_v37 }
 0x78d   : > { %v2159_v60 = vadd.f32 %v2146_v29, %v2032_v43  ;;  %v5611_v17 = vadd.f32 %v2171_v40, %v2158_v23  ;;  %v2183_v10 = vadd.f32 %v2166_v6, %v2155_v24  ;;  %v5654_v43 = vld [vmem:[%s6399_s4 + $0x18] sm:$0xff]  ;;  %v2197_v40 = vld [vmem:[%s6405_s10 + $0x10] sm:$0xff] }
 0x78e   : > { %v2148_v5 = vpop.f32.mrf.mxu1 }
 0x78f   : > { %v2160_v32 = vadd.f32 %v2148_v5, %v2033_v49  ;;  %v5606_v61 = vadd.f32 %v2176_v7, %v2159_v60  ;;  %v2202_v2 = vadd.f32 %v5611_v17, %v5616_v27  ;;  %v2199_v35 = vadd.f32 %v2184_v8, %v2183_v10 }
 0x790   : > { %v2150_v30 = vpop.f32.mrf.mxu1 }
 0x791   : > { %v5608_v53 = vadd.f32 %v2176_v7, %v2160_v32  ;;  %v2161_v25 = vadd.f32 %v2150_v30, %v2034_v62 }
 0x792   : > { %v2152_v41 = vpop.f32.mrf.mxu1 }
 0x793   : > { %v2162_v22 = vadd.f32 %v2152_v41, %v2035_v51  ;;  %v2205_v33 = vadd.f32 %v5608_v53, %v5606_v61  ;;  %v2189_v19 = vadd.f32 %v2181_v52, %v2161_v25  ;;  %v2193_v25 = vld [vmem:[%s6404_s9 + $0x10] sm:$0xff] }
 0x795   : > { %v2190_v3 = vadd.f32 %v2181_v52, %v2162_v22  ;;  %2206 = vadd.xlane.f32.xlu0 %v2205_v33  ;;  %v6519_v52 = vmov 0  }
 0x797   : > { %v2208_v50 = vadd.f32 %v2190_v3, %v2189_v19 }
 0x799   : > { %2209 = vadd.xlane.f32.xlu1 %v2208_v50  ;;  %2203 = vadd.xlane.f32.xlu0 %v2202_v2 }
 0x79d   : > { %2200 = vadd.xlane.f32.xlu1 %v2199_v35 }
 0x81e   : > { %v2207_v12 = vpop.xlane.xlu0 %2206 }
 0x822   : > { %v2210_v42 = vpop.xlane.xlu1 %2209  ;;  %v2204_v44 = vpop.xlane.xlu0 %2203 }
 0x823   : > { %4197 = vmatpush3.msra.mxu0 %v2210_v42 }
 0x824   : > { %4198 = vmatprep.subr.mxu0 %v6518_v18 }
 0x825   : > { %4199 = vmatpush3.msra.mxu0 %v2207_v12 }
 0x826   : > { %4200 = vmatprep.subr.mxu0 %v6518_v18  ;;  %v2201_v45 = vpop.xlane.xlu1 %2200 }
 0x827   : > { %4201 = vmatpush3.msra.mxu0 %v2204_v44 }
 0x828   : > { %4202 = vmatprep.subr.mxu0 %v6518_v18 }
 0x829   : > { %4203 = vmatpush3.msra.mxu0 %v2201_v45 }
 0x82a   : > { %4205 = vmatmul.mubr.msk.f32.vlgmr.msra.gmra.mxu0 %vm532_vm1, %v5626_v15 }
 0x82b   : > { %4209 = vmatprep.mubr.msk.f32.mxu0 %vm606_vm2, %v5633_v47 }
 0x8ea   : > { %v2277_v57 = vpop.f32.mrf.mxu0 }
 0x8eb   : > { %4207 = vmatprep.subr.mxu0 %v2277_v57 }
 0x8ec   : > { %v4206_v63 = vpop.f32.mrf.mxu0  ;;  %4208 = vmatpush3.msra.mxu0 %v2277_v57  ;;  %v2191_v57 = vld [vmem:[%s6404_s9] sm:$0xff] }
 0x8ed   : > { %4210 = vmatmul.mubr.msk.f32.vlgmr.msra.gmra.mxu0 %vm606_vm2, %v5640_v46  ;;  %v2192_v63 = vld [vmem:[%s6404_s9 + $0x8] sm:$0xff] }
 0x8ee   : > { %4212 = vmatprep.mubr.msk.f32.mxu0 %vm606_vm2, %v5647_v39 }
 0x8f1   : > { %4213 = vmatmul.mubr.msk.f32.gmra.mxu0 %vm606_vm2, %v5654_v43 }
 0x8f2   : > { %2826 = vmatprep.mubr.bf16.mxu0 %v6519_v52 }
 0x9ad   : > { %v4211_v55 = vpop.f32.mrf.mxu0 }
 0x9ae   : > { %v2367_v56 = vmul.f32 0.0009765625, %v4211_v55 }
 0x9af   : > { %v2347_v38 = vpop.f32.mrf.mxu0 }
 0x9b0   : > { %v2366_v29 = vmul.f32 0.0009765625, %v2347_v38 }
 0x9b1   : > { %v4214_v54 = vpop.f32.mrf.mxu0 }
 0x9b2   : > { %v2369_v14 = vmul.f32 0.0009765625, %v4214_v54 }
 0x9b3   : > { %v2357_v16 = vpop.f32.mrf.mxu0 }
 0x9b4   : > { %v2368_v20 = vmul.f32 0.0009765625, %v2357_v16  ;;  %2387 = vperm.xlu0 %4306, %v2369_v14  }
 0x9b6   : > { %2382 = vperm.xlu1 %4307, %v2368_v20  }
 0x9b8   : > { %2372 = vperm.xlu0 %4306, %v2366_v29  }
 0x9ba   : > { %2377 = vperm.xlu1 %4307, %v2367_v56  }
 0xa2f   : > { %v2388_v13 = vpop.permute.xlu0 %2387 }
 0xa30   : > { %v5659_v49 = vsub.f32 %v2189_v19, %v2388_v13  ;;  %v5661_v60 = vsub.f32 %v2190_v3, %v2388_v13 }
 0xa31   : > { %v2383_v59 = vpop.permute.xlu1 %2382 }
 0xa32   : > { %v2404_v28 = vmul.f32 %v5659_v49, %v5659_v49  ;;  %v2405_v26 = vmul.f32 %v5661_v60, %v5661_v60  ;;  %v5668_v36 = vsub.f32 %v5606_v61, %v2383_v59  ;;  %v5671_v0 = vsub.f32 %v5608_v53, %v2383_v59 }
 0xa33   : > { %v2373_v31 = vpop.permute.xlu0 %2372 }
 0xa34   : > { %v5673_v5 = vsub.f32 %v2183_v10, %v2373_v31  ;;  %v5675_v4 = vsub.f32 %v2184_v8, %v2373_v31  ;;  %v2415_v62 = vadd.f32 %v2405_v26, %v2404_v28  ;;  %v2402_v23 = vmul.f32 %v5668_v36, %v5668_v36 }
 0xa35   : > { %v2378_v32 = vpop.permute.xlu1 %2377  ;;  %v2403_v7 = vmul.f32 %v5671_v0, %v5671_v0 }
 0xa36   : > { %v2398_v9 = vmul.f32 %v5673_v5, %v5673_v5  ;;  %v2399_v11 = vmul.f32 %v5675_v4, %v5675_v4  ;;  %v5686_v58 = vsub.f32 %v5616_v27, %v2378_v32  ;;  %v5689_v48 = vsub.f32 %v5611_v17, %v2378_v32  ;;  %2416 = vadd.xlane.f32.xlu1 %v2415_v62 }
 0xa37   : > { %v2412_v1 = vadd.f32 %v2403_v7, %v2402_v23 }
 0xa38   : > { %v2406_v30 = vadd.f32 %v2399_v11, %v2398_v9  ;;  %v2400_v51 = vmul.f32 %v5686_v58, %v5686_v58  ;;  %v2401_v61 = vmul.f32 %v5689_v48, %v5689_v48 }
 0xa39   : > { %2413 = vadd.xlane.f32.xlu0 %v2412_v1 }
 0xa3a   : > { %2407 = vadd.xlane.f32.xlu1 %v2406_v30  ;;  %v2409_v53 = vadd.f32 %v2401_v61, %v2400_v51 }
 0xa3d   : > { %2410 = vadd.xlane.f32.xlu0 %v2409_v53 }
 0xa4b   : > { %2625 = vperm.xlu1 %4307, %v2193_v25  }
 0xa4f   : > { %2653 = vperm.xlu1 %4307, %v2197_v40  }
 0xa53   : > { %2630 = vperm.xlu0 %4306, %v2194_v21  }
 0xa57   : > { %2658 = vperm.xlu0 %4306, %v2198_v34  }
 0xabf   : > { %v2417_v41 = vpop.xlane.xlu1 %2416 }
 0xac0   : > { %4216 = vmatpush3.msra.mxu1 %v2417_v41 }
 0xac1   : > { %4217 = vmatprep.subr.mxu1 %v6518_v18 }
 0xac2   : > { %v2414_v37 = vpop.xlane.xlu0 %2413 }
 0xac3   : > { %4218 = vmatpush3.msra.mxu1 %v2414_v37  ;;  %v2408_v22 = vpop.xlane.xlu1 %2407 }
 0xac4   : > { %4219 = vmatprep.subr.mxu1 %v6518_v18 }
 0xac6   : > { %v2411_v17 = vpop.xlane.xlu0 %2410 }
 0xac7   : > { %4220 = vmatpush3.msra.mxu1 %v2411_v17 }
 0xac8   : > { %4221 = vmatprep.subr.mxu1 %v6518_v18 }
 0xac9   : > { %4222 = vmatpush3.msra.mxu1 %v2408_v22 }
 0xaca   : > { %4224 = vmatmul.mubr.msk.f32.vlgmr.msra.gmra.mxu1 %vm532_vm1, %v5626_v15 }
 0xacb   : > { %4228 = vmatprep.mubr.msk.f32.mxu1 %vm606_vm2, %v5633_v47 }
 0xace   : > { %v2631_v55 = vpop.permute.xlu0 %2630 }
 0xad2   : > { %v2659_v54 = vpop.permute.xlu0 %2658 }
 0xb8a   : > { %v2484_v33 = vpop.f32.mrf.mxu1 }
 0xb8b   : > { %4226 = vmatprep.subr.mxu1 %v2484_v33 }
 0xb8c   : > { %v4225_v24 = vpop.f32.mrf.mxu1  ;;  %4227 = vmatpush3.msra.mxu1 %v2484_v33 }
 0xb8d   : > { %4229 = vmatmul.mubr.msk.f32.vlgmr.msra.gmra.mxu1 %vm606_vm2, %v5640_v46  ;;  %v2195_v46 = vld [vmem:[%s6405_s10] sm:$0xff] }
 0xb8e   : > { %4231 = vmatprep.mubr.msk.f32.mxu1 %vm606_vm2, %v5647_v39  ;;  %v2196_v39 = vld [vmem:[%s6405_s10 + $0x8] sm:$0xff] }
 0xb91   : > { %4232 = vmatmul.mubr.msk.f32.gmra.mxu1 %vm606_vm2, %v5654_v43  ;;  %v2626_v43 = vpop.permute.xlu1 %2625 }
 0xb92   : > { %2895 = vmatprep.mubr.bf16.mxu1 %v6519_v52 }
 0xb95   : > { %v2654_v38 = vpop.permute.xlu1 %2653 }
 0xc4d   : > { %v4230_v27 = vpop.f32.mrf.mxu1 }
 0xc4e   : > { %v2574_v19 = vmul.f32 0.0009765625, %v4230_v27 }
 0xc4f   : > { %v2554_v3 = vpop.f32.mrf.mxu1 }
 0xc50   : > { %v2578_v6 = vadd.f32 1e-05, %v2574_v19  ;;  %v2573_v8 = vmul.f32 0.0009765625, %v2554_v3 }
 0xc51   : > { %v4233_v50 = vpop.f32.mrf.mxu1 }
 0xc52   : > { %4384 = vrsqrt.f32 %v2578_v6  ;;  %v2577_v2 = vadd.f32 1e-05, %v2573_v8  ;;  %v2576_v10 = vmul.f32 0.0009765625, %v4233_v50 }
 0xc53   : > { %v2564_v35 = vpop.f32.mrf.mxu1 }
 0xc54   : > { %4386 = vrsqrt.f32 %v2577_v2  ;;  %v2580_v12 = vadd.f32 1e-05, %v2576_v10  ;;  %v2575_v42 = vmul.f32 0.0009765625, %v2564_v35 }
 0xc56   : > { %v2579_v18 = vadd.f32 1e-05, %v2575_v42  ;;  %4388 = vrsqrt.f32 %v2580_v12 }
 0xc58   : > { %4390 = vrsqrt.f32 %v2579_v18 }
 0xc5f   : > { %v4385_v44 = vpop.eup %4384 }
 0xc60   : > { %2592 = vperm.xlu0 %4306, %v4385_v44  }
 0xc61   : > { %v4387_v45 = vpop.eup %4386 }
 0xc62   : > { %2587 = vperm.xlu1 %4307, %v4387_v45  }
 0xc63   : > { %v4389_v15 = vpop.eup %4388 }
 0xc65   : > { %v4391_v47 = vpop.eup %4390 }
 0xc66   : > { %2602 = vperm.xlu1 %4307, %v4389_v15   ;;  %2597 = vperm.xlu0 %4306, %v4391_v47  }
 0xc6a   : > { %2615 = vperm.xlu1 %4307, %v2191_v57   ;;  %2620 = vperm.xlu0 %4306, %v2192_v63  }
 0xc6e   : > { %2643 = vperm.xlu1 %4307, %v2195_v46   ;;  %2648 = vperm.xlu0 %4306, %v2196_v39  }
 0xcdb   : > { %v2593_v14 = vpop.permute.xlu0 %2592 }
 0xcdc   : > { %v2607_v32 = vmul.f32 %v2593_v14, %v5686_v58  ;;  %v2608_v7 = vmul.f32 %v2593_v14, %v5689_v48 }
 0xcdd   : > { %v2588_v16 = vpop.permute.xlu1 %2587 }
 0xcde   : > { %v2605_v9 = vmul.f32 %v2588_v16, %v5673_v5 }
 0xce1   : > { %v2598_v20 = vpop.permute.xlu0 %2597  ;;  %v2603_v29 = vpop.permute.xlu1 %2602 }
 0xce2   : > { %v2609_v56 = vmul.f32 %v2598_v20, %v5668_v36  ;;  %v2610_v13 = vmul.f32 %v2598_v20, %v5671_v0  ;;  %v2611_v59 = vmul.f32 %v2603_v29, %v5659_v49  ;;  %v2612_v28 = vmul.f32 %v2603_v29, %v5661_v60 }
 0xce3   : > { %v2606_v49 = vmul.f32 %v2588_v16, %v5675_v4 }
 0xce4   : > { %v2637_v26 = vmul.f32 %v2626_v43, %v2609_v56  ;;  %v2638_v31 = vmul.f32 %v2626_v43, %v2610_v13  ;;  %v2639_v62 = vmul.f32 %v2631_v55, %v2611_v59  ;;  %v2640_v23 = vmul.f32 %v2631_v55, %v2612_v28 }
 0xce5   : > { %v2621_v11 = vpop.permute.xlu0 %2620  ;;  %v2616_v1 = vpop.permute.xlu1 %2615 }
 0xce6   : > { %v2665_v30 = vadd.f32 %v2654_v38, %v2637_v26  ;;  %v2666_v36 = vadd.f32 %v2654_v38, %v2638_v31  ;;  %v2667_v51 = vadd.f32 %v2659_v54, %v2639_v62  ;;  %v2668_v0 = vadd.f32 %v2659_v54, %v2640_v23 }
 0xce7   : > { %v2635_v61 = vmul.f32 %v2621_v11, %v2607_v32  ;;  %v2636_v60 = vmul.f32 %v2621_v11, %v2608_v7  ;;  %v2633_v21 = vmul.f32 %v2616_v1, %v2605_v9  ;;  %v2634_v58 = vmul.f32 %v2616_v1, %v2606_v49  ;;  %v4327_v7 = vld [vmem:[%s6523_s18 + $0x40] sm:$0xff]   ;;  %v4329_v9 = vld [vmem:[%s6523_s18 + $0x48] sm:$0xff]  }
 0xce8   : > { %v4030_v53 = vmul.f32 -1.442695, %v2665_v30  ;;  %v4031_v25 = vmul.f32 -1.442695, %v2666_v36  ;;  %v4032_v40 = vmul.f32 -1.442695, %v2667_v51 }
 0xce9   : > { %v4033_v34 = vmul.f32 -1.442695, %v2668_v0  ;;  %v2649_v41 = vpop.permute.xlu0 %2648  ;;  %v2644_v48 = vpop.permute.xlu1 %2643 }
 0xcea   : > { %4392 = vpow2.f32 %v4030_v53  ;;  %v2663_v5 = vadd.f32 %v2649_v41, %v2635_v61  ;;  %v2664_v37 = vadd.f32 %v2649_v41, %v2636_v60  ;;  %v2661_v17 = vadd.f32 %v2644_v48, %v2633_v21  ;;  %v6526_v21 = vld [vmem:[#allocation18_spill] sm:$0xff]  ;;  %v4341_v60 = vld [vmem:[%s6523_s18 + $0x78] sm:$0xff]  }
 0xceb   : > { %4394 = vpow2.f32 %v4031_v25  ;;  %v2662_v22 = vadd.f32 %v2644_v48, %v2634_v58  ;;  %v6527_v58 = vld [vmem:[#allocation17_spill] sm:$0xff] }
 0xcec   : > { %4396 = vpow2.f32 %v4032_v40  ;;  %v4028_v33 = vmul.f32 -1.442695, %v2663_v5  ;;  %v4029_v24 = vmul.f32 -1.442695, %v2664_v37  ;;  %v4026_v4 = vmul.f32 -1.442695, %v2661_v17 }
 0xced   : > { %4398 = vpow2.f32 %v4033_v34  ;;  %v4027_v27 = vmul.f32 -1.442695, %v2662_v22 }
 0xcee   : > { %4400 = vpow2.f32 %v4028_v33 }
 0xcef   : > { %4402 = vpow2.f32 %v4029_v24 }
 0xcf0   : > { %4404 = vpow2.f32 %v4026_v4 }
 0xcf1   : > { %4406 = vpow2.f32 %v4027_v27 }
 0xcf7   : > { %v4393_v19 = vpop.eup %4392 }
 0xcf8   : > { %v4395_v3 = vpop.eup %4394  ;;  %v2697_v6 = vadd.f32 1.0, %v4393_v19 }
 0xcf9   : > { %v4397_v8 = vpop.eup %4396  ;;  %v2698_v50 = vadd.f32 1.0, %v4395_v3 }
 0xcfa   : > { %v4399_v2 = vpop.eup %4398  ;;  %4408 = vrcp.f32 %v2697_v6  ;;  %v2699_v10 = vadd.f32 1.0, %v4397_v8 }
 0xcfb   : > { %v4401_v35 = vpop.eup %4400  ;;  %4410 = vrcp.f32 %v2698_v50  ;;  %v2700_v12 = vadd.f32 1.0, %v4399_v2  ;;  %v6528_v2 = vld [vmem:[#allocation20_spill] sm:$0xff] }
 0xcfc   : > { %v4403_v42 = vpop.eup %4402  ;;  %4412 = vrcp.f32 %v2699_v10  ;;  %v2695_v18 = vadd.f32 1.0, %v4401_v35  ;;  %v6529_v35 = vld [vmem:[#allocation19_spill] sm:$0xff] }
 0xcfd   : > { %v4405_v44 = vpop.eup %4404  ;;  %4414 = vrcp.f32 %v2700_v12  ;;  %v2696_v45 = vadd.f32 1.0, %v4403_v42 }
 0xcfe   : > { %v4407_v15 = vpop.eup %4406  ;;  %4416 = vrcp.f32 %v2695_v18  ;;  %v2693_v47 = vadd.f32 1.0, %v4405_v44 }
 0xcff   : > { %4418 = vrcp.f32 %v2696_v45  ;;  %v2694_v57 = vadd.f32 1.0, %v4407_v15 }
 0xd00   : > { %4420 = vrcp.f32 %v2693_v47 }
 0xd01   : > { %4422 = vrcp.f32 %v2694_v57 }
 0xd07   : > { %v4409_v63 = vpop.eup %4408 }
 0xd08   : > { %v4411_v46 = vpop.eup %4410  ;;  %v5741_v39 = vmul.f32 %v4409_v63, %v2665_v30 }
 0xd09   : > { %v4413_v43 = vpop.eup %4412  ;;  %v5743_v55 = vmul.f32 %v4411_v46, %v2666_v36 }
 0xd0a   : > { %v4415_v38 = vpop.eup %4414  ;;  %v5745_v54 = vmul.f32 %v4413_v43, %v2667_v51 }
 0xd0b   : > { %v4417_v14 = vpop.eup %4416  ;;  %v5747_v16 = vmul.f32 %v4415_v38, %v2668_v0  ;;  %v6530_v38 = vld [vmem:[#allocation21_spill] sm:$0xff] }
 0xd0c   : > { %v4419_v20 = vpop.eup %4418  ;;  %v5749_v29 = vmul.f32 %v4417_v14, %v2663_v5  ;;  %v2736_v56 = vpack.c.bf16 %v5745_v54, %v5741_v39  ;;  %v6531_v14 = vld [vmem:[#allocation22_spill] sm:$0xff] }
 0xd0d   : > { %v4421_v13 = vpop.eup %4420  ;;  %v5753_v59 = vmul.f32 %v4419_v20, %v2664_v37  ;;  %v2737_v28 = vpack.c.bf16 %v5747_v16, %v5743_v55 }
 0xd0e   : > { %v4423_v26 = vpop.eup %4422  ;;  %v2717_v31 = vmul.f32 %v4421_v13, %v2661_v17  ;;  %2740 = vrot.lane.b32.xlu0 %v5749_v29, %s4570_s14 }
 0xd0f   : > { %v5759_v62 = vmul.f32 %v4423_v26, %v2662_v22  ;;  %2875 = vmatprep.subr.bf16.mxu1 %v2737_v28 }
 0xd10   : > { %2876 = vmatpush1.bf16.msra.mxu1 %v2736_v56  ;;  %2738 = vrot.lane.b32.xlu1 %v2717_v31, %s4570_s14  ;;  %v2734_v23 = vpack.c.bf16 %v5749_v29, %v2717_v31 }
 0xd11   : > { %v2735_v32 = vpack.c.bf16 %v5753_v59, %v5759_v62 }
 0xd12   : > { %2748 = vrot.lane.b32.xlu0 %v5753_v59, %s4570_s14 }
 0xd13   : > { %2877 = vmatprep.subr.bf16.mxu1 %v2735_v32 }
 0xd14   : > { %2878 = vmatpush1.bf16.msra.mxu1 %v2734_v23  ;;  %2746 = vrot.lane.b32.xlu1 %v5759_v62, %s4570_s14 }
 0xd16   : > { %2918 = vrot.lane.b32.xlu0 %v5749_v29, %s4571_s16 }
 0xd17   : > { %4044 = vmatmul.mubr.msk.bf16.vlgmr.msra.gmra.mxu1 %vm532_vm1, %v4327_v7 }
 0xd18   : > { %2916 = vrot.lane.b32.xlu1 %v2717_v31, %s4571_s16  ;;  %2905 = vmatprep.mubr.bf16.mxu1 %v6519_v52 }
 0xd1a   : > { %2926 = vrot.lane.b32.xlu0 %v5753_v59, %s4571_s16 }
 0xd1c   : > { %2924 = vrot.lane.b32.xlu1 %v5759_v62, %s4571_s16 }
 0xd1e   : > { %3036 = vrot.lane.b32.xlu0 %v5749_v29, %s4572_s17 }
 0xd1f   : > { %4045 = vmatmul.mubr.msk.bf16.gmra.mxu1 %vm532_vm1, %v4329_v9  ;;  %v6532_v9 = vld [vmem:[#allocation24_spill] sm:$0xff] }
 0xd20   : > { %3034 = vrot.lane.b32.xlu1 %v2717_v31, %s4572_s17  ;;  %3123 = vmatprep.mubr.bf16.mxu1 %v6519_v52 }
 0xd22   : > { %3044 = vrot.lane.b32.xlu0 %v5753_v59, %s4572_s17 }
 0xd24   : > { %3042 = vrot.lane.b32.xlu1 %v5759_v62, %s4572_s17 }
 0xd26   : > { %3154 = vrot.lane.b32.xlu0 %v5749_v29, %s4573_s21 }
 0xd28   : > { %3152 = vrot.lane.b32.xlu1 %v2717_v31, %s4573_s21 }
 0xd2a   : > { %3162 = vrot.lane.b32.xlu0 %v5753_v59, %s4573_s21 }
 0xd2c   : > { %3160 = vrot.lane.b32.xlu1 %v5759_v62, %s4573_s21 }
 0xd2e   : > { %3272 = vrot.lane.b32.xlu0 %v5749_v29, %s6520_s12 }
 0xd30   : > { %3270 = vrot.lane.b32.xlu1 %v2717_v31, %s6520_s12 }
 0xd32   : > { %3280 = vrot.lane.b32.xlu0 %v5753_v59, %s6520_s12 }
 0xd34   : > { %3278 = vrot.lane.b32.xlu1 %v5759_v62, %s6520_s12 }
 0xd36   : > { %3390 = vrot.lane.b32.xlu0 %v5749_v29, %s6521_s13 }
 0xd38   : > { %3388 = vrot.lane.b32.xlu1 %v2717_v31, %s6521_s13 }
 0xd3a   : > { %3398 = vrot.lane.b32.xlu0 %v5753_v59, %s6521_s13 }
 0xd3c   : > { %3396 = vrot.lane.b32.xlu1 %v5759_v62, %s6521_s13 }
 0xd3e   : > { %3508 = vrot.lane.b32.xlu0 %v5749_v29, %s6522_s19 }
 0xd40   : > { %3506 = vrot.lane.b32.xlu1 %v2717_v31, %s6522_s19 }
 0xd42   : > { %2744 = vrot.lane.b32.xlu0 %v5745_v54, %s4570_s14 }
 0xd44   : > { %2742 = vrot.lane.b32.xlu1 %v5741_v39, %s4570_s14 }
 0xd46   : > { %2752 = vrot.lane.b32.xlu0 %v5747_v16, %s4570_s14 }
 0xd48   : > { %2750 = vrot.lane.b32.xlu1 %v5743_v55, %s4570_s14 }
 0xd4a   : > { %2922 = vrot.lane.b32.xlu0 %v5745_v54, %s4571_s16 }
 0xd4c   : > { %3514 = vrot.lane.b32.xlu1 %v5759_v62, %s6522_s19 }
 0xd4e   : > { %2930 = vrot.lane.b32.xlu0 %v5747_v16, %s4571_s16 }
 0xd50   : > { %3624 = vrot.lane.b32.xlu1 %v2717_v31, %s4577_s2 }
 0xd52   : > { %3040 = vrot.lane.b32.xlu0 %v5745_v54, %s4572_s17 }
 0xd54   : > { %2920 = vrot.lane.b32.xlu1 %v5741_v39, %s4571_s16 }
 0xd56   : > { %3048 = vrot.lane.b32.xlu0 %v5747_v16, %s4572_s17 }
 0xd58   : > { %2928 = vrot.lane.b32.xlu1 %v5743_v55, %s4571_s16 }
 0xd5a   : > { %3158 = vrot.lane.b32.xlu0 %v5745_v54, %s4573_s21 }
 0xd5c   : > { %3038 = vrot.lane.b32.xlu1 %v5741_v39, %s4572_s17 }
 0xd5e   : > { %3166 = vrot.lane.b32.xlu0 %v5747_v16, %s4573_s21 }
 0xd60   : > { %3046 = vrot.lane.b32.xlu1 %v5743_v55, %s4572_s17  ;;  %s6524_s17 = sld [smem:[#allocation41_spill]] }
 0xd62   : > { %3276 = vrot.lane.b32.xlu0 %v5745_v54, %s6520_s12 }
 0xd64   : > { %3156 = vrot.lane.b32.xlu1 %v5741_v39, %s4573_s21 }
 0xd66   : > { %3284 = vrot.lane.b32.xlu0 %v5747_v16, %s6520_s12  ;;  %v2726_v49 = vld [vmem:[%s6524_s17 + $0x8] sm:$0xff]  ;;  %v2725_v40 = vld [vmem:[%s6524_s17] sm:$0xff]  ;;  %v2728_v17 = vld [vmem:[%s6524_s17 + $0x18] sm:$0xff] }
 0xd67   : > { %v2727_v4 = vld [vmem:[%s6524_s17 + $0x10] sm:$0xff] }
 0xd68   : > { %3164 = vrot.lane.b32.xlu1 %v5743_v55, %s4573_s21  ;;  %s6551_s21 = sld [smem:[#allocation42_spill]] }
 0xd6a   : > { %3394 = vrot.lane.b32.xlu0 %v5745_v54, %s6521_s13 }
 0xd6c   : > { %3274 = vrot.lane.b32.xlu1 %v5741_v39, %s6520_s12 }
 0xd6e   : > { %3402 = vrot.lane.b32.xlu0 %v5747_v16, %s6521_s13 }
 0xd70   : > { %3282 = vrot.lane.b32.xlu1 %v5743_v55, %s6520_s12  ;;  %s6351_s12 = scalar_lea.hbm %s6551_s21, %s4117_s24 }
 0xd72   : > { %3512 = vrot.lane.b32.xlu0 %v5745_v54, %s6522_s19 }
 0xd74   : > { %3392 = vrot.lane.b32.xlu1 %v5741_v39, %s6521_s13 }
 0xd76   : > { %3520 = vrot.lane.b32.xlu0 %v5747_v16, %s6522_s19 }
 0xd78   : > { %3400 = vrot.lane.b32.xlu1 %v5743_v55, %s6521_s13  ;;  %s4493_s13 = scalar_lea.vmem %s6343_s11, 512 }
 0xd79   : > { %p4494_p11 = scmp.ne.s32.totalorder %s6343_s11, %s4493_s13 }
 0xd7a   : > { %3630 = vrot.lane.b32.xlu0 %v5745_v54, %s4577_s2 }
 0xd7b   : > { %p4495_p9 = pnand %p4494_p11, %p6552_p7 }
 0xd7c   : > { %3510 = vrot.lane.b32.xlu1 %v5741_v39, %s6522_s19 }
 0xd7d   : > { %p4496_p10 = pneg %p4495_p9 }
 0xd7e   : > { %3638 = vrot.lane.b32.xlu0 %v5747_v16, %s4577_s2 }
 0xd80   : > { %3518 = vrot.lane.b32.xlu1 %v5743_v55, %s6522_s19  ;;  %v5880_v11 = vpop.permute.xlu0 %2740 }
 0xd82   : > { %v5882_v1 = vpop.permute.xlu1 %2738  ;;  %3516 = vrot.lane.b32.xlu0 %v5753_v59, %s6522_s19  ;;  %s4497_s19 = sshll.u32 %s4578_s29, 4  ;;  %s4498_s19 = int_to_ptr.vmem [resolvable:$false] %s4497_s19 }
 0xd83   : > { %s4499_s23 = scalar_lea.vmem %s4498_s19, 1024  ;;  %p4500_p12 = scmp.lt.s32.totalorder %s6343_s11, %s4498_s19 }
 0xd84   : > { %3628 = vrot.lane.b32.xlu1 %v5741_v39, %s4577_s2  ;;  %v5888_v30 = vpop.permute.xlu0 %2748  ;;  %p4501_p13 = scmp.lt.s32.totalorder %s4499_s23, %s4493_s13 }
 0xd86   : > { %v5890_v36 = vpop.permute.xlu1 %2746  ;;  %3626 = vrot.lane.b32.xlu0 %v5749_v29, %s4577_s2  ;;  %p4502_p0 = por %p4501_p13, %p4500_p12 }
 0xd88   : > { %3636 = vrot.lane.b32.xlu1 %v5743_v55, %s4577_s2  ;;  %v2919_v51 = vpop.permute.xlu0 %2918  ;;  %p4503_p5 = pnand %p4502_p0, %p4496_p10 }
 0xd8a   : > { %v2917_v0 = vpop.permute.xlu1 %2916  ;;  %3634 = vrot.lane.b32.xlu0 %v5753_v59, %s4577_s2 }
 0xd8c   : > { %3632 = vrot.lane.b32.xlu1 %v5759_v62, %s4577_s2  ;;  %v2927_v61 = vpop.permute.xlu0 %2926  ;;  %s3807_s2 = scalar_lea.sflag [#allocation4], %s4773_s30 }
 0xd8d   : > { %v2933_v53 = vsel %vm1290_vm4, %v2919_v51, %v2927_v61  ;;  %v2937_v25 = vsel %vm1290_vm4, %v2927_v61, %v2919_v51 }
 0xd8e   : > { %v5911_v34 = vmul.f32 %v2937_v25, %v6526_v21  ;;  %v5914_v41 = vmul.f32 %v2933_v53, %v6527_v58  ;;  %v2925_v48 = vpop.permute.xlu1 %2924  ;;  %3749 = vperm.xlu0 %4306, %v2726_v49  }
 0xd8f   : > { %v2932_v5 = vsel %vm1290_vm4, %v2917_v0, %v2925_v48  ;;  %v2936_v37 = vsel %vm1290_vm4, %v2925_v48, %v2917_v0  ;;  %v6533_v0 = vld [vmem:[#allocation23_spill] sm:$0xff] }
 0xd90   : > { %v5924_v22 = vmul.f32 %v2936_v37, %v6526_v21  ;;  %v5927_v33 = vmul.f32 %v2932_v5, %v6527_v58  ;;  %3744 = vperm.xlu1 %4307, %v2725_v40   ;;  %v3037_v24 = vpop.permute.xlu0 %3036 }
 0xd92   : > { %v2948_v27 = vpack.c.bf16 %v5911_v34, %v5924_v22  ;;  %v3035_v19 = vpop.permute.xlu1 %3034  ;;  %3759 = vperm.xlu0 %4306, %v2728_v17   ;;  %v2949_v3 = vpack.c.bf16 %v5914_v41, %v5927_v33  ;;  %v4330_v41 = vld [vmem:[%s6523_s18 + $0x10] sm:$0xff]  }
 0xd94   : > { %3754 = vperm.xlu1 %4307, %v2727_v4   ;;  %v3045_v6 = vpop.permute.xlu0 %3044 }
 0xd95   : > { %v3051_v8 = vsel %vm1417_vm5, %v3037_v24, %v3045_v6  ;;  %v3055_v50 = vsel %vm1417_vm5, %v3045_v6, %v3037_v24 }
 0xd96   : > { %v5941_v10 = vmul.f32 %v3055_v50, %v6528_v2  ;;  %v5944_v12 = vmul.f32 %v3051_v8, %v6529_v35  ;;  %v3043_v42 = vpop.permute.xlu1 %3042  ;;  %v6534_v8 = vld [vmem:[#allocation25_spill] sm:$0xff] }
 0xd97   : > { %v3050_v18 = vsel %vm1417_vm5, %v3035_v19, %v3043_v42  ;;  %v3054_v44 = vsel %vm1417_vm5, %v3043_v42, %v3035_v19  ;;  %v6535_v42 = vld [vmem:[#allocation26_spill] sm:$0xff] }
 0xd98   : > { %v5951_v45 = vmul.f32 %v3054_v44, %v6528_v2  ;;  %v5954_v15 = vmul.f32 %v3050_v18, %v6529_v35  ;;  %v3155_v47 = vpop.permute.xlu0 %3154 }
 0xd9a   : > { %v3066_v57 = vpack.c.bf16 %v5941_v10, %v5951_v45  ;;  %v3153_v63 = vpop.permute.xlu1 %3152  ;;  %v3067_v46 = vpack.c.bf16 %v5944_v12, %v5954_v15  ;;  %v4331_v12 = vld [vmem:[%s6523_s18 + $0x18] sm:$0xff]   ;;  %v4332_v15 = vld [vmem:[%s6523_s18 + $0x20] sm:$0xff]  }
 0xd9c   : > { %v3163_v39 = vpop.permute.xlu0 %3162 }
 0xd9d   : > { %v3169_v43 = vsel %vm1544_vm6, %v3155_v47, %v3163_v39  ;;  %v3173_v55 = vsel %vm1544_vm6, %v3163_v39, %v3155_v47 }
 0xd9e   : > { %v5965_v54 = vmul.f32 %v3173_v55, %v6530_v38  ;;  %v5968_v16 = vmul.f32 %v3169_v43, %v6531_v14  ;;  %v3161_v20 = vpop.permute.xlu1 %3160 }
 0xd9f   : > { %v3168_v29 = vsel %vm1544_vm6, %v3153_v63, %v3161_v20  ;;  %v3172_v56 = vsel %vm1544_vm6, %v3161_v20, %v3153_v63 }
 0xda0   : > { %v5975_v13 = vmul.f32 %v3172_v56, %v6530_v38  ;;  %v5978_v59 = vmul.f32 %v3168_v29, %v6531_v14  ;;  %v3273_v28 = vpop.permute.xlu0 %3272 }
 0xda2   : > { %v3184_v26 = vpack.c.bf16 %v5965_v54, %v5975_v13  ;;  %v3271_v31 = vpop.permute.xlu1 %3270  ;;  %v3185_v62 = vpack.c.bf16 %v5968_v16, %v5978_v59  ;;  %v4333_v16 = vld [vmem:[%s6523_s18 + $0x28] sm:$0xff]   ;;  %v4334_v59 = vld [vmem:[%s6523_s18 + $0x30] sm:$0xff]  }
 0xda4   : > { %v3281_v23 = vpop.permute.xlu0 %3280 }
 0xda5   : > { %v3287_v32 = vsel %vm1671_vm7, %v3273_v28, %v3281_v23  ;;  %v3291_v7 = vsel %vm1671_vm7, %v3281_v23, %v3273_v28  ;;  %v2755_v23 = vsel %vm1103_vm3, %v5880_v11, %v5888_v30 }
 0xda6   : > { %v5989_v51 = vmul.f32 %v3287_v32, %v6532_v9  ;;  %v5992_v49 = vmul.f32 %v3291_v7, %v6533_v0  ;;  %v3279_v61 = vpop.permute.xlu1 %3278  ;;  %v2754_v7 = vsel %vm1103_vm3, %v5882_v1, %v5890_v36 }
 0xda7   : > { %v3286_v53 = vsel %vm1671_vm7, %v3271_v31, %v3279_v61  ;;  %v3290_v25 = vsel %vm1671_vm7, %v3279_v61, %v3271_v31 }
 0xda8   : > { %v5999_v40 = vmul.f32 %v3286_v53, %v6532_v9  ;;  %v6002_v48 = vmul.f32 %v3290_v25, %v6533_v0  ;;  %v3391_v5 = vpop.permute.xlu0 %3390  ;;  %v6536_v25 = vld [vmem:[#allocation16_spill] sm:$0xff] }
 0xdaa   : > { %v3389_v17 = vpop.permute.xlu1 %3388  ;;  %v3303_v24 = vpack.c.bf16 %v5992_v49, %v6002_v48  ;;  %v4336_v48 = vld [vmem:[%s6523_s18 + $0x50] sm:$0xff]  }
 0xdac   : > { %v3399_v4 = vpop.permute.xlu0 %3398 }
 0xdad   : > { %v3405_v19 = vsel %vm1798_vm8, %v3391_v5, %v3399_v4  ;;  %v3409_v6 = vsel %vm1798_vm8, %v3399_v4, %v3391_v5 }
 0xdae   : > { %v6013_v50 = vmul.f32 %v3405_v19, %v6534_v8  ;;  %v6016_v18 = vmul.f32 %v3409_v6, %v6535_v42  ;;  %v3397_v44 = vpop.permute.xlu1 %3396  ;;  %v2759_v6 = vsel %vm1103_vm3, %v5888_v30, %v5880_v11 }
 0xdaf   : > { %v3404_v47 = vsel %vm1798_vm8, %v3389_v17, %v3397_v44  ;;  %v3408_v63 = vsel %vm1798_vm8, %v3397_v44, %v3389_v17  ;;  %v6537_v17 = vld [vmem:[#allocation15_spill] sm:$0xff]  ;;  %v2764_v56 = vmul.f32 %v2759_v6, %v6536_v25 }
 0xdb0   : > { %v6023_v39 = vmul.f32 %v3404_v47, %v6534_v8  ;;  %v6026_v43 = vmul.f32 %v3408_v63, %v6535_v42  ;;  %v6028_v55 = vpop.permute.xlu0 %3508  ;;  %v2765_v44 = vmul.f32 %v2755_v23, %v6537_v17 }
 0xdb2   : > { %v6032_v29 = vpop.permute.xlu1 %3506 }
 0xdb4   : > { %v2745_v28 = vpop.permute.xlu0 %2744 }
 0xdb6   : > { %v2743_v31 = vpop.permute.xlu1 %2742 }
 0xdb8   : > { %v2753_v32 = vpop.permute.xlu0 %2752 }
 0xdb9   : > { %v2757_v61 = vsel %vm1103_vm3, %v2745_v28, %v2753_v32  ;;  %v2761_v53 = vsel %vm1103_vm3, %v2753_v32, %v2745_v28  ;;  %v2758_v28 = vsel %vm1103_vm3, %v5890_v36, %v5882_v1  ;;  %v2763_v32 = vmul.f32 %v2754_v7, %v6537_v17 }
 0xdba   : > { %v2768_v5 = vmul.f32 %v2761_v53, %v6536_v25  ;;  %v2769_v4 = vmul.f32 %v2757_v61, %v6537_v17  ;;  %v2751_v19 = vpop.permute.xlu1 %2750 }
 0xdbb   : > { %v2756_v47 = vsel %vm1103_vm3, %v2743_v31, %v2751_v19  ;;  %v2760_v63 = vsel %vm1103_vm3, %v2751_v19, %v2743_v31  ;;  %v2762_v31 = vmul.f32 %v2758_v28, %v6536_v25  ;;  %v2771_v37 = vpack.c.bf16 %v2765_v44, %v2763_v32 }
 0xdbc   : > { %v2766_v61 = vmul.f32 %v2760_v63, %v6536_v25  ;;  %v2767_v53 = vmul.f32 %v2756_v47, %v6537_v17  ;;  %v2923_v11 = vpop.permute.xlu0 %2922 }
 0xdbd   : > { %v2770_v36 = vpack.c.bf16 %v2764_v56, %v2762_v31 }
 0xdbe   : > { %v2772_v30 = vpack.c.bf16 %v2768_v5, %v2766_v61  ;;  %v6066_v23 = vpop.permute.xlu1 %3514  ;;  %v2773_v20 = vpack.c.bf16 %v2769_v4, %v2767_v53  ;;  %v4326_v5 = vld [vmem:[%s6523_s18] sm:$0xff]   ;;  %v4328_v61 = vld [vmem:[%s6523_s18 + $0x8] sm:$0xff]  }
 0xdc0   : > { %2806 = vmatprep.subr.bf16.mxu0 %v2773_v20  ;;  %v2931_v19 = vpop.permute.xlu0 %2930 }
 0xdc1   : > { %2807 = vmatpush1.bf16.msra.mxu0 %v2772_v30  ;;  %v2935_v20 = vsel %vm1290_vm4, %v2923_v11, %v2931_v19  ;;  %v2939_v25 = vsel %vm1290_vm4, %v2931_v19, %v2923_v11 }
 0xdc2   : > { %2808 = vmatprep.subr.bf16.mxu0 %v2771_v37  ;;  %v6070_v1 = vpop.permute.xlu1 %3624  ;;  %v2946_v44 = vmul.f32 %v2939_v25, %v6526_v21  ;;  %v2947_v47 = vmul.f32 %v2935_v20, %v6527_v58 }
 0xdc4   : > { %v3041_v7 = vpop.permute.xlu0 %3040 }
 0xdc5   : > { %2809 = vmatpush1.bf16.msra.mxu0 %v2770_v36 }
 0xdc6   : > { %v2921_v17 = vpop.permute.xlu1 %2920 }
 0xdc8   : > { %4040 = vmatmul.mubr.msk.bf16.vlgmr.msra.gmra.mxu0 %vm532_vm1, %v4326_v5  ;;  %v3049_v4 = vpop.permute.xlu0 %3048 }
 0xdc9   : > { %2836 = vmatprep.mubr.bf16.mxu0 %v6519_v52  ;;  %v3053_v19 = vsel %vm1417_vm5, %v3041_v7, %v3049_v4 }
 0xdca   : > { %v2929_v37 = vpop.permute.xlu1 %2928  ;;  %v3065_v20 = vmul.f32 %v3053_v19, %v6529_v35 }
 0xdcb   : > { %v2934_v56 = vsel %vm1290_vm4, %v2921_v17, %v2929_v37  ;;  %v2938_v6 = vsel %vm1290_vm4, %v2929_v37, %v2921_v17 }
 0xdcc   : > { %v2944_v63 = vmul.f32 %v2938_v6, %v6526_v21  ;;  %v2945_v28 = vmul.f32 %v2934_v56, %v6527_v58  ;;  %v3159_v32 = vpop.permute.xlu0 %3158  ;;  %v3057_v21 = vsel %vm1417_vm5, %v3049_v4, %v3041_v7 }
 0xdcd   : > { %v3064_v17 = vmul.f32 %v3057_v21, %v6528_v2 }
 0xdce   : > { %v2950_v53 = vpack.c.bf16 %v2946_v44, %v2944_v63  ;;  %v3039_v11 = vpop.permute.xlu1 %3038  ;;  %v2951_v30 = vpack.c.bf16 %v2947_v47, %v2945_v28 }
 0xdd0   : > { %4041 = vmatmul.mubr.msk.bf16.gmra.mxu0 %vm532_vm1, %v4328_v61  ;;  %2985 = vmatprep.subr.bf16.mxu0 %v2951_v30  ;;  %v3167_v31 = vpop.permute.xlu0 %3166 }
 0xdd1   : > { %2986 = vmatpush1.bf16.msra.mxu0 %v2950_v53  ;;  %3005 = vmatprep.mubr.bf16.mxu0 %v6519_v52 }
 0xdd2   : > { %2987 = vmatprep.subr.bf16.mxu0 %v2949_v3  ;;  %v3047_v58 = vpop.permute.xlu1 %3046 }
 0xdd3   : > { %v3052_v36 = vsel %vm1417_vm5, %v3039_v11, %v3047_v58  ;;  %v3056_v5 = vsel %vm1417_vm5, %v3047_v58, %v3039_v11 }
 0xdd4   : > { %v3062_v7 = vmul.f32 %v3056_v5, %v6528_v2  ;;  %v3063_v4 = vmul.f32 %v3052_v36, %v6529_v35  ;;  %v3277_v25 = vpop.permute.xlu0 %3276  ;;  %v3171_v2 = vsel %vm1544_vm6, %v3159_v32, %v3167_v31  ;;  %v3175_v35 = vsel %vm1544_vm6, %v3167_v31, %v3159_v32 }
 0xdd5   : > { %2988 = vmatpush1.bf16.msra.mxu0 %v2948_v27  ;;  %v3182_v27 = vmul.f32 %v3175_v35, %v6530_v38  ;;  %v3183_v44 = vmul.f32 %v3171_v2, %v6531_v14  ;;  %v6539_v2 = vpack.c.bf16 %v6016_v18, %v6026_v43  ;;  %v4337_v18 = vld [vmem:[%s6523_s18 + $0x58] sm:$0xff]  }
 0xdd6   : > { %v3068_v33 = vpack.c.bf16 %v3064_v17, %v3062_v7  ;;  %v3157_v3 = vpop.permute.xlu1 %3156  ;;  %v3069_v37 = vpack.c.bf16 %v3065_v20, %v3063_v4 }
 0xdd8   : > { %4052 = vmatmul.mubr.msk.bf16.vlgmr.msra.gmra.mxu0 %vm532_vm1, %v4330_v41  ;;  %3103 = vmatprep.subr.bf16.mxu1 %v3069_v37  ;;  %v3285_v56 = vpop.permute.xlu0 %3284 }
 0xdd9   : > { %3104 = vmatpush1.bf16.msra.mxu1 %v3068_v33  ;;  %3015 = vmatprep.mubr.bf16.mxu0 %v6519_v52  ;;  %v3293_v53 = vsel %vm1671_vm7, %v3285_v56, %v3277_v25 }
 0xdda   : > { %v3165_v6 = vpop.permute.xlu1 %3164  ;;  %3105 = vmatprep.subr.bf16.mxu1 %v3067_v46  ;;  %v3301_v30 = vmul.f32 %v3293_v53, %v6533_v0 }
 0xddb   : > { %v3170_v34 = vsel %vm1544_vm6, %v3157_v3, %v3165_v6  ;;  %v3174_v22 = vsel %vm1544_vm6, %v3165_v6, %v3157_v3 }
 0xddc   : > { %v3180_v47 = vmul.f32 %v3174_v22, %v6530_v38  ;;  %v3181_v63 = vmul.f32 %v3170_v34, %v6531_v14  ;;  %v3395_v28 = vpop.permute.xlu0 %3394  ;;  %v3289_v14 = vsel %vm1671_vm7, %v3277_v25, %v3285_v56  ;;  %v4335_v25 = vld [vmem:[%s6523_s18 + $0x38] sm:$0xff]   ;;  %v3522_v56 = vsel %vm1925_vm9, %v6032_v29, %v6066_v23  ;;  %v6540_v34 = vld [vmem:[#allocation27_spill] sm:$0xff] }
 0xddd   : > { %3106 = vmatpush1.bf16.msra.mxu1 %v3066_v57  ;;  %v3300_v11 = vmul.f32 %v3289_v14, %v6532_v9  ;;  %v3530_v53 = vmul.f32 %v3522_v56, %v6540_v34 }
 0xdde   : > { %v3186_v46 = vpack.c.bf16 %v3182_v27, %v3180_v47  ;;  %v3275_v32 = vpop.permute.xlu1 %3274  ;;  %v3187_v61 = vpack.c.bf16 %v3183_v44, %v3181_v63  ;;  %v6541_v27 = vld [vmem:[#allocation28_spill] sm:$0xff] }
 0xde0   : > { %4053 = vmatmul.mubr.msk.bf16.gmra.mxu0 %vm532_vm1, %v4331_v12  ;;  %4060 = vmatmul.mubr.msk.bf16.vlgmr.msra.gmra.mxu1 %vm532_vm1, %v4332_v15  ;;  %v3403_v38 = vpop.permute.xlu0 %3402  ;;  %v4338_v12 = vld [vmem:[%s6523_s18 + $0x60] sm:$0xff]  }
 0xde1   : > { %3221 = vmatprep.subr.bf16.mxu0 %v3187_v61  ;;  %3133 = vmatprep.mubr.bf16.mxu1 %v6519_v52  ;;  %v3411_v5 = vsel %vm1798_vm8, %v3403_v38, %v3395_v28 }
 0xde2   : > { %3222 = vmatpush1.bf16.msra.mxu0 %v3186_v46  ;;  %v3283_v10 = vpop.permute.xlu1 %3282  ;;  %3241 = vmatprep.mubr.bf16.mxu0 %v6519_v52  ;;  %v3419_v20 = vmul.f32 %v3411_v5, %v6535_v42  ;;  %v6542_v46 = vpack.c.bf16 %v6013_v50, %v6023_v39  ;;  %v4339_v5 = vld [vmem:[%s6523_s18 + $0x68] sm:$0xff]  }
 0xde3   : > { %3223 = vmatprep.subr.bf16.mxu0 %v3185_v62  ;;  %v3288_v45 = vsel %vm1671_vm7, %v3275_v32, %v3283_v10  ;;  %v3292_v57 = vsel %vm1671_vm7, %v3283_v10, %v3275_v32 }
 0xde4   : > { %v3298_v31 = vmul.f32 %v3288_v45, %v6532_v9  ;;  %v3299_v19 = vmul.f32 %v3292_v57, %v6533_v0  ;;  %v3513_v21 = vpop.permute.xlu0 %3512  ;;  %v3407_v0 = vsel %vm1798_vm8, %v3395_v28, %v3403_v38 }
 0xde6   : > { %v3304_v62 = vpack.c.bf16 %v3300_v11, %v3298_v31  ;;  %3224 = vmatpush1.bf16.msra.mxu0 %v3184_v26  ;;  %v3393_v58 = vpop.permute.xlu1 %3392  ;;  %v3305_v36 = vpack.c.bf16 %v3301_v30, %v3299_v19  ;;  %v3418_v26 = vmul.f32 %v3407_v0, %v6534_v8  ;;  %v4429_v31 = vld [vmem:[#allocation5 + $0x10] ss:$0 sm:$0xff] }
 0xde8   : > { %4061 = vmatmul.mubr.msk.bf16.gmra.mxu1 %vm532_vm1, %v4333_v16  ;;  %3339 = vmatprep.subr.bf16.mxu1 %v3305_v36  ;;  %v3521_v9 = vpop.permute.xlu0 %3520  ;;  %v4340_v36 = vld [vmem:[%s6523_s18 + $0x70] sm:$0xff]  }
 0xde9   : > { %4068 = vmatmul.mubr.msk.bf16.vlgmr.msra.gmra.mxu0 %vm532_vm1, %v4334_v59  ;;  %3340 = vmatpush1.bf16.msra.mxu1 %v3304_v62  ;;  %v3529_v37 = vsel %vm1925_vm9, %v3521_v9, %v3513_v21 }
 0xdea   : > { %v3401_v17 = vpop.permute.xlu1 %3400  ;;  %3341 = vmatprep.subr.bf16.mxu1 %v3303_v24  ;;  %3251 = vmatprep.mubr.bf16.mxu0 %v6519_v52  ;;  %v6538_v24 = vpack.c.bf16 %v5989_v51, %v5999_v40  ;;  %v3526_v51 = vsel %vm1925_vm9, %v6066_v23, %v6032_v29  ;;  %v3537_v44 = vmul.f32 %v3529_v37, %v6541_v27 }
 0xdeb   : > { %v3406_v54 = vsel %vm1798_vm8, %v3393_v58, %v3401_v17  ;;  %v3410_v13 = vsel %vm1798_vm8, %v3401_v17, %v3393_v58  ;;  %3359 = vmatprep.mubr.bf16.mxu1 %v6519_v52  ;;  %v3531_v43 = vmul.f32 %v3526_v51, %v6541_v27 }
 0xdec   : > { %v3416_v7 = vmul.f32 %v3406_v54, %v6534_v8  ;;  %v3417_v4 = vmul.f32 %v3410_v13, %v6535_v42  ;;  %v3631_v49 = vpop.permute.xlu0 %3630  ;;  %v3525_v42 = vsel %vm1925_vm9, %v3513_v21, %v3521_v9  ;;  %v4430_v21 = vld [vmem:[#allocation5 + $0x18] ss:$0 sm:$0xff] }
 0xded   : > { %3342 = vmatpush1.bf16.msra.mxu1 %v6538_v24  ;;  %v3536_v22 = vmul.f32 %v3525_v42, %v6540_v34 }
 0xdee   : > { %v3422_v41 = vpack.c.bf16 %v3418_v26, %v3416_v7  ;;  %v3511_v33 = vpop.permute.xlu1 %3510  ;;  %v3423_v3 = vpack.c.bf16 %v3419_v20, %v3417_v4 }
 0xdf0   : > { %4076 = vmatmul.mubr.msk.bf16.vlgmr.msra.gmra.mxu1 %vm532_vm1, %v4336_v48  ;;  %3457 = vmatprep.subr.bf16.mxu0 %v3423_v3  ;;  %v3639_v8 = vpop.permute.xlu0 %3638 }
 0xdf1   : > { %4069 = vmatmul.mubr.msk.bf16.gmra.mxu0 %vm532_vm1, %v4335_v25  ;;  %3369 = vmatprep.mubr.bf16.mxu1 %v6519_v52  ;;  %v3643_v45 = vsel %vm2052_vm10, %v3631_v49, %v3639_v8  ;;  %v3647_v50 = vsel %vm2052_vm10, %v3639_v8, %v3631_v49 }
 0xdf2   : > { %3458 = vmatpush1.bf16.msra.mxu0 %v3422_v41  ;;  %v3519_v40 = vpop.permute.xlu1 %3518  ;;  %3477 = vmatprep.mubr.bf16.mxu0 %v6519_v52  ;;  %v3654_v19 = vmul.f32 %v4429_v31, %v3643_v45  ;;  %v3655_v16 = vmul.f32 %v4430_v21, %v3647_v50  ;;  %v4343_v41 = vld [vmem:[%s6523_s18 + $0x88] sm:$0xff]  }
 0xdf3   : > { %3459 = vmatprep.subr.bf16.mxu0 %v6539_v2  ;;  %v3524_v35 = vsel %vm1925_vm9, %v3511_v33, %v3519_v40  ;;  %v3528_v6 = vsel %vm1925_vm9, %v3519_v40, %v3511_v33  ;;  %v2897_v33 = vpop.f32.mrf.mxu1 }
 0xdf4   : > { %v3534_v47 = vmul.f32 %v3524_v35, %v6540_v34  ;;  %v3535_v63 = vmul.f32 %v3528_v6, %v6541_v27  ;;  %v3517_v28 = vpop.permute.xlu0 %3516 }
 0xdf5   : > { %v3523_v29 = vsel %vm1925_vm9, %v6028_v55, %v3517_v28  ;;  %v3527_v23 = vsel %vm1925_vm9, %v3517_v28, %v6028_v55  ;;  %v2899_v3 = vpop.f32.mrf.mxu1 }
 0xdf6   : > { %v3540_v15 = vpack.c.bf16 %v3536_v22, %v3534_v47  ;;  %3460 = vmatpush1.bf16.msra.mxu0 %v6542_v46  ;;  %v3532_v32 = vmul.f32 %v3523_v29, %v6540_v34  ;;  %v3533_v61 = vmul.f32 %v3527_v23, %v6541_v27  ;;  %v3629_v38 = vpop.permute.xlu1 %3628  ;;  %v3541_v14 = vpack.c.bf16 %v3537_v44, %v3535_v63 }
 0xdf7   : > { %v2901_v37 = vpop.f32.mrf.mxu1 }
 0xdf8   : > { %4077 = vmatmul.mubr.msk.bf16.gmra.mxu1 %vm532_vm1, %v4337_v18  ;;  %3575 = vmatprep.subr.bf16.mxu1 %v3541_v14  ;;  %v3627_v55 = vpop.permute.xlu0 %3626  ;;  %v3539_v10 = vpack.c.bf16 %v3533_v61, %v3531_v43  ;;  %v3538_v39 = vpack.c.bf16 %v3532_v32, %v3530_v53 }
 0xdf9   : > { %4084 = vmatmul.mubr.msk.bf16.vlgmr.msra.gmra.mxu0 %vm532_vm1, %v4338_v12  ;;  %3576 = vmatpush1.bf16.msra.mxu1 %v3540_v15  ;;  %v2903_v56 = vpop.f32.mrf.mxu1 }
 0xdfa   : > { %v3637_v57 = vpop.permute.xlu1 %3636  ;;  %3577 = vmatprep.subr.bf16.mxu1 %v3539_v10  ;;  %3487 = vmatprep.mubr.bf16.mxu0 %v6519_v52 }
 0xdfb   : > { %v3642_v11 = vsel %vm2052_vm10, %v3629_v38, %v3637_v57  ;;  %v3646_v30 = vsel %vm2052_vm10, %v3637_v57, %v3629_v38  ;;  %3595 = vmatprep.mubr.bf16.mxu1 %v6519_v52  ;;  %v2907_v6 = vpop.f32.mrf.mxu1 }
 0xdfc   : > { %v3652_v59 = vmul.f32 %v4429_v31, %v3642_v11  ;;  %v3653_v62 = vmul.f32 %v4430_v21, %v3646_v30  ;;  %v3635_v58 = vpop.permute.xlu0 %3634 }
 0xdfd   : > { %3578 = vmatpush1.bf16.msra.mxu1 %v3538_v39  ;;  %v3641_v9 = vsel %vm2052_vm10, %v3627_v55, %v3635_v58  ;;  %v3645_v0 = vsel %vm2052_vm10, %v3635_v58, %v3627_v55 }
 0xdfe   : > { %v3658_v17 = vpack.c.bf16 %v3654_v19, %v3652_v59  ;;  %v3650_v54 = vmul.f32 %v4429_v31, %v3641_v9  ;;  %v3651_v13 = vmul.f32 %v4430_v21, %v3645_v0  ;;  %v3633_v26 = vpop.permute.xlu1 %3632  ;;  %v3659_v20 = vpack.c.bf16 %v3655_v16, %v3653_v62 }
 0xdff   : > { %v3640_v7 = vsel %vm2052_vm10, %v6070_v1, %v3633_v26  ;;  %v3644_v4 = vsel %vm2052_vm10, %v3633_v26, %v6070_v1  ;;  %v4342_v1 = vld [vmem:[%s6523_s18 + $0x80] sm:$0xff]  }
 0xe00   : > { %v3648_v49 = vmul.f32 %v4429_v31, %v3640_v7  ;;  %v3649_v48 = vmul.f32 %v4430_v21, %v3644_v4  ;;  %4092 = vmatmul.mubr.msk.bf16.vlgmr.msra.gmra.mxu1 %vm532_vm1, %v4340_v36  ;;  %3693 = vmatprep.subr.bf16.mxu0 %v3659_v20 }
 0xe01   : > { %4085 = vmatmul.mubr.msk.bf16.gmra.mxu0 %vm532_vm1, %v4339_v5  ;;  %3605 = vmatprep.mubr.bf16.mxu1 %v6519_v52 }
 0xe02   : > { %v3656_v24 = vpack.c.bf16 %v3650_v54, %v3648_v49  ;;  %3694 = vmatpush1.bf16.msra.mxu0 %v3658_v17  ;;  %v3657_v25 = vpack.c.bf16 %v3651_v13, %v3649_v48  ;;  %3713 = vmatprep.mubr.bf16.mxu0 %v6519_v52 }
 0xe04   : > { %3695 = vmatprep.subr.bf16.mxu0 %v3657_v25 }
 0xe06   : > { %3696 = vmatpush1.bf16.msra.mxu0 %v3656_v24 }
 0xe08   : > { %4093 = vmatmul.mubr.msk.bf16.gmra.mxu1 %vm532_vm1, %v4341_v60 }
 0xe09   : > { %4100 = vmatmul.mubr.msk.bf16.vlgmr.msra.gmra.mxu0 %vm532_vm1, %v4342_v1 }
 0xe0a   : > { %3723 = vmatprep.mubr.bf16.mxu0 %v6519_v52  ;;  %v2909_v52 = vpop.f32.mrf.mxu1 }
 0xe0c   : > { %v6294_v44 = vpop.f32.mrf.mxu1 }
 0xe0e   : > { %v6296_v28 = vpop.f32.mrf.mxu1 }
 0xe11   : > { %4101 = vmatmul.mubr.msk.bf16.gmra.mxu0 %vm532_vm1, %v4343_v41 }
 0xe88   : > { %v2828_v8 = vpop.f32.mrf.mxu0 }
 0xe89   : > { %v2898_v0 = vadd.f32 %v2897_v33, %v2828_v8 }
 0xe8a   : > { %v2830_v42 = vpop.f32.mrf.mxu0 }
 0xe8b   : > { %v2900_v54 = vadd.f32 %v2899_v3, %v2830_v42 }
 0xe8c   : > { %v2832_v51 = vpop.f32.mrf.mxu0 }
 0xe8d   : > { %v2902_v7 = vadd.f32 %v2901_v37, %v2832_v51 }
 0xe8e   : > { %v2834_v40 = vpop.f32.mrf.mxu0 }
 0xe8f   : > { %v2904_v25 = vadd.f32 %v2903_v56, %v2834_v40 }
 0xe90   : > { %v2838_v2 = vpop.f32.mrf.mxu0 }
 0xe92   : > { %v6288_v35 = vpop.f32.mrf.mxu0 }
 0xe94   : > { %v6290_v34 = vpop.f32.mrf.mxu0 }
 0xe95   : > { %v2912_v56 = vadd.f32 %v6294_v44, %v6290_v34 }
 0xe96   : > { %v6292_v22 = vpop.f32.mrf.mxu0 }
 0xe98   : > { %v3007_v27 = vpop.f32.mrf.mxu0 }
 0xe99   : > { %v3026_v13 = vadd.f32 %v3007_v27, %v2898_v0  ;;  %v2910_v27 = vadd.f32 %v2909_v52, %v6288_v35  ;;  %v2914_v35 = vadd.f32 %v6296_v28, %v6292_v22 }
 0xe9a   : > { %v3009_v47 = vpop.f32.mrf.mxu0 }
 0xe9b   : > { %v3027_v4 = vadd.f32 %v3009_v47, %v2900_v54 }
 0xe9c   : > { %v3011_v63 = vpop.f32.mrf.mxu0 }
 0xe9d   : > { %v3028_v60 = vadd.f32 %v3011_v63, %v2902_v7 }
 0xe9e   : > { %v3013_v18 = vpop.f32.mrf.mxu0 }
 0xe9f   : > { %v3029_v8 = vadd.f32 %v3013_v18, %v2904_v25 }
 0xea0   : > { %v3017_v43 = vpop.f32.mrf.mxu0  ;;  %v3125_v29 = vpop.f32.mrf.mxu1 }
 0xea1   : > { %v3144_v49 = vadd.f32 %v3125_v29, %v3026_v13 }
 0xea2   : > { %v3019_v23 = vpop.f32.mrf.mxu0  ;;  %v3127_v12 = vpop.f32.mrf.mxu1 }
 0xea3   : > { %v3145_v1 = vadd.f32 %v3127_v12, %v3027_v4  ;;  %v3031_v63 = vadd.f32 %v3019_v23, %v2910_v27 }
 0xea4   : > { %v6298_v15 = vpop.f32.mrf.mxu0  ;;  %v3129_v46 = vpop.f32.mrf.mxu1 }
 0xea5   : > { %v3032_v52 = vadd.f32 %v6298_v15, %v2912_v56 }
 0xea6   : > { %v6300_v32 = vpop.f32.mrf.mxu0  ;;  %v3131_v61 = vpop.f32.mrf.mxu1 }
 0xea7   : > { %v3147_v51 = vadd.f32 %v3131_v61, %v3029_v8  ;;  %v3033_v23 = vadd.f32 %v6300_v32, %v2914_v35  ;;  %v4432_v8 = vld [vmem:[%s4777_s25 + $0x8] sm:$0xff] }
 0xea8   : > { %v3135_v38 = vpop.f32.mrf.mxu1 }
 0xea9   : > { %v3243_v14 = vpop.f32.mrf.mxu0 }
 0xeaa   : > { %v3137_v53 = vpop.f32.mrf.mxu1  ;;  %v3262_v41 = vadd.f32 %v3243_v14, %v3144_v49 }
 0xeab   : > { %v3245_v55 = vpop.f32.mrf.mxu0 }
 0xeac   : > { %v6302_v10 = vpop.f32.mrf.mxu1 }
 0xead   : > { %v3247_v45 = vpop.f32.mrf.mxu0 }
 0xeae   : > { %v6304_v50 = vpop.f32.mrf.mxu1 }
 0xeaf   : > { %v3249_v39 = vpop.f32.mrf.mxu0 }
 0xeb0   : > { %v3361_v57 = vpop.f32.mrf.mxu1  ;;  %v3265_v18 = vadd.f32 %v3249_v39, %v3147_v51 }
 0xeb1   : > { %v3253_v11 = vpop.f32.mrf.mxu0  ;;  %v3380_v3 = vadd.f32 %v3361_v57, %v3262_v41  ;;  %v3745_v57 = vpop.permute.xlu1 %3744 }
 0xeb2   : > { %v3363_v30 = vpop.f32.mrf.mxu1 }
 0xeb3   : > { %v3255_v31 = vpop.f32.mrf.mxu0 }
 0xeb4   : > { %v3365_v19 = vpop.f32.mrf.mxu1 }
 0xeb5   : > { %v6306_v21 = vpop.f32.mrf.mxu0 }
 0xeb6   : > { %6543 = vst [vmem:[#allocation30_spill] sm:$0xff] %v6306_v21  ;;  %v3367_v16 = vpop.f32.mrf.mxu1  ;;  %v3263_v21 = vadd.f32 %v3245_v55, %v3145_v1  ;;  %v4431_v1 = vld [vmem:[%s4777_s25] sm:$0xff] }
 0xeb7   : > { %v6308_v59 = vpop.f32.mrf.mxu0 }
 0xeb8   : > { %6544 = vst [vmem:[#allocation29_spill] sm:$0xff] %v6308_v59  ;;  %v3371_v62 = vpop.f32.mrf.mxu1  ;;  %v3381_v29 = vadd.f32 %v3363_v30, %v3263_v21  ;;  %v3383_v30 = vadd.f32 %v3367_v16, %v3265_v18 }
 0xeb9   : > { %v3479_v58 = vpop.f32.mrf.mxu0 }
 0xeba   : > { %v6310_v36 = vpop.f32.mrf.mxu1  ;;  %v3498_v54 = vadd.f32 %v3479_v58, %v3380_v3 }
 0xebb   : > { %6545 = vst [vmem:[#allocation32_spill] sm:$0xff] %v6310_v36  ;;  %v3481_v9 = vpop.f32.mrf.mxu0  ;;  %v2908_v36 = vadd.f32 %v2907_v6, %v2838_v2 }
 0xebc   : > { %v6312_v5 = vpop.f32.mrf.mxu1 }
 0xebd   : > { %6546 = vst [vmem:[#allocation31_spill] sm:$0xff] %v6312_v5  ;;  %v3483_v17 = vpop.f32.mrf.mxu0  ;;  %v3146_v5 = vadd.f32 %v3129_v46, %v3028_v60  ;;  %v3030_v0 = vadd.f32 %v3017_v43, %v2908_v36  ;;  %v3499_v46 = vadd.f32 %v3481_v9, %v3381_v29  ;;  %v3149_v43 = vadd.f32 %v3137_v53, %v3031_v63  ;;  %v6547_v9 = vld [vmem:[#allocation30_spill] sm:$0xff] }
 0xebe   : > { %v6314_v26 = vpop.f32.mrf.mxu1 }
 0xebf   : > { %v3485_v20 = vpop.f32.mrf.mxu0  ;;  %v3264_v47 = vadd.f32 %v3247_v45, %v3146_v5  ;;  %v3148_v2 = vadd.f32 %v3135_v38, %v3030_v0  ;;  %v3150_v38 = vadd.f32 %v6302_v10, %v3032_v52  ;;  %v3267_v39 = vadd.f32 %v3255_v31, %v3149_v43  ;;  %v3750_v10 = vpop.permute.xlu0 %3749  ;;  %v6549_v7 = vld [vmem:[#allocation29_spill] sm:$0xff] }
 0xec0   : > { %v3597_v48 = vpop.f32.mrf.mxu1  ;;  %v3501_v22 = vadd.f32 %v3485_v20, %v3383_v30  ;;  %v4435_v30 = vld [vmem:[%s4777_s25 + $0x20] sm:$0xff] }
 0xec1   : > { %v3489_v24 = vpop.f32.mrf.mxu0  ;;  %v3382_v12 = vadd.f32 %v3365_v19, %v3264_v47  ;;  %v3616_v14 = vadd.f32 %v3597_v48, %v3498_v54  ;;  %v3266_v61 = vadd.f32 %v3253_v11, %v3148_v2  ;;  %v3151_v11 = vadd.f32 %v6304_v50, %v3033_v23  ;;  %v3755_v47 = vpop.permute.xlu1 %3754 }
 0xec2   : > { %v3599_v59 = vpop.f32.mrf.mxu1  ;;  %v3268_v16 = vadd.f32 %v6547_v9, %v3150_v38 }
 0xec3   : > { %v3491_v33 = vpop.f32.mrf.mxu0  ;;  %v3500_v21 = vadd.f32 %v3483_v17, %v3382_v12  ;;  %v3617_v34 = vadd.f32 %v3599_v59, %v3499_v46  ;;  %v3384_v19 = vadd.f32 %v3371_v62, %v3266_v61  ;;  %v6548_v59 = vld [vmem:[#allocation32_spill] sm:$0xff]  ;;  %v3269_v20 = vadd.f32 %v6549_v7, %v3151_v11 }
 0xec4   : > { %v3601_v42 = vpop.f32.mrf.mxu1  ;;  %v3385_v5 = vadd.f32 %v6548_v59, %v3267_v39  ;;  %v6550_v4 = vld [vmem:[#allocation31_spill] sm:$0xff]  ;;  %v4433_v12 = vld [vmem:[%s4777_s25 + $0x10] sm:$0xff] }
 0xec5   : > { %v3493_v37 = vpop.f32.mrf.mxu0  ;;  %v3618_v28 = vadd.f32 %v3601_v42, %v3500_v21  ;;  %v3502_v32 = vadd.f32 %v3489_v24, %v3384_v19  ;;  %v3386_v49 = vadd.f32 %v6550_v4, %v3268_v16  ;;  %v3387_v27 = vadd.f32 %v6314_v26, %v3269_v20 }
 0xec6   : > { %v3603_v40 = vpop.f32.mrf.mxu1  ;;  %v3503_v48 = vadd.f32 %v3491_v33, %v3385_v5 }
 0xec7   : > { %v3495_v6 = vpop.f32.mrf.mxu0  ;;  %v3619_v13 = vadd.f32 %v3603_v40, %v3501_v22  ;;  %v3504_v0 = vadd.f32 %v3493_v37, %v3386_v49  ;;  %v4434_v37 = vld [vmem:[%s4777_s25 + $0x18] sm:$0xff] }
 0xec8   : > { %v3607_v55 = vpop.f32.mrf.mxu1  ;;  %v3505_v56 = vadd.f32 %v3495_v6, %v3387_v27  ;;  %v4438_v22 = vld [vmem:[%s4777_s25 + $0x38] sm:$0xff] }
 0xec9   : > { %v3715_v45 = vpop.f32.mrf.mxu0  ;;  %v3620_v25 = vadd.f32 %v3607_v55, %v3502_v32 }
 0xeca   : > { %v3734_v44 = vadd.f32 %v3715_v45, %v3616_v14  ;;  %v3609_v58 = vpop.f32.mrf.mxu1  ;;  %v3760_v45 = vpop.permute.xlu0 %3759 }
 0xecb   : > { %v3717_v36 = vpop.f32.mrf.mxu0  ;;  %v3621_v29 = vadd.f32 %v3609_v58, %v3503_v48  ;;  %v4437_v58 = vld [vmem:[%s4777_s25 + $0x30] sm:$0xff] }
 0xecc   : > { %v3762_v15 = vadd.f32 %v3745_v57, %v3734_v44  ;;  %v3735_v53 = vadd.f32 %v3717_v36, %v3617_v34  ;;  %v3611_v50 = vpop.f32.mrf.mxu1  ;;  %v4436_v34 = vld [vmem:[%s4777_s25 + $0x28] sm:$0xff] }
 0xecd   : > { %v3719_v17 = vpop.f32.mrf.mxu0  ;;  %v3622_v63 = vadd.f32 %v3611_v50, %v3504_v0 }
 0xece   : > { %v3763_v31 = vadd.f32 %v3745_v57, %v3735_v53  ;;  %v3736_v62 = vadd.f32 %v3719_v17, %v3618_v28  ;;  %v3770_v41 = vadd.f32 %v4431_v1, %v3762_v15  ;;  %v3613_v2 = vpop.f32.mrf.mxu1 }
 0xecf   : > { %v3721_v60 = vpop.f32.mrf.mxu0  ;;  %v3623_v52 = vadd.f32 %v3613_v2, %v3505_v56 }
 0xed0   : > { %v3771_v3 = vadd.f32 %v4432_v8, %v3763_v31  ;;  %v3764_v42 = vadd.f32 %v3750_v10, %v3736_v62  ;;  %v3737_v24 = vadd.f32 %v3721_v60, %v3619_v13 }
 0xed1   : > { %v3725_v51 = vpop.f32.mrf.mxu0 }
 0xed2   : > { %v4113_v54 = vpack.c.bf16 %v3771_v3, %v3770_v41  ;;  %v3765_v40 = vadd.f32 %v3750_v10, %v3737_v24  ;;  %v3738_v33 = vadd.f32 %v3725_v51, %v3620_v25  ;;  %v3772_v26 = vadd.f32 %v4433_v12, %v3764_v42 }
 0xed3   : > { %v3727_v18 = vpop.f32.mrf.mxu0 }
 0xed4   : > { %3802 = vst [vmem:[%s6333_s22] sm:$0xff] %v4113_v54  ;;  %v3773_v46 = vadd.f32 %v4434_v37, %v3765_v40  ;;  %v3766_v14 = vadd.f32 %v3755_v47, %v3738_v33  ;;  %v3739_v55 = vadd.f32 %v3727_v18, %v3621_v29 }
 0xed5   : > { %v3729_v35 = vpop.f32.mrf.mxu0 }
 0xed6   : > { %v4114_v6 = vpack.c.bf16 %v3773_v46, %v3772_v26  ;;  %v3767_v43 = vadd.f32 %v3755_v47, %v3739_v55  ;;  %v3740_v61 = vadd.f32 %v3729_v35, %v3622_v63  ;;  %v3774_v21 = vadd.f32 %v4435_v30, %v3766_v14 }
 0xed7   : > { %v3731_v57 = vpop.f32.mrf.mxu0 }
 0xed8   : > { %3803 = vst [vmem:[%s6333_s22 + $0x8] sm:$0xff] %v4114_v6  ;;  %v3775_v44 = vadd.f32 %v4436_v34, %v3767_v43  ;;  %v3768_v23 = vadd.f32 %v3760_v45, %v3740_v61  ;;  %v3741_v38 = vadd.f32 %v3731_v57, %v3623_v52 }
 0xeda   : > { %v4115_v39 = vpack.c.bf16 %v3775_v44, %v3774_v21  ;;  %v3769_v19 = vadd.f32 %v3760_v45, %v3741_v38  ;;  %v3776_v36 = vadd.f32 %v4437_v58, %v3768_v23 }
 0xedc   : > { %3804 = vst [vmem:[%s6333_s22 + $0x10] sm:$0xff] %v4115_v39  ;;  %v3777_v28 = vadd.f32 %v4438_v22, %v3769_v19 }
 0xede   : > { %v4116_v15 = vpack.c.bf16 %v3777_v28, %v3776_v36 }
 0xee0   : > { %3805 = vst [vmem:[%s6333_s22 + $0x18] sm:$0xff] %v4116_v15 }
 0xee1   : > { %4506 = shalt.err (!%p4503_p5)
}
 0xee2   : > { %s4507_s25 = scalar_lea.hbm %s6351_s12, 512  ;;  %s4511_s14 = scalar_lea.hbm %s6551_s21, 1024 }
 0xee3   : > { %p4508_p2 = scmp.ne.s32.totalorder %s6351_s12, %s4507_s25  ;;  %p4512_p6 = scmp.lt.s32.totalorder %s6351_s12, %s6551_s21 }
 0xee4   : > { %p4513_p8 = scmp.lt.s32.totalorder %s4511_s14, %s4507_s25 }
 0xee5   : > { %p4509_p1 = pnand %p4508_p2, %p6552_p7 }
 0xee6   : > { %p4514_p3 = por %p4513_p8, %p4512_p6 }
 0xee7   : > { %p4510_p4 = pneg %p4509_p1 }
 0xee9   : > { %p4515_p11 = pnand %p4514_p3, %p4510_p4 }
 0xeeb   : > { %4518 = shalt.err (!%p4515_p11)
}
 0xeec   : > { %s4579_s13 = smov 128   ;;  %s4580_s19 = smov 8  }
 0xeed   : > { %4240 = dma.vmem_to_hbm [thread:$0]  (%p6552_p7), %s6343_s11, 512, %s6351_s12, %s3807_s2, %s4579_s13, %s4579_s13, %s4580_s19  }
 0xeee PF: > { %s6553_s23 = sld [smem:[#allocation11_spill]]  ;;  %p6556_p10 = scmp.ge.s32.totalorder %s4561_s28, 2 }
 0xeef   : > { %s6554_s22 = sld [smem:[#allocation12_spill]] }
 0xef4   : > { %s3835_s24 = sand.u32 1, %s6553_s23  }
 0xef5   : > { %p6555_p9 = scmp.ne.s32.totalorder %s6554_s22, 0  ;;  %s3836_s25 = scalar_lea.sflag [#allocation4], %s3835_s24 }
 0xef7   : > { %p4251_p12 = pnand %p6556_p10, %p6555_p9 }
 0xef9   : > { %p4252_p13 = pneg %p4251_p12 }
 0xefb   : > { %4544 = dma.done.wait (%p4252_p13), %s3836_s25, 512  }
 0xefc   : > { %4546 = vsyncadd (%p4252_p13), %s3836_s25, 4294966784  ;;  %s6557_s28 = sld [smem:[#allocation13_spill]]  ;;  %s6558_s25 = smov %s4553_s26 }
 0xefd   : > { %s6559_s26 = smov %s4557_s27  ;;  %s6560_s27 = smov %s4725_s20 }
 0xf02   : > { %p27_p0 = scmp.ge.s32.totalorder %s6557_s28, 4  }
 0xf04   :  { %29 = sbr.rel (!%p27_p0) target bundleno = 11 (0xb), region = 140 }
 0xf09   :  { %3841 = vsyncpa [#allocation3], 1 }
 0xf0a   :  { %3843 = vsyncpa [#allocation3 + $0x1], 1 }
 0xf0b   :  { %3844 = vsyncpa [#allocation6], 1 }
 0xf0c   :  { %3845 = vsyncpa [#allocation4], 1 }
 0xf0d   :  { %3847 = vsyncpa [#allocation4 + $0x1], 1 }

</bundles_post_ra>
